<compile_context>
chip_gen: v7x
topology: tpu7x:2x2x1
jax: 0.10.0
libtpu: 0.0.40
codegen_flags: <defaults>
</compile_context>

<pallas_src>
import math

import jax
import jax.numpy as jnp
from jax import lax
from jax.experimental import pallas as pl
from jax.experimental.pallas import tpu as pltpu

LN_EPS = 1e-5  # torch.nn.LayerNorm default


def _layernorm(h, gamma, beta):
    """Single-pass LayerNorm: both row reductions issued independently so the
    two XLU reductions can overlap.
    TODO(synk): E[x^2]-E[x]^2 can lose precision if trained weights push
    |mean| >> std; switch to two-pass if drift vs. torch appears."""
    n = h.shape[-1]
    inv_n = 1.0 / float(n)
    s = jnp.sum(h, axis=-1, keepdims=True)        # XLU reduction #1
    ss = jnp.sum(h * h, axis=-1, keepdims=True)   # XLU reduction #2 (independent)
    mu = s * inv_n
    var = jnp.maximum(ss * inv_n - mu * mu, 0.0)  # biased variance (torch LN)
    return (h - mu) * lax.rsqrt(var + LN_EPS) * gamma + beta


def critic_kernel(x_ref,
                  w1_ref, b1_ref, g1_ref, be1_ref,
                  w2_ref, b2_ref, g2_ref, be2_ref,
                  w3_ref, b3_ref,
                  out_ref):
    # Activations are cast to the (possibly pre-cast bf16) weight dtype so the
    # MXU sees native operands; weights arrive already in their matmul dtype
    # (prepare_params) so there is no per-step weight cast. Accumulation is f32.
    # TODO(synk): for exact torch-f32 parity pass precision=lax.Precision.HIGHEST
    # to the dots on the f32 path; default precision already passes 1e-3 here.
    x = x_ref[...]
    if x.dtype != w1_ref.dtype:
        x = x.astype(w1_ref.dtype)

    # fc1 + LayerNorm + ReLU
    h = jnp.dot(x, w1_ref[...], preferred_element_type=jnp.float32) + b1_ref[...]
    h = jnp.maximum(_layernorm(h, g1_ref[...], be1_ref[...]), 0.0)

    # fc2 + LayerNorm + ReLU
    h_in = h if h.dtype == w2_ref.dtype else h.astype(w2_ref.dtype)
    h = jnp.dot(h_in, w2_ref[...], preferred_element_type=jnp.float32) + b2_ref[...]
    h = jnp.maximum(_layernorm(h, g2_ref[...], be2_ref[...]), 0.0)

    # Value head Linear(fc2, 1): VPU multiply + XLU lane-reduction (keeps the
    # N=1 matmul off the MXU, which would use a single systolic column).
    v = jnp.sum(h * w3_ref[...], axis=-1, keepdims=True) + b3_ref[...]  # [bm, 1]

    # Direct [block_m, 1] store: ~block_m*4 bytes of HBM writeback per tile
    # (vs. the previous 128-lane slab -> 128x less output traffic, and no
    # wrapper-side slab re-read).
    out_ref[...] = v.astype(out_ref.dtype)


def _resident_spec(arr):
    """Constant-index BlockSpec: whole array, same block for every grid step,
    so it stays VMEM-resident across the grid (only x is re-DMA'd per step)."""
    return pl.BlockSpec(arr.shape, lambda i: (0, 0))


def _tiling_for_batch(B, max_block_m=512):
    """Pick (block_m, n_tiles). Small batches: one full tile (no padding, no
    cross-TC split). Large batches: ~max_block_m rows per tile with an even
    tile count so ("parallel",) feeds both v7x TensorCores."""
    if B <= max_block_m:
        return B, 1
    n_tiles = math.ceil(B / max_block_m)
    if n_tiles % 2:
        n_tiles += 1
    block_m = math.ceil(math.ceil(B / n_tiles) / 8) * 8
    return block_m, n_tiles


def critic_forward(state, params, *, block_m=None):
    """state: [B, input_dims] float32 -> value: [B, 1] float32."""
    (w1, b1, g1, be1, w2, b2, g2, be2, w3, b3) = params
    B, K = state.shape

    if block_m is None:
        block_m, n_tiles = _tiling_for_batch(B)
    else:
        n_tiles = math.ceil(B / block_m)
    B_pad = block_m * n_tiles

    # Only per-call op that touches data: pad the batch up to the tile grid.
    # Padded rows are zeros (LN stays finite via eps) and are sliced off below.
    x = state if B_pad == B else jnp.pad(state, ((0, B_pad - B), (0, 0)))

    out = pl.pallas_call(
        critic_kernel,
        out_shape=jax.ShapeDtypeStruct((B_pad, 1), jnp.float32),
        grid_spec=pltpu.PrefetchScalarGridSpec(
            num_scalar_prefetch=0,
            grid=(n_tiles,),
            in_specs=[
                # x tile: real K (block last dim == full array extent -> legal),
                # the only per-step DMA.
                pl.BlockSpec((block_m, K), lambda i: (i, 0)),
                _resident_spec(w1), _resident_spec(b1),
                _resident_spec(g1), _resident_spec(be1),
                _resident_spec(w2), _resident_spec(b2),
                _resident_spec(g2), _resident_spec(be2),
                _resident_spec(w3), _resident_spec(b3),
            ],
            out_specs=pl.BlockSpec((block_m, 1), lambda i: (i, 0)),
        ),
        compiler_params=pltpu.CompilerParams(
            dimension_semantics=("parallel",)),
    )(x, w1, b1, g1, be1, w2, b2, g2, be2, w3, b3)

    return out if B_pad == B else out[:B]


def init_params(key, input_dims, fc1_dims, fc2_dims):
    ks = jax.random.split(key, 6)

    def lin(kw, kb, fan_in, fan_out):
        bound = 1.0 / jnp.sqrt(fan_in)
        w = jax.random.uniform(kw, (fan_in, fan_out), jnp.float32, -bound, bound)
        b = jax.random.uniform(kb, (1, fan_out), jnp.float32, -bound, bound)
        return w, b

    w1, b1 = lin(ks[0], ks[1], input_dims, fc1_dims)
    w2, b2 = lin(ks[2], ks[3], fc1_dims, fc2_dims)
    w3_col, b3 = lin(ks[4], ks[5], fc2_dims, 1)
    w3 = w3_col.T  # value-head weight stored as a [1, fc2] row for the kernel
    g1, be1 = jnp.ones((1, fc1_dims), jnp.float32), jnp.zeros((1, fc1_dims), jnp.float32)
    g2, be2 = jnp.ones((1, fc2_dims), jnp.float32), jnp.zeros((1, fc2_dims), jnp.float32)
    return (w1, b1, g1, be1, w2, b2, g2, be2, w3, b3)


def prepare_params(params, *, matmul_dtype=None):
    """One-time param prep (off the per-call dispatch path).

    Optionally pre-casts the big matmul weights (w1, w2) to `matmul_dtype`
    (jnp.bfloat16 recommended on v5e/v6e/v7x — their MXUs are bf16-native).
    Biases, LN params and the tiny value head stay f32 since that math runs on
    the VPU/XLU in f32 (v5e's VPU has no bf16)."""
    if matmul_dtype is None:
        return params
    (w1, b1, g1, be1, w2, b2, g2, be2, w3, b3) = params
    return (w1.astype(matmul_dtype), b1, g1, be1,
            w2.astype(matmul_dtype), b2, g2, be2, w3, b3)


def critic_forward_ref(state, params):
    """Pure-JAX reference matching torch semantics (two-pass LN, f32)."""
    (w1, b1, g1, be1, w2, b2, g2, be2, w3, b3) = params

    def ln(h, g, be):
        mu = jnp.mean(h, axis=-1, keepdims=True)
        var = jnp.mean((h - mu) * (h - mu), axis=-1, keepdims=True)
        return (h - mu) / jnp.sqrt(var + LN_EPS) * g + be

    h = jnp.maximum(ln(state @ w1 + b1, g1, be1), 0.0)
    h = jnp.maximum(ln(h @ w2 + b2, g2, be2), 0.0)
    return h @ w3.T + b3  # w3 is the [1, fc2] row form


if __name__ == "__main__":
    # Small shapes consistent with the module: input_dims=(32,), fc1=fc2=256
    # (the real module defaults to 2048; for fc=2048 prefer the bf16 weight
    # path and/or a higher vmem_limit_bytes).
    B, INPUT_DIMS, FC1, FC2 = 200, 32, 256, 256

    key = jax.random.PRNGKey(0)
    k_param, k_state, k_state2 = jax.random.split(key, 3)
    params = init_params(k_param, INPUT_DIMS, FC1, FC2)

    # f32 path (default), small batch -> single full-batch tile, no padding.
    state = jax.random.normal(k_state, (B, INPUT_DIMS), jnp.float32)
    value = jax.block_until_ready(critic_forward(state, params))
    ref = critic_forward_ref(state, params)
    assert value.shape == (B, 1)
    assert jnp.allclose(value, ref, atol=1e-3, rtol=1e-3), (value, ref)

    # Larger batch -> exercises batch padding and an even 2-step "parallel"
    # grid (both v7x TensorCores get a tile).
    B2 = 1000
    state2 = jax.random.normal(k_state2, (B2, INPUT_DIMS), jnp.float32)
    value2 = jax.block_until_ready(critic_forward(state2, params))
    ref2 = critic_forward_ref(state2, params)
    assert value2.shape == (B2, 1)
    assert jnp.allclose(value2, ref2, atol=1e-3, rtol=1e-3)

    # bf16-operand path (weights pre-cast ONCE; f32 accumulation + f32 LN),
    # validated with a looser tolerance as it intentionally trades precision.
    params_bf16 = prepare_params(params, matmul_dtype=jnp.bfloat16)
    value_bf16 = jax.block_until_ready(critic_forward(state, params_bf16))
    assert value_bf16.shape == (B, 1)
    assert jnp.all(jnp.isfinite(value_bf16))
    assert jnp.allclose(value_bf16, ref, atol=1e-1, rtol=1e-1)

    print("KERNEL_OK")
</pallas_src>

<mosaic_0001>
module attributes {stable_mosaic.version = 11 : i64} {
  func.func @critic_kernel(%arg0: i32, %arg1: memref<200x32xf32, #tpu.memory_space<vmem>>, %arg2: memref<32x256xf32, #tpu.memory_space<vmem>>, %arg3: memref<1x256xf32, #tpu.memory_space<vmem>>, %arg4: memref<1x256xf32, #tpu.memory_space<vmem>>, %arg5: memref<1x256xf32, #tpu.memory_space<vmem>>, %arg6: memref<256x256xf32, #tpu.memory_space<vmem>>, %arg7: memref<1x256xf32, #tpu.memory_space<vmem>>, %arg8: memref<1x256xf32, #tpu.memory_space<vmem>>, %arg9: memref<1x256xf32, #tpu.memory_space<vmem>>, %arg10: memref<1x256xf32, #tpu.memory_space<vmem>>, %arg11: memref<1x1xf32, #tpu.memory_space<vmem>>, %arg12: memref<200x1xf32, #tpu.memory_space<vmem>>) attributes {dimension_semantics = [#tpu.dimension_semantics<parallel>], iteration_bounds = array<i64: 1>, scalar_prefetch = 0 : i64, scratch_operands = 0 : i64, tpu.core_type = #tpu.core_type<tc>, window_params = [{transform_indices = @transform_0, window_bounds = array<i64: 200, 32>}, {pipeline_mode = #tpu.pipeline_mode<synchronous>, transform_indices = @transform_1, window_bounds = array<i64: 32, 256>}, {pipeline_mode = #tpu.pipeline_mode<synchronous>, transform_indices = @transform_2, window_bounds = array<i64: 1, 256>}, {pipeline_mode = #tpu.pipeline_mode<synchronous>, transform_indices = @transform_3, window_bounds = array<i64: 1, 256>}, {pipeline_mode = #tpu.pipeline_mode<synchronous>, transform_indices = @transform_4, window_bounds = array<i64: 1, 256>}, {pipeline_mode = #tpu.pipeline_mode<synchronous>, transform_indices = @transform_5, window_bounds = array<i64: 256, 256>}, {pipeline_mode = #tpu.pipeline_mode<synchronous>, transform_indices = @transform_6, window_bounds = array<i64: 1, 256>}, {pipeline_mode = #tpu.pipeline_mode<synchronous>, transform_indices = @transform_7, window_bounds = array<i64: 1, 256>}, {pipeline_mode = #tpu.pipeline_mode<synchronous>, transform_indices = @transform_8, window_bounds = array<i64: 1, 256>}, {pipeline_mode = #tpu.pipeline_mode<synchronous>, transform_indices = @transform_9, window_bounds = array<i64: 1, 256>}, {pipeline_mode = #tpu.pipeline_mode<synchronous>, transform_indices = @transform_10, window_bounds = array<i64: 1, 1>}, {transform_indices = @transform_11, window_bounds = array<i64: 200, 1>}]} {
    %c0 = arith.constant 0 : index
    %c0_0 = arith.constant 0 : index
    %0 = vector.load %arg1[%c0, %c0_0] : memref<200x32xf32, #tpu.memory_space<vmem>>, vector<200x32xf32>
    %c0_1 = arith.constant 0 : index
    %c0_2 = arith.constant 0 : index
    %1 = vector.load %arg2[%c0_1, %c0_2] : memref<32x256xf32, #tpu.memory_space<vmem>>, vector<32x256xf32>
    %cst = arith.constant dense<0.000000e+00> : vector<200x256xf32>
    %2 = tpu.matmul %0, %1, %cst {dimension_numbers = #tpu.dot_dimension_numbers<[1], [0], [0], [1], [0, 0, 1, 1], [], []>} : vector<200x32xf32>, vector<32x256xf32>, vector<200x256xf32> -> vector<200x256xf32>
    %c0_3 = arith.constant 0 : index
    %c0_4 = arith.constant 0 : index
    %3 = vector.load %arg3[%c0_3, %c0_4] : memref<1x256xf32, #tpu.memory_space<vmem>>, vector<1x256xf32>
    %4 = vector.broadcast %3 : vector<1x256xf32> to vector<200x256xf32>
    %5 = arith.addf %2, %4 : vector<200x256xf32>
    %c0_5 = arith.constant 0 : index
    %c0_6 = arith.constant 0 : index
    %6 = vector.load %arg4[%c0_5, %c0_6] : memref<1x256xf32, #tpu.memory_space<vmem>>, vector<1x256xf32>
    %c0_7 = arith.constant 0 : index
    %c0_8 = arith.constant 0 : index
    %7 = vector.load %arg5[%c0_7, %c0_8] : memref<1x256xf32, #tpu.memory_space<vmem>>, vector<1x256xf32>
    %cst_9 = arith.constant dense<0.000000e+00> : vector<200xf32>
    %8 = vector.multi_reduction <add>, %5, %cst_9 [1] : vector<200x256xf32> to vector<200xf32>
    %9 = vector.shape_cast %8 : vector<200xf32> to vector<200x1xf32>
    %10 = arith.mulf %5, %5 : vector<200x256xf32>
    %cst_10 = arith.constant dense<0.000000e+00> : vector<200xf32>
    %11 = vector.multi_reduction <add>, %10, %cst_10 [1] : vector<200x256xf32> to vector<200xf32>
    %12 = vector.shape_cast %11 : vector<200xf32> to vector<200x1xf32>
    %cst_11 = arith.constant 3.906250e-03 : f32
    %13 = vector.broadcast %cst_11 : f32 to vector<200x1xf32>
    %14 = arith.mulf %9, %13 : vector<200x1xf32>
    %cst_12 = arith.constant 3.906250e-03 : f32
    %15 = vector.broadcast %cst_12 : f32 to vector<200x1xf32>
    %16 = arith.mulf %12, %15 : vector<200x1xf32>
    %17 = arith.mulf %14, %14 : vector<200x1xf32>
    %18 = arith.subf %16, %17 : vector<200x1xf32>
    %cst_13 = arith.constant 0.000000e+00 : f32
    %19 = vector.broadcast %cst_13 : f32 to vector<200x1xf32>
    %20 = arith.maximumf %18, %19 : vector<200x1xf32>
    %21 = vector.broadcast %14 : vector<200x1xf32> to vector<200x256xf32>
    %22 = arith.subf %5, %21 : vector<200x256xf32>
    %cst_14 = arith.constant 9.99999974E-6 : f32
    %23 = vector.broadcast %cst_14 : f32 to vector<200x1xf32>
    %24 = arith.addf %20, %23 : vector<200x1xf32>
    %25 = math.rsqrt %24 : vector<200x1xf32>
    %26 = vector.broadcast %25 : vector<200x1xf32> to vector<200x256xf32>
    %27 = arith.mulf %22, %26 : vector<200x256xf32>
    %28 = vector.broadcast %6 : vector<1x256xf32> to vector<200x256xf32>
    %29 = arith.mulf %27, %28 : vector<200x256xf32>
    %30 = vector.broadcast %7 : vector<1x256xf32> to vector<200x256xf32>
    %31 = arith.addf %29, %30 : vector<200x256xf32>
    %cst_15 = arith.constant 0.000000e+00 : f32
    %32 = vector.broadcast %cst_15 : f32 to vector<200x256xf32>
    %33 = arith.maximumf %31, %32 : vector<200x256xf32>
    %c0_16 = arith.constant 0 : index
    %c0_17 = arith.constant 0 : index
    %34 = vector.load %arg6[%c0_16, %c0_17] : memref<256x256xf32, #tpu.memory_space<vmem>>, vector<256x256xf32>
    %cst_18 = arith.constant dense<0.000000e+00> : vector<200x256xf32>
    %35 = tpu.matmul %33, %34, %cst_18 {dimension_numbers = #tpu.dot_dimension_numbers<[1], [0], [0], [1], [0, 0, 1, 1], [], []>} : vector<200x256xf32>, vector<256x256xf32>, vector<200x256xf32> -> vector<200x256xf32>
    %c0_19 = arith.constant 0 : index
    %c0_20 = arith.constant 0 : index
    %36 = vector.load %arg7[%c0_19, %c0_20] : memref<1x256xf32, #tpu.memory_space<vmem>>, vector<1x256xf32>
    %37 = vector.broadcast %36 : vector<1x256xf32> to vector<200x256xf32>
    %38 = arith.addf %35, %37 : vector<200x256xf32>
    %c0_21 = arith.constant 0 : index
    %c0_22 = arith.constant 0 : index
    %39 = vector.load %arg8[%c0_21, %c0_22] : memref<1x256xf32, #tpu.memory_space<vmem>>, vector<1x256xf32>
    %c0_23 = arith.constant 0 : index
    %c0_24 = arith.constant 0 : index
    %40 = vector.load %arg9[%c0_23, %c0_24] : memref<1x256xf32, #tpu.memory_space<vmem>>, vector<1x256xf32>
    %cst_25 = arith.constant dense<0.000000e+00> : vector<200xf32>
    %41 = vector.multi_reduction <add>, %38, %cst_25 [1] : vector<200x256xf32> to vector<200xf32>
    %42 = vector.shape_cast %41 : vector<200xf32> to vector<200x1xf32>
    %43 = arith.mulf %38, %38 : vector<200x256xf32>
    %cst_26 = arith.constant dense<0.000000e+00> : vector<200xf32>
    %44 = vector.multi_reduction <add>, %43, %cst_26 [1] : vector<200x256xf32> to vector<200xf32>
    %45 = vector.shape_cast %44 : vector<200xf32> to vector<200x1xf32>
    %cst_27 = arith.constant 3.906250e-03 : f32
    %46 = vector.broadcast %cst_27 : f32 to vector<200x1xf32>
    %47 = arith.mulf %42, %46 : vector<200x1xf32>
    %cst_28 = arith.constant 3.906250e-03 : f32
    %48 = vector.broadcast %cst_28 : f32 to vector<200x1xf32>
    %49 = arith.mulf %45, %48 : vector<200x1xf32>
    %50 = arith.mulf %47, %47 : vector<200x1xf32>
    %51 = arith.subf %49, %50 : vector<200x1xf32>
    %cst_29 = arith.constant 0.000000e+00 : f32
    %52 = vector.broadcast %cst_29 : f32 to vector<200x1xf32>
    %53 = arith.maximumf %51, %52 : vector<200x1xf32>
    %54 = vector.broadcast %47 : vector<200x1xf32> to vector<200x256xf32>
    %55 = arith.subf %38, %54 : vector<200x256xf32>
    %cst_30 = arith.constant 9.99999974E-6 : f32
    %56 = vector.broadcast %cst_30 : f32 to vector<200x1xf32>
    %57 = arith.addf %53, %56 : vector<200x1xf32>
    %58 = math.rsqrt %57 : vector<200x1xf32>
    %59 = vector.broadcast %58 : vector<200x1xf32> to vector<200x256xf32>
    %60 = arith.mulf %55, %59 : vector<200x256xf32>
    %61 = vector.broadcast %39 : vector<1x256xf32> to vector<200x256xf32>
    %62 = arith.mulf %60, %61 : vector<200x256xf32>
    %63 = vector.broadcast %40 : vector<1x256xf32> to vector<200x256xf32>
    %64 = arith.addf %62, %63 : vector<200x256xf32>
    %cst_31 = arith.constant 0.000000e+00 : f32
    %65 = vector.broadcast %cst_31 : f32 to vector<200x256xf32>
    %66 = arith.maximumf %64, %65 : vector<200x256xf32>
    %c0_32 = arith.constant 0 : index
    %c0_33 = arith.constant 0 : index
    %67 = vector.load %arg10[%c0_32, %c0_33] : memref<1x256xf32, #tpu.memory_space<vmem>>, vector<1x256xf32>
    %68 = vector.broadcast %67 : vector<1x256xf32> to vector<200x256xf32>
    %69 = arith.mulf %66, %68 : vector<200x256xf32>
    %cst_34 = arith.constant dense<0.000000e+00> : vector<200xf32>
    %70 = vector.multi_reduction <add>, %69, %cst_34 [1] : vector<200x256xf32> to vector<200xf32>
    %71 = vector.shape_cast %70 : vector<200xf32> to vector<200x1xf32>
    %c0_35 = arith.constant 0 : index
    %c0_36 = arith.constant 0 : index
    %72 = vector.load %arg11[%c0_35, %c0_36] : memref<1x1xf32, #tpu.memory_space<vmem>>, vector<1x1xf32>
    %73 = vector.broadcast %72 : vector<1x1xf32> to vector<200x1xf32>
    %74 = arith.addf %71, %73 : vector<200x1xf32>
    %c0_37 = arith.constant 0 : index
    %c0_38 = arith.constant 0 : index
    %75 = vector.load %arg12[%c0_37, %c0_38] : memref<200x1xf32, #tpu.memory_space<vmem>>, vector<200x1xf32>
    tpu.vector_store %arg12[%c0_37, %c0_38], %74 {strides = array<i32>} : memref<200x1xf32, #tpu.memory_space<vmem>>, vector<200x1xf32>,
    return
  }
  func.func @transform_0(%arg0: i32) -> (i32, i32) {
    %c0_i32 = arith.constant 0 : i32
    %c0_i32_0 = arith.constant 0 : i32
    return %arg0, %c0_i32 : i32, i32
  }
  func.func @transform_1(%arg0: i32) -> (i32, i32) {
    %c0_i32 = arith.constant 0 : i32
    %c0_i32_0 = arith.constant 0 : i32
    %c0_i32_1 = arith.constant 0 : i32
    return %c0_i32, %c0_i32_0 : i32, i32
  }
  func.func @transform_2(%arg0: i32) -> (i32, i32) {
    %c0_i32 = arith.constant 0 : i32
    %c0_i32_0 = arith.constant 0 : i32
    %c0_i32_1 = arith.constant 0 : i32
    return %c0_i32, %c0_i32_0 : i32, i32
  }
  func.func @transform_3(%arg0: i32) -> (i32, i32) {
    %c0_i32 = arith.constant 0 : i32
    %c0_i32_0 = arith.constant 0 : i32
    %c0_i32_1 = arith.constant 0 : i32
    return %c0_i32, %c0_i32_0 : i32, i32
  }
  func.func @transform_4(%arg0: i32) -> (i32, i32) {
    %c0_i32 = arith.constant 0 : i32
    %c0_i32_0 = arith.constant 0 : i32
    %c0_i32_1 = arith.constant 0 : i32
    return %c0_i32, %c0_i32_0 : i32, i32
  }
  func.func @transform_5(%arg0: i32) -> (i32, i32) {
    %c0_i32 = arith.constant 0 : i32
    %c0_i32_0 = arith.constant 0 : i32
    %c0_i32_1 = arith.constant 0 : i32
    return %c0_i32, %c0_i32_0 : i32, i32
  }
  func.func @transform_6(%arg0: i32) -> (i32, i32) {
    %c0_i32 = arith.constant 0 : i32
    %c0_i32_0 = arith.constant 0 : i32
    %c0_i32_1 = arith.constant 0 : i32
    return %c0_i32, %c0_i32_0 : i32, i32
  }
  func.func @transform_7(%arg0: i32) -> (i32, i32) {
    %c0_i32 = arith.constant 0 : i32
    %c0_i32_0 = arith.constant 0 : i32
    %c0_i32_1 = arith.constant 0 : i32
    return %c0_i32, %c0_i32_0 : i32, i32
  }
  func.func @transform_8(%arg0: i32) -> (i32, i32) {
    %c0_i32 = arith.constant 0 : i32
    %c0_i32_0 = arith.constant 0 : i32
    %c0_i32_1 = arith.constant 0 : i32
    return %c0_i32, %c0_i32_0 : i32, i32
  }
  func.func @transform_9(%arg0: i32) -> (i32, i32) {
    %c0_i32 = arith.constant 0 : i32
    %c0_i32_0 = arith.constant 0 : i32
    %c0_i32_1 = arith.constant 0 : i32
    return %c0_i32, %c0_i32_0 : i32, i32
  }
  func.func @transform_10(%arg0: i32) -> (i32, i32) {
    %c0_i32 = arith.constant 0 : i32
    %c0_i32_0 = arith.constant 0 : i32
    %c0_i32_1 = arith.constant 0 : i32
    return %c0_i32, %c0_i32_0 : i32, i32
  }
  func.func @transform_11(%arg0: i32) -> (i32, i32) {
    %c0_i32 = arith.constant 0 : i32
    %c0_i32_0 = arith.constant 0 : i32
    return %arg0, %c0_i32 : i32, i32
  }
}

</mosaic_0001>

<bundles_post_ra>
// kernel: tpu_custom_call.1
= control target key start
LH: loop header
LB: loop body
LE: loop exit
PB: predicated region body
PF: predicated region fallthrough
CT: control target
= control target key end

     0   :  { %s4384_s0 = inlined_call_operand.vmem [shape: f32[200,32], index: 0, kind: input, shape index: {}]   ;;  %s4385_s1 = inlined_call_operand.vmem [shape: f32[32,256], index: 1, kind: input, shape index: {}]   ;;  %s4386_s2 = inlined_call_operand.vmem [shape: f32[1,256], index: 2, kind: input, shape index: {}]   ;;  %s4387_s3 = inlined_call_operand.vmem [shape: f32[1,256], index: 3, kind: input, shape index: {}]   ;;  %s4388_s4 = inlined_call_operand.vmem [shape: f32[1,256], index: 4, kind: input, shape index: {}]   ;;  %s4389_s5 = inlined_call_operand.hbm [shape: f32[256,256], index: 5, kind: input, shape index: {}]   ;;  %s4390_s6 = inlined_call_operand.vmem [shape: f32[1,256], index: 6, kind: input, shape index: {}]   ;;  %s4391_s7 = inlined_call_operand.vmem [shape: f32[1,256], index: 7, kind: input, shape index: {}]   ;;  %s4392_s8 = inlined_call_operand.vmem [shape: f32[1,256], index: 8, kind: input, shape index: {}]   ;;  %s4393_s9 = inlined_call_operand.vmem [shape: f32[1,256], index: 9, kind: input, shape index: {}]   ;;  %s4394_s10 = inlined_call_operand.<no memory space> [shape: f32[1,1], index: 10, kind: input, shape index: {}]   ;;  %s4395_s11 = inlined_call_operand.vmem [shape: f32[200,1], index: 11, kind: output, shape index: {}]  }
   0x1   :  { %v16_v0 = vstv %s4394_s10 }
   0x2   :  { %17 = vst [vmem:[#allocation2] sm:$0x1] %v16_v0 }
   0x3   :  { %18 = vsyncpa [#allocation4], 0  ;;  %s2437_s19 = smov [#allocation3]   ;;  %s2413_s23 = scalar_lea.hbm %s4389_s5, 8192 }
   0x4   :  { %s34_s20 = sshll.u32 %s2437_s19, 4  ;;  %p2414_p0 = scmp.ne.s32.totalorder %s4389_s5, %s2413_s23  ;;  %s35_s20 = int_to_ptr.vmem [resolvable:$true] %s34_s20 }
   0x5   :  { %p2417_p1 = scmp.lt.u32.totalorder %s2413_s23, %s4389_s5 }
   0x7   :  { %p2419_p2 = pnand %p2417_p1, %p2414_p0 }
   0x9   :  { %2422 = shalt.err (!%p2419_p2)
}
   0xa   :  { %s2423_s10 = scalar_lea.vmem %s35_s20, 8192  ;;  %p2428_p4 = scmp.lt.s32.totalorder %s35_s20, %s35_s20 }
   0xb   :  { %p2424_p3 = scmp.ne.s32.totalorder %s35_s20, %s2423_s10  ;;  %p2429_p5 = scmp.lt.s32.totalorder %s2423_s10, %s2423_s10 }
   0xd   :  { %p2430_p6 = por %p2429_p5, %p2428_p4 }
   0xf   :  { %p2431_p7 = pnand %p2430_p6, %p2424_p3 }
  0x11   :  { %2434 = shalt.err (!%p2431_p7)
}
  0x12   :  { %s2438_s28 = smov 256   ;;  %s2439_s29 = smov 16  }
  0x13   :  { %40 = dma.hbm_to_vmem [thread:$0]  %s4389_s5, 8192, %s35_s20, [#allocation4], %s2438_s28, %s2438_s28, %s2439_s29  }
  0x14   :  { %2435 = dma.done.wait [#allocation4], 8192  }
  0x15   :  { %2436 = vsyncadd [#allocation4], 4294959104  ;;  %v2440_v1 = vmov 0.0   ;;  %v80_v2 = vld [vmem:[%s4385_s1 + $0x8] sm:$0xff]  ;;  %v82_v3 = vld [vmem:[%s4385_s1 + $0x18] sm:$0xff]  ;;  %vm99_vm0 = vcmask 261120   ;;  %v89_v39 = vlaneseq }
  0x16   :  { %239 = vmatprep.mubr.f32.mxu0 %v2440_v1  ;;  %v79_v4 = vld [vmem:[%s4385_s1] sm:$0xff]  ;;  %v2205_v5 = vpack.c.bf16 %v82_v3, %v80_v2  ;;  %v81_v6 = vld [vmem:[%s4385_s1 + $0x10] sm:$0xff]  ;;  %v84_v7 = vld [vmem:[%s4385_s1 + $0x28] sm:$0xff]  ;;  %vm2148_vm1 = vcmask 7168  }
  0x17   :  { %v86_v8 = vld [vmem:[%s4385_s1 + $0x38] sm:$0xff]  ;;  %v2207_v9 = vpack.c.bf16 %v81_v6, %v79_v4  ;;  %v83_v11 = vld [vmem:[%s4385_s1 + $0x20] sm:$0xff]  ;;  %v85_v12 = vld [vmem:[%s4385_s1 + $0x30] sm:$0xff]  ;;  %v90_v46 = vshrl.u32 %v89_v39, 7 }
  0x18   :  { %v2209_v10 = vpack.c.bf16 %v86_v8, %v84_v7  ;;  %2206 = vmatprep.subr.bf16.mxu0 %v2205_v5  ;;  %v2211_v13 = vpack.c.bf16 %v85_v12, %v83_v11  ;;  %v54_v14 = vld [vmem:[%s4384_s0] sm:$0xff]  ;;  %v55_v15 = vld [vmem:[%s4384_s0 + $0x8] sm:$0xff]  ;;  %v56_v16 = vld [vmem:[%s4384_s0 + $0x10] sm:$0xff] }
  0x19   :  { %2208 = vmatpush1.bf16.msra.mxu0 %v2207_v9  ;;  %v57_v17 = vld [vmem:[%s4384_s0 + $0x18] sm:$0xff]  ;;  %v58_v18 = vld [vmem:[%s4384_s0 + $0x20] sm:$0xff]  ;;  %v59_v19 = vld [vmem:[%s4384_s0 + $0x28] sm:$0xff]  ;;  %v2665_v53 = vsub.s32 0, %v90_v46  ;;  %v2670_v57 = vsub.s32 1, %v90_v46 }
  0x1a   :  { %2210 = vmatprep.subr.bf16.mxu0 %v2209_v10  ;;  %v60_v20 = vld [vmem:[%s4384_s0 + $0x30] sm:$0xff]  ;;  %v61_v21 = vld [vmem:[%s4384_s0 + $0x38] sm:$0xff]  ;;  %v62_v22 = vld [vmem:[%s4384_s0 + $0x40] sm:$0xff] }
  0x1b   :  { %v63_v23 = vld [vmem:[%s4384_s0 + $0x48] sm:$0xff]  ;;  %v64_v24 = vld [vmem:[%s4384_s0 + $0x50] sm:$0xff]  ;;  %v65_v25 = vld [vmem:[%s4384_s0 + $0x58] sm:$0xff]  ;;  %4431 = vst [vmem:[#allocation6_spill] sm:$0xff] %v2665_v53 }
  0x1c   :  { %v66_v26 = vld [vmem:[%s4384_s0 + $0x60] sm:$0xff]  ;;  %v67_v27 = vld [vmem:[%s4384_s0 + $0x68] sm:$0xff]  ;;  %v68_v28 = vld [vmem:[%s4384_s0 + $0x70] sm:$0xff]  ;;  %4432 = vst [vmem:[#allocation7_spill] sm:$0xff] %v2670_v57 }
  0x1d   :  { %2212 = vmatpush1.bf16.msra.mxu0 %v2211_v13  ;;  %v69_v29 = vld [vmem:[%s4384_s0 + $0x78] sm:$0xff]  ;;  %v70_v30 = vld [vmem:[%s4384_s0 + $0x80] sm:$0xff]  ;;  %v71_v31 = vld [vmem:[%s4384_s0 + $0x88] sm:$0xff] }
  0x1e   :  { %v72_v32 = vld [vmem:[%s4384_s0 + $0x90] sm:$0xff]  ;;  %v73_v33 = vld [vmem:[%s4384_s0 + $0x98] sm:$0xff]  ;;  %v74_v34 = vld [vmem:[%s4384_s0 + $0xa0] sm:$0xff] }
  0x1f   :  { %v75_v35 = vld [vmem:[%s4384_s0 + $0xa8] sm:$0xff]  ;;  %v76_v36 = vld [vmem:[%s4384_s0 + $0xb0] sm:$0xff]  ;;  %v77_v37 = vld [vmem:[%s4384_s0 + $0xb8] sm:$0xff] }
  0x20   :  { %2179 = vmatmul.mubr.msk.f32.vlgmr.msra.gmra.mrb[0].mxu0 %vm99_vm0, %v54_v14  ;;  %v78_v38 = vld [vmem:[%s4384_s0 + $0xc0] sm:$0xff]  ;;  %v1040_v40 = vld [vmem:[#allocation3 + $0x8] sm:$0xff]  ;;  %v1041_v44 = vld [vmem:[#allocation3 + $0x10] sm:$0xff] }
  0x21   :  { %245 = vmatprep.mubr.f32.mxu0 %v2440_v1  ;;  %v1042_v41 = vld [vmem:[#allocation3 + $0x18] sm:$0xff]  ;;  %v1039_v43 = vld [vmem:[#allocation3] sm:$0xff]  ;;  %v1044_v47 = vld [vmem:[#allocation3 + $0x28] sm:$0xff] }
  0x22   :  { %v2213_v42 = vpack.c.bf16 %v1042_v41, %v1040_v40  ;;  %v2215_v45 = vpack.c.bf16 %v1041_v44, %v1039_v43  ;;  %v1046_v48 = vld [vmem:[#allocation3 + $0x38] sm:$0xff]  ;;  %v1043_v50 = vld [vmem:[#allocation3 + $0x20] sm:$0xff]  ;;  %v1045_v51 = vld [vmem:[#allocation3 + $0x30] sm:$0xff] }
  0x23   :  { %v2217_v49 = vpack.c.bf16 %v1046_v48, %v1044_v47  ;;  %v2219_v52 = vpack.c.bf16 %v1045_v51, %v1043_v50  ;;  %v1048_v54 = vld [vmem:[#allocation3 + $0x48] sm:$0xff]  ;;  %v1050_v55 = vld [vmem:[#allocation3 + $0x58] sm:$0xff]  ;;  %v1047_v59 = vld [vmem:[#allocation3 + $0x40] sm:$0xff] }
  0x24   :  { %2180 = vmatmul.mubr.msk.f32.gmra.mrb[2].mxu0 %vm99_vm0, %v55_v15  ;;  %2214 = vmatprep.subr.bf16.mxu0 %v2213_v42  ;;  %v87_v56 = vld [vmem:[%s4386_s2] sm:$0x3]  ;;  %v2221_v58 = vpack.c.bf16 %v1050_v55, %v1048_v54  ;;  %v1049_v60 = vld [vmem:[#allocation3 + $0x50] sm:$0xff]  ;;  %v1052_v63 = vld [vmem:[#allocation3 + $0x68] sm:$0xff] }
  0x25   :  { %251 = vmatprep.mubr.f32.mxu0 %v2440_v1  ;;  %2277 = vmatprep.subr.bf16.mxu1 %v2213_v42  ;;  %v2223_v61 = vpack.c.bf16 %v1049_v60, %v1047_v59  ;;  %v2673_v62 = vrot.slane %v87_v56, %v2665_v53  ;;  %v1054_v0 = vld [vmem:[#allocation3 + $0x78] sm:$0xff]  ;;  %v1051_v3 = vld [vmem:[#allocation3 + $0x60] sm:$0xff]  ;;  %v1053_v4 = vld [vmem:[#allocation3 + $0x70] sm:$0xff] }
  0x26   :  { %2216 = vmatpush1.bf16.msra.mxu0 %v2215_v45  ;;  %2293 = vmatpush1.bf16.msra.mxu1 %v2215_v45  ;;  %v2225_v2 = vpack.c.bf16 %v1054_v0, %v1052_v63  ;;  %v2227_v5 = vpack.c.bf16 %v1053_v4, %v1051_v3  ;;  %v1056_v9 = vld [vmem:[#allocation3 + $0x88] sm:$0xff]  ;;  %v1058_v10 = vld [vmem:[#allocation3 + $0x98] sm:$0xff]  ;;  %v1055_v13 = vld [vmem:[#allocation3 + $0x80] sm:$0xff] }
  0x27   :  { %2218 = vmatprep.subr.bf16.mxu0 %v2217_v49  ;;  %2278 = vmatprep.subr.bf16.mxu1 %v2217_v49  ;;  %v2229_v12 = vpack.c.bf16 %v1058_v10, %v1056_v9  ;;  %v1057_v14 = vld [vmem:[#allocation3 + $0x90] sm:$0xff]  ;;  %v1067_v41 = vld [vmem:[#allocation3 + $0xe0] sm:$0xff]  ;;  %v1072_v55 = vld [vmem:[#allocation3 + $0x108] sm:$0xff] }
  0x28   :  { %2181 = vmatmul.mubr.msk.f32.gmra.mrb[4].mxu0 %vm99_vm0, %v56_v16  ;;  %v2231_v15 = vpack.c.bf16 %v1057_v14, %v1055_v13  ;;  %v1069_v42 = vld [vmem:[#allocation3 + $0xf0] sm:$0xff]  ;;  %v1071_v59 = vld [vmem:[#allocation3 + $0x100] sm:$0xff] }
  0x29   :  { %257 = vmatprep.mubr.f32.mxu0 %v2440_v1  ;;  %v2243_v48 = vpack.c.bf16 %v1069_v42, %v1067_v41  ;;  %v1073_v60 = vld [vmem:[#allocation3 + $0x110] sm:$0xff]  ;;  %v1075_v9 = vld [vmem:[#allocation3 + $0x120] sm:$0xff]  ;;  %v1090_v41 = vld [vmem:[#allocation3 + $0x198] sm:$0xff] }
  0x2a   :  { %2220 = vmatpush1.bf16.msra.mxu0 %v2219_v52  ;;  %2294 = vmatpush1.bf16.msra.mxu1 %v2219_v52  ;;  %v1077_v10 = vld [vmem:[#allocation3 + $0x130] sm:$0xff] }
  0x2b   :  { %2222 = vmatprep.subr.bf16.mxu0 %v2221_v58  ;;  %2279 = vmatprep.subr.bf16.mxu1 %v2221_v58 }
  0x2c   :  { %2182 = vmatmul.mubr.msk.f32.gmra.mrb[6].mxu0 %vm99_vm0, %v57_v17 }
  0x2d   :  { %263 = vmatprep.mubr.f32.mxu0 %v2440_v1 }
  0x2e   :  { %2224 = vmatpush1.bf16.msra.mxu0 %v2223_v61  ;;  %2295 = vmatpush1.bf16.msra.mxu1 %v2223_v61  ;;  %v2247_v61 = vpack.c.bf16 %v1073_v60, %v1071_v59 }
  0x2f   :  { %2226 = vmatprep.subr.bf16.mxu0 %v2225_v2  ;;  %2280 = vmatprep.subr.bf16.mxu1 %v2225_v2 }
  0x30   :  { %2183 = vmatmul.mubr.msk.f32.gmra.mrb[8].mxu0 %vm99_vm0, %v58_v18 }
  0x31   :  { %269 = vmatprep.mubr.f32.mxu0 %v2440_v1 }
  0x32   :  { %2228 = vmatpush1.bf16.msra.mxu0 %v2227_v5  ;;  %2296 = vmatpush1.bf16.msra.mxu1 %v2227_v5  ;;  %v1076_v5 = vld [vmem:[#allocation3 + $0x128] sm:$0xff] }
  0x33   :  { %2230 = vmatprep.subr.bf16.mxu0 %v2229_v12  ;;  %2281 = vmatprep.subr.bf16.mxu1 %v2229_v12  ;;  %v2251_v12 = vpack.c.bf16 %v1077_v10, %v1075_v9 }
  0x34   :  { %2184 = vmatmul.mubr.msk.f32.gmra.mrb[10].mxu0 %vm99_vm0, %v59_v19 }
  0x35   :  { %275 = vmatprep.mubr.f32.mxu0 %v2440_v1 }
  0x36   :  { %2232 = vmatpush1.bf16.msra.mxu0 %v2231_v15  ;;  %2297 = vmatpush1.bf16.msra.mxu1 %v2231_v15 }
  0x38   :  { %2185 = vmatmul.mubr.msk.f32.gmra.mrb[12].mxu0 %vm99_vm0, %v60_v20 }
  0x39   :  { %281 = vmatprep.mubr.f32.mxu0 %v2440_v1 }
  0x3c   :  { %2186 = vmatmul.mubr.msk.f32.gmra.mrb[14].mxu0 %vm99_vm0, %v61_v21  ;;  %v1060_v21 = vld [vmem:[#allocation3 + $0xa8] sm:$0xff] }
  0x3d   :  { %287 = vmatprep.mubr.f32.mxu0 %v2440_v1 }
  0x40   :  { %2187 = vmatmul.mubr.msk.f32.gmra.mrb[16].mxu0 %vm99_vm0, %v62_v22  ;;  %v1062_v22 = vld [vmem:[#allocation3 + $0xb8] sm:$0xff] }
  0x41   :  { %293 = vmatprep.mubr.f32.mxu0 %v2440_v1 }
  0x44   :  { %2188 = vmatmul.mubr.msk.f32.gmra.mrb[18].mxu0 %vm99_vm0, %v63_v23  ;;  %v2233_v23 = vpack.c.bf16 %v1062_v22, %v1060_v21 }
  0x45   :  { %299 = vmatprep.mubr.f32.mxu0 %v2440_v1 }
  0x46   :  { %2234 = vmatprep.subr.bf16.mxu0 %v2233_v23  ;;  %2282 = vmatprep.subr.bf16.mxu1 %v2233_v23 }
  0x48   :  { %2189 = vmatmul.mubr.msk.f32.gmra.mrb[20].mxu0 %vm99_vm0, %v64_v24  ;;  %v1059_v24 = vld [vmem:[#allocation3 + $0xa0] sm:$0xff] }
  0x49   :  { %305 = vmatprep.mubr.f32.mxu0 %v2440_v1 }
  0x4c   :  { %2190 = vmatmul.mubr.msk.f32.gmra.mrb[22].mxu0 %vm99_vm0, %v65_v25  ;;  %v1061_v25 = vld [vmem:[#allocation3 + $0xb0] sm:$0xff] }
  0x4d   :  { %311 = vmatprep.mubr.f32.mxu0 %v2440_v1 }
  0x50   :  { %2191 = vmatmul.mubr.msk.f32.gmra.mrb[24].mxu0 %vm99_vm0, %v66_v26  ;;  %v1064_v26 = vld [vmem:[#allocation3 + $0xc8] sm:$0xff] }
  0x51   :  { %317 = vmatprep.mubr.f32.mxu0 %v2440_v1 }
  0x54   :  { %2192 = vmatmul.mubr.msk.f32.gmra.mrb[26].mxu0 %vm99_vm0, %v67_v27  ;;  %v2235_v27 = vpack.c.bf16 %v1061_v25, %v1059_v24  ;;  %v1084_v25 = vld [vmem:[#allocation3 + $0x168] sm:$0xff] }
  0x55   :  { %323 = vmatprep.mubr.f32.mxu0 %v2440_v1 }
  0x56   :  { %2236 = vmatpush1.bf16.msra.mxu0 %v2235_v27  ;;  %2298 = vmatpush1.bf16.msra.mxu1 %v2235_v27 }
  0x58   :  { %2193 = vmatmul.mubr.msk.f32.gmra.mrb[28].mxu0 %vm99_vm0, %v68_v28  ;;  %v1066_v28 = vld [vmem:[#allocation3 + $0xd8] sm:$0xff] }
  0x59   :  { %329 = vmatprep.mubr.f32.mxu0 %v2440_v1 }
  0x5c   :  { %2194 = vmatmul.mubr.msk.f32.gmra.mrb[30].mxu0 %vm99_vm0, %v69_v29  ;;  %v1063_v29 = vld [vmem:[#allocation3 + $0xc0] sm:$0xff] }
  0x5d   :  { %335 = vmatprep.mubr.f32.mxu0 %v2440_v1 }
  0x60   :  { %2195 = vmatmul.mubr.msk.f32.gmra.mrb[32].mxu0 %vm99_vm0, %v70_v30  ;;  %v1065_v30 = vld [vmem:[#allocation3 + $0xd0] sm:$0xff] }
  0x61   :  { %341 = vmatprep.mubr.f32.mxu0 %v2440_v1  ;;  %v2239_v39 = vpack.c.bf16 %v1065_v30, %v1063_v29  ;;  %v1083_v29 = vld [vmem:[#allocation3 + $0x160] sm:$0xff]  ;;  %v1085_v30 = vld [vmem:[#allocation3 + $0x170] sm:$0xff] }
  0x64   :  { %2196 = vmatmul.mubr.msk.f32.gmra.mrb[34].mxu0 %vm99_vm0, %v71_v31 }
  0x65   :  { %347 = vmatprep.mubr.f32.mxu0 %v2440_v1 }
  0x68   :  { %2197 = vmatmul.mubr.msk.f32.gmra.mrb[36].mxu0 %vm99_vm0, %v72_v32 }
  0x69   :  { %353 = vmatprep.mubr.f32.mxu0 %v2440_v1 }
  0x6c   :  { %2198 = vmatmul.mubr.msk.f32.gmra.mrb[38].mxu0 %vm99_vm0, %v73_v33 }
  0x6d   :  { %359 = vmatprep.mubr.f32.mxu0 %v2440_v1 }
  0x70   :  { %2199 = vmatmul.mubr.msk.f32.gmra.mrb[40].mxu0 %vm99_vm0, %v74_v34 }
  0x71   :  { %365 = vmatprep.mubr.f32.mxu0 %v2440_v1 }
  0x74   :  { %2200 = vmatmul.mubr.msk.f32.gmra.mrb[42].mxu0 %vm99_vm0, %v75_v35  ;;  %v2237_v35 = vpack.c.bf16 %v1066_v28, %v1064_v26  ;;  %v1086_v26 = vld [vmem:[#allocation3 + $0x178] sm:$0xff] }
  0x75   :  { %371 = vmatprep.mubr.f32.mxu0 %v2440_v1  ;;  %v2257_v28 = vpack.c.bf16 %v1086_v26, %v1084_v25  ;;  %v1095_v25 = vld [vmem:[#allocation3 + $0x1c0] sm:$0xff]  ;;  %v1097_v26 = vld [vmem:[#allocation3 + $0x1d0] sm:$0xff] }
  0x76   :  { %2238 = vmatprep.subr.bf16.mxu0 %v2237_v35  ;;  %2283 = vmatprep.subr.bf16.mxu1 %v2237_v35 }
  0x77   :  { %2240 = vmatpush1.bf16.msra.mxu0 %v2239_v39  ;;  %2299 = vmatpush1.bf16.msra.mxu1 %v2239_v39 }
  0x78   :  { %2201 = vmatmul.mubr.msk.f32.gmra.mrb[44].mxu0 %vm99_vm0, %v76_v36  ;;  %v1068_v36 = vld [vmem:[#allocation3 + $0xe8] sm:$0xff] }
  0x79   :  { %377 = vmatprep.mubr.f32.mxu0 %v2440_v1 }
  0x7c   :  { %2202 = vmatmul.mubr.msk.f32.gmra.mrb[46].mxu0 %vm99_vm0, %v77_v37  ;;  %v1070_v37 = vld [vmem:[#allocation3 + $0xf8] sm:$0xff] }
  0x7d   :  { %383 = vmatprep.mubr.f32.mxu0 %v2440_v1  ;;  %v2676_v1 = vrot.slane %v87_v56, %v2670_v57  ;;  %v2241_v40 = vpack.c.bf16 %v1070_v37, %v1068_v36  ;;  %v1074_v56 = vld [vmem:[#allocation3 + $0x118] sm:$0xff] }
  0x7e   :  { %v2245_v58 = vpack.c.bf16 %v1074_v56, %v1072_v55 }
  0x7f   :  { %2242 = vmatprep.subr.bf16.mxu0 %v2241_v40  ;;  %2284 = vmatprep.subr.bf16.mxu1 %v2241_v40  ;;  %v1088_v40 = vld [vmem:[#allocation3 + $0x188] sm:$0xff] }
  0x80   :  { %2203 = vmatmul.mubr.msk.f32.gmra.mrb[48].mxu0 %vm99_vm0, %v78_v38  ;;  %2300 = vmatpush1.bf16.msra.mxu1 %v2243_v48 }
  0x81   :  { %2244 = vmatpush1.bf16.msra.mxu0 %v2243_v48  ;;  %2285 = vmatprep.subr.bf16.mxu1 %v2245_v58 }
  0x82   :  { %2246 = vmatprep.subr.bf16.mxu0 %v2245_v58 }
  0x84   :  { %2301 = vmatpush1.bf16.msra.mxu1 %v2247_v61 }
  0x85   :  { %2248 = vmatpush1.bf16.msra.mxu0 %v2247_v61 }
  0xf3   :  { %v241_v6 = vpop.f32.mrb[0].mxu0 }
  0xf4   :  { %v2679_v7 = vadd.f32 %v241_v6, %v2673_v62  ;;  %v243_v8 = vpop.f32.mrb[1].mxu0  ;;  %v1078_v6 = vld [vmem:[#allocation3 + $0x138] sm:$0xff] }
  0xf5   :  { %v2682_v11 = vadd.f32 %v243_v8, %v2676_v1  ;;  %v2249_v8 = vpack.c.bf16 %v1078_v6, %v1076_v5  ;;  %v1091_v6 = vld [vmem:[#allocation3 + $0x1a0] sm:$0xff] }
  0xf6   :  { %v467_v18 = vmul.f32 %v2679_v7, %v2679_v7 }
  0xf7   :  { %v247_v16 = vpop.f32.mrb[2].mxu0  ;;  %v392_v17 = vadd.f32 %v2682_v11, %v2679_v7  ;;  %v468_v19 = vmul.f32 %v2682_v11, %v2682_v11  ;;  %2250 = vmatprep.subr.bf16.mxu0 %v2249_v8  ;;  %2286 = vmatprep.subr.bf16.mxu1 %v2249_v8  ;;  %v1093_v8 = vld [vmem:[#allocation3 + $0x1b0] sm:$0xff] }
  0xf8   :  { %v249_v20 = vpop.f32.mrb[3].mxu0  ;;  %v2691_v31 = vadd.f32 %v247_v16, %v2673_v62  ;;  %2252 = vmatpush1.bf16.msra.mxu0 %v2251_v12  ;;  %v1080_v16 = vld [vmem:[#allocation3 + $0x148] sm:$0xff]  ;;  %2302 = vmatpush1.bf16.msra.mxu1 %v2251_v12  ;;  %v2267_v10 = vpack.c.bf16 %v1093_v8, %v1091_v6 }
  0xf9   :  { %393 = vadd.xlane.f32.xlu0 %v392_v17  ;;  %v2694_v32 = vadd.f32 %v249_v20, %v2676_v1  ;;  %v517_v34 = vadd.f32 %v468_v19, %v467_v18  ;;  %v1082_v17 = vld [vmem:[#allocation3 + $0x158] sm:$0xff]  ;;  %v1079_v19 = vld [vmem:[#allocation3 + $0x140] sm:$0xff]  ;;  %v1081_v20 = vld [vmem:[#allocation3 + $0x150] sm:$0xff] }
  0xfa   :  { %v469_v45 = vmul.f32 %v2691_v31, %v2691_v31  ;;  %v2253_v18 = vpack.c.bf16 %v1082_v17, %v1080_v16  ;;  %v2255_v21 = vpack.c.bf16 %v1081_v20, %v1079_v19  ;;  %v1096_v20 = vld [vmem:[#allocation3 + $0x1c8] sm:$0xff] }
  0xfb   :  { %v253_v33 = vpop.f32.mrb[4].mxu0  ;;  %v395_v44 = vadd.f32 %v2694_v32, %v2691_v31  ;;  %v470_v46 = vmul.f32 %v2694_v32, %v2694_v32 }
  0xfc   :  { %v255_v38 = vpop.f32.mrb[5].mxu0  ;;  %v2707_v49 = vadd.f32 %v253_v33, %v2673_v62  ;;  %2254 = vmatprep.subr.bf16.mxu0 %v2253_v18  ;;  %2287 = vmatprep.subr.bf16.mxu1 %v2253_v18  ;;  %v2259_v33 = vpack.c.bf16 %v1085_v30, %v1083_v29  ;;  %v2271_v29 = vpack.c.bf16 %v1097_v26, %v1095_v25 }
  0xfd   :  { %518 = vadd.xlane.f32.xlu0 %v517_v34  ;;  %v2710_v50 = vadd.f32 %v255_v38, %v2676_v1  ;;  %v520_v52 = vadd.f32 %v470_v46, %v469_v45  ;;  %2256 = vmatpush1.bf16.msra.mxu0 %v2255_v21  ;;  %v1087_v45 = vld [vmem:[#allocation3 + $0x180] sm:$0xff]  ;;  %v1089_v46 = vld [vmem:[#allocation3 + $0x190] sm:$0xff] }
  0xfe   :  { %v471_v2 = vmul.f32 %v2707_v49, %v2707_v49  ;;  %2303 = vmatpush1.bf16.msra.mxu1 %v2255_v21  ;;  %2258 = vmatprep.subr.bf16.mxu0 %v2257_v28  ;;  %v1098_v21 = vld [vmem:[#allocation3 + $0x1d8] sm:$0xff] }
  0xff   :  { %v2696_v43 = vpop.f32.mrb[6].mxu0  ;;  %v398_v0 = vadd.f32 %v2710_v50, %v2707_v49  ;;  %v472_v3 = vmul.f32 %v2710_v50, %v2710_v50  ;;  %2288 = vmatprep.subr.bf16.mxu1 %v2257_v28 }
 0x100   :  { %v2704_v47 = vpop.f32.mrb[7].mxu0 }
 0x101   :  { %396 = vadd.xlane.f32.xlu0 %v395_v44  ;;  %v523_v14 = vadd.f32 %v472_v3, %v471_v2  ;;  %2260 = vmatpush1.bf16.msra.mxu0 %v2259_v33  ;;  %v2261_v44 = vpack.c.bf16 %v1090_v41, %v1088_v40  ;;  %v1094_v2 = vld [vmem:[#allocation3 + $0x1b8] sm:$0xff] }
 0x102   :  { %2304 = vmatpush1.bf16.msra.mxu1 %v2259_v33  ;;  %v1102_v40 = vld [vmem:[#allocation3 + $0x1f8] sm:$0xff] }
 0x103   :  { %v2712_v51 = vpop.f32.mrb[8].mxu0  ;;  %2262 = vmatprep.subr.bf16.mxu0 %v2261_v44  ;;  %2289 = vmatprep.subr.bf16.mxu1 %v2261_v44 }
 0x104   :  { %v2714_v54 = vpop.f32.mrb[9].mxu0 }
 0x105   :  { %521 = vadd.xlane.f32.xlu0 %v520_v52  ;;  %v2263_v52 = vpack.c.bf16 %v1089_v46, %v1087_v45  ;;  %v1099_v45 = vld [vmem:[#allocation3 + $0x1e0] sm:$0xff]  ;;  %v1101_v46 = vld [vmem:[#allocation3 + $0x1f0] sm:$0xff] }
 0x107   :  { %v2716_v63 = vpop.f32.mrb[10].mxu0  ;;  %2264 = vmatpush1.bf16.msra.mxu0 %v2263_v52  ;;  %2305 = vmatpush1.bf16.msra.mxu1 %v2263_v52  ;;  %v2275_v52 = vpack.c.bf16 %v1101_v46, %v1099_v45 }
 0x108   :  { %v2724_v4 = vpop.f32.mrb[11].mxu0 }
 0x109   :  { %399 = vadd.xlane.f32.xlu0 %v398_v0  ;;  %v1092_v0 = vld [vmem:[#allocation3 + $0x1a8] sm:$0xff] }
 0x10a   :  { %v2265_v5 = vpack.c.bf16 %v1094_v2, %v1092_v0 }
 0x10b   :  { %v2726_v13 = vpop.f32.mrb[12].mxu0 }
 0x10c   :  { %v2728_v15 = vpop.f32.mrb[13].mxu0  ;;  %2266 = vmatprep.subr.bf16.mxu0 %v2265_v5  ;;  %2290 = vmatprep.subr.bf16.mxu1 %v2265_v5 }
 0x10d   :  { %524 = vadd.xlane.f32.xlu0 %v523_v14  ;;  %2268 = vmatpush1.bf16.msra.mxu0 %v2267_v10 }
 0x10e   :  { %2306 = vmatpush1.bf16.msra.mxu1 %v2267_v10 }
 0x10f   :  { %v283_v22 = vpop.f32.mrb[14].mxu0 }
 0x110   :  { %v2731_v23 = vadd.f32 %v283_v22, %v2673_v62  ;;  %v285_v24 = vpop.f32.mrb[15].mxu0 }
 0x111   :  { %v2734_v27 = vadd.f32 %v285_v24, %v2676_v1  ;;  %v2269_v24 = vpack.c.bf16 %v1098_v21, %v1096_v20 }
 0x112   :  { %v481_v36 = vmul.f32 %v2731_v23, %v2731_v23 }
 0x113   :  { %v289_v34 = vpop.f32.mrb[16].mxu0  ;;  %v413_v35 = vadd.f32 %v2734_v27, %v2731_v23  ;;  %v482_v37 = vmul.f32 %v2734_v27, %v2734_v27  ;;  %2270 = vmatprep.subr.bf16.mxu0 %v2269_v24  ;;  %2291 = vmatprep.subr.bf16.mxu1 %v2269_v24 }
 0x114   :  { %v2743_v38 = vadd.f32 %v289_v34, %v2673_v62  ;;  %v291_v39 = vpop.f32.mrb[17].mxu0  ;;  %2272 = vmatpush1.bf16.msra.mxu0 %v2271_v29  ;;  %2307 = vmatpush1.bf16.msra.mxu1 %v2271_v29 }
 0x115   :  { %v2746_v42 = vadd.f32 %v291_v39, %v2676_v1  ;;  %414 = vadd.xlane.f32.xlu0 %v413_v35  ;;  %v538_v58 = vadd.f32 %v482_v37, %v481_v36  ;;  %v1100_v39 = vld [vmem:[#allocation3 + $0x1e8] sm:$0xff] }
 0x116   :  { %v483_v48 = vmul.f32 %v2743_v38, %v2743_v38  ;;  %v2273_v44 = vpack.c.bf16 %v1102_v40, %v1100_v39 }
 0x117   :  { %v295_v55 = vpop.f32.mrb[18].mxu0  ;;  %v416_v56 = vadd.f32 %v2746_v42, %v2743_v38  ;;  %v484_v59 = vmul.f32 %v2746_v42, %v2746_v42 }
 0x118   :  { %v2755_v60 = vadd.f32 %v295_v55, %v2673_v62  ;;  %v297_v61 = vpop.f32.mrb[19].mxu0  ;;  %2274 = vmatprep.subr.bf16.mxu0 %v2273_v44  ;;  %2292 = vmatprep.subr.bf16.mxu1 %v2273_v44 }
 0x119   :  { %v2758_v3 = vadd.f32 %v297_v61, %v2676_v1  ;;  %417 = vadd.xlane.f32.xlu1 %v416_v56  ;;  %539 = vadd.xlane.f32.xlu0 %v538_v58  ;;  %v541_v9 = vadd.f32 %v484_v59, %v483_v48 }
 0x11a   :  { %v485_v16 = vmul.f32 %v2755_v60, %v2755_v60  ;;  %2276 = vmatpush1.bf16.msra.mxu0 %v2275_v52  ;;  %2308 = vmatpush1.bf16.msra.mxu1 %v2275_v52 }
 0x11b   :  { %v301_v12 = vpop.f32.mrb[20].mxu0  ;;  %v419_v14 = vadd.f32 %v2758_v3, %v2755_v60  ;;  %v486_v17 = vmul.f32 %v2758_v3, %v2758_v3 }
 0x11c   :  { %v2767_v18 = vadd.f32 %v301_v12, %v2673_v62  ;;  %v303_v19 = vpop.f32.mrb[21].mxu0 }
 0x11d   :  { %v2770_v22 = vadd.f32 %v303_v19, %v2676_v1  ;;  %542 = vadd.xlane.f32.xlu1 %v541_v9  ;;  %420 = vadd.xlane.f32.xlu0 %v419_v14  ;;  %v544_v33 = vadd.f32 %v486_v17, %v485_v16 }
 0x11e   :  { %v487_v28 = vmul.f32 %v2767_v18, %v2767_v18 }
 0x11f   :  { %v307_v30 = vpop.f32.mrb[22].mxu0  ;;  %v422_v34 = vadd.f32 %v2770_v22, %v2767_v18  ;;  %v488_v35 = vmul.f32 %v2770_v22, %v2770_v22 }
 0x120   :  { %v2779_v36 = vadd.f32 %v307_v30, %v2673_v62  ;;  %v309_v37 = vpop.f32.mrb[23].mxu0 }
 0x121   :  { %v2782_v41 = vadd.f32 %v309_v37, %v2676_v1  ;;  %545 = vadd.xlane.f32.xlu1 %v544_v33  ;;  %423 = vadd.xlane.f32.xlu0 %v422_v34  ;;  %v547_v48 = vadd.f32 %v488_v35, %v487_v28 }
 0x122   :  { %v489_v58 = vmul.f32 %v2779_v36, %v2779_v36 }
 0x123   :  { %v313_v55 = vpop.f32.mrb[24].mxu0  ;;  %v425_v56 = vadd.f32 %v2782_v41, %v2779_v36  ;;  %v490_v59 = vmul.f32 %v2782_v41, %v2782_v41 }
 0x124   :  { %v2791_v61 = vadd.f32 %v313_v55, %v2673_v62  ;;  %v315_v0 = vpop.f32.mrb[25].mxu0 }
 0x125   :  { %v2794_v2 = vadd.f32 %v315_v0, %v2676_v1  ;;  %548 = vadd.xlane.f32.xlu1 %v547_v48  ;;  %426 = vadd.xlane.f32.xlu0 %v425_v56  ;;  %v550_v6 = vadd.f32 %v490_v59, %v489_v58 }
 0x126   :  { %v491_v9 = vmul.f32 %v2791_v61, %v2791_v61 }
 0x127   :  { %v319_v5 = vpop.f32.mrb[26].mxu0  ;;  %v428_v8 = vadd.f32 %v2794_v2, %v2791_v61  ;;  %v492_v10 = vmul.f32 %v2794_v2, %v2794_v2 }
 0x128   :  { %v2803_v12 = vadd.f32 %v319_v5, %v2673_v62  ;;  %v321_v14 = vpop.f32.mrb[27].mxu0 }
 0x129   :  { %v2806_v16 = vadd.f32 %v321_v14, %v2676_v1  ;;  %551 = vadd.xlane.f32.xlu1 %v550_v6  ;;  %429 = vadd.xlane.f32.xlu0 %v428_v8  ;;  %v553_v19 = vadd.f32 %v492_v10, %v491_v9 }
 0x12a   :  { %v493_v21 = vmul.f32 %v2803_v12, %v2803_v12 }
 0x12b   :  { %v325_v17 = vpop.f32.mrb[28].mxu0  ;;  %v431_v20 = vadd.f32 %v2806_v16, %v2803_v12  ;;  %v494_v24 = vmul.f32 %v2806_v16, %v2806_v16 }
 0x12c   :  { %v2815_v25 = vadd.f32 %v325_v17, %v2673_v62  ;;  %v327_v26 = vpop.f32.mrb[29].mxu0  ;;  %v2858_v17 = vadd.f32 %v2696_v43, %v2673_v62 }
 0x12d   :  { %v2818_v28 = vadd.f32 %v327_v26, %v2676_v1  ;;  %554 = vadd.xlane.f32.xlu1 %v553_v19  ;;  %432 = vadd.xlane.f32.xlu0 %v431_v20  ;;  %v556_v30 = vadd.f32 %v494_v24, %v493_v21  ;;  %v2862_v19 = vadd.f32 %v2704_v47, %v2676_v1 }
 0x12e   :  { %v495_v34 = vmul.f32 %v2815_v25, %v2815_v25 }
 0x12f   :  { %v331_v29 = vpop.f32.mrb[30].mxu0  ;;  %v434_v33 = vadd.f32 %v2818_v28, %v2815_v25  ;;  %v496_v35 = vmul.f32 %v2818_v28, %v2818_v28 }
 0x130   :  { %v2827_v37 = vadd.f32 %v331_v29, %v2673_v62  ;;  %v333_v39 = vpop.f32.mrb[31].mxu0 }
 0x131   :  { %v2830_v40 = vadd.f32 %v333_v39, %v2676_v1  ;;  %557 = vadd.xlane.f32.xlu1 %v556_v30  ;;  %435 = vadd.xlane.f32.xlu0 %v434_v33  ;;  %v559_v45 = vadd.f32 %v496_v35, %v495_v34  ;;  %v401_v34 = vadd.f32 %v2862_v19, %v2858_v17 }
 0x132   :  { %v497_v48 = vmul.f32 %v2827_v37, %v2827_v37  ;;  %v473_v35 = vmul.f32 %v2858_v17, %v2858_v17  ;;  %v474_v39 = vmul.f32 %v2862_v19, %v2862_v19 }
 0x133   :  { %v337_v44 = vpop.f32.mrb[32].mxu0  ;;  %v437_v46 = vadd.f32 %v2830_v40, %v2827_v37  ;;  %v498_v52 = vmul.f32 %v2830_v40, %v2830_v40 }
 0x134   :  { %v2839_v55 = vadd.f32 %v337_v44, %v2673_v62  ;;  %v339_v56 = vpop.f32.mrb[33].mxu0 }
 0x135   :  { %v2842_v58 = vadd.f32 %v339_v56, %v2676_v1  ;;  %560 = vadd.xlane.f32.xlu1 %v559_v45  ;;  %438 = vadd.xlane.f32.xlu0 %v437_v46  ;;  %v562_v0 = vadd.f32 %v498_v52, %v497_v48  ;;  %v2890_v56 = vadd.f32 %v2712_v51, %v2673_v62 }
 0x136   :  { %v499_v6 = vmul.f32 %v2839_v55, %v2839_v55 }
 0x137   :  { %v343_v59 = vpop.f32.mrb[34].mxu0  ;;  %v440_v5 = vadd.f32 %v2842_v58, %v2839_v55  ;;  %v500_v8 = vmul.f32 %v2842_v58, %v2842_v58 }
 0x138   :  { %v2851_v9 = vadd.f32 %v343_v59, %v2673_v62  ;;  %v345_v10 = vpop.f32.mrb[35].mxu0  ;;  %v2894_v59 = vadd.f32 %v2714_v54, %v2676_v1 }
 0x139   :  { %v2854_v14 = vadd.f32 %v345_v10, %v2676_v1  ;;  %563 = vadd.xlane.f32.xlu1 %v562_v0  ;;  %441 = vadd.xlane.f32.xlu0 %v440_v5  ;;  %v565_v20 = vadd.f32 %v500_v8, %v499_v6  ;;  %v526_v0 = vadd.f32 %v474_v39, %v473_v35 }
 0x13a   :  { %v501_v26 = vmul.f32 %v2851_v9, %v2851_v9  ;;  %v404_v51 = vadd.f32 %v2894_v59, %v2890_v56  ;;  %v476_v54 = vmul.f32 %v2894_v59, %v2894_v59  ;;  %v2920_v35 = vadd.f32 %v2724_v4, %v2676_v1 }
 0x13b   :  { %v443_v21 = vadd.f32 %v2854_v14, %v2851_v9  ;;  %v349_v24 = vpop.f32.mrb[36].mxu0  ;;  %v502_v29 = vmul.f32 %v2854_v14, %v2854_v14 }
 0x13c   :  { %v351_v30 = vpop.f32.mrb[37].mxu0  ;;  %v2871_v43 = vadd.f32 %v349_v24, %v2673_v62  ;;  %v478_v4 = vmul.f32 %v2920_v35, %v2920_v35 }
 0x13d   :  { %566 = vadd.xlane.f32.xlu1 %v565_v20  ;;  %444 = vadd.xlane.f32.xlu0 %v443_v21  ;;  %v2874_v47 = vadd.f32 %v351_v30, %v2676_v1  ;;  %v568_v33 = vadd.f32 %v502_v29, %v501_v26  ;;  %v475_v21 = vmul.f32 %v2890_v56, %v2890_v56 }
 0x13e   :  { %v503_v48 = vmul.f32 %v2871_v43, %v2871_v43 }
 0x13f   :  { %v355_v44 = vpop.f32.mrb[38].mxu0  ;;  %v446_v46 = vadd.f32 %v2874_v47, %v2871_v43  ;;  %v504_v52 = vmul.f32 %v2874_v47, %v2874_v47  ;;  %v529_v39 = vadd.f32 %v476_v54, %v475_v21  ;;  %v2942_v54 = vadd.f32 %v2726_v13, %v2673_v62 }
 0x140   :  { %v357_v45 = vpop.f32.mrb[39].mxu0  ;;  %v2897_v8 = vadd.f32 %v355_v44, %v2673_v62 }
 0x141   :  { %569 = vadd.xlane.f32.xlu1 %v568_v33  ;;  %402 = vadd.xlane.f32.xlu0 %v401_v34  ;;  %v2900_v10 = vadd.f32 %v357_v45, %v2676_v1  ;;  %v571_v20 = vadd.f32 %v504_v52, %v503_v48  ;;  %v2916_v34 = vadd.f32 %v2716_v63, %v2673_v62 }
 0x142   :  { %v505_v30 = vmul.f32 %v2897_v8, %v2897_v8 }
 0x143   :  { %v361_v5 = vpop.f32.mrb[40].mxu0  ;;  %v449_v29 = vadd.f32 %v2900_v10, %v2897_v8  ;;  %v506_v33 = vmul.f32 %v2900_v10, %v2900_v10  ;;  %v407_v63 = vadd.f32 %v2920_v35, %v2916_v34 }
 0x144   :  { %v363_v6 = vpop.f32.mrb[41].mxu0 }
 0x145   :  { %447 = vadd.xlane.f32.xlu1 %v446_v46  ;;  %527 = vadd.xlane.f32.xlu0 %v526_v0  ;;  %v2923_v46 = vadd.f32 %v361_v5, %v2673_v62  ;;  %v2926_v48 = vadd.f32 %v363_v6, %v2676_v1  ;;  %v574_v52 = vadd.f32 %v506_v33, %v505_v30 }
 0x146   :  { %v477_v0 = vmul.f32 %v2916_v34, %v2916_v34 }
 0x147   :  { %v367_v24 = vpop.f32.mrb[42].mxu0  ;;  %4433 = vst [vmem:[#allocation8_spill] sm:$0xff] %v2923_v46  ;;  %4434 = vst [vmem:[#allocation9_spill] sm:$0xff] %v2926_v48  ;;  %v452_v5 = vadd.f32 %v2926_v48, %v2923_v46  ;;  %v507_v6 = vmul.f32 %v2923_v46, %v2923_v46  ;;  %v508_v21 = vmul.f32 %v2926_v48, %v2926_v48 }
 0x148   :  { %v369_v26 = vpop.f32.mrb[43].mxu0  ;;  %v532_v30 = vadd.f32 %v478_v4, %v477_v0  ;;  %v479_v46 = vmul.f32 %v2942_v54, %v2942_v54 }
 0x149   :  { %572 = vadd.xlane.f32.xlu1 %v571_v20  ;;  %405 = vadd.xlane.f32.xlu0 %v404_v51  ;;  %v577_v48 = vadd.f32 %v508_v21, %v507_v6 }
 0x14b   :  { %v373_v44 = vpop.f32.mrb[44].mxu0 }
 0x14c   :  { %v375_v45 = vpop.f32.mrb[45].mxu0 }
 0x14d   :  { %450 = vadd.xlane.f32.xlu1 %v449_v29  ;;  %530 = vadd.xlane.f32.xlu0 %v529_v39  ;;  %v2946_v29 = vadd.f32 %v2728_v15, %v2676_v1  ;;  %v2970_v6 = vadd.f32 %v375_v45, %v2676_v1 }
 0x14f   :  { %v379_v20 = vpop.f32.mrb[46].mxu0  ;;  %v410_v13 = vadd.f32 %v2946_v29, %v2942_v54  ;;  %v480_v15 = vmul.f32 %v2946_v29, %v2946_v29  ;;  %4437 = vst [vmem:[#allocation12_spill] sm:$0xff] %v2970_v6 }
 0x150   :  { %v381_v51 = vpop.f32.mrb[47].mxu0 }
 0x151   :  { %575 = vadd.xlane.f32.xlu1 %v574_v52  ;;  %408 = vadd.xlane.f32.xlu0 %v407_v63  ;;  %v2949_v52 = vadd.f32 %v367_v24, %v2673_v62  ;;  %v2952_v63 = vadd.f32 %v369_v26, %v2676_v1  ;;  %v535_v4 = vadd.f32 %v480_v15, %v479_v46 }
 0x152   :  { %v2979_v46 = vadd.f32 %v379_v20, %v2673_v62 }
 0x153   :  { %v385_v33 = vpop.f32.mrb[48].mxu0  ;;  %4435 = vst [vmem:[#allocation10_spill] sm:$0xff] %v2952_v63  ;;  %v455_v0 = vadd.f32 %v2952_v63, %v2949_v52  ;;  %v509_v24 = vmul.f32 %v2949_v52, %v2949_v52  ;;  %v510_v26 = vmul.f32 %v2952_v63, %v2952_v63 }
 0x154   :  { %v387_v39 = vpop.f32.mrb[49].mxu0  ;;  %4438 = vst [vmem:[#allocation13_spill] sm:$0xff] %v2979_v46 }
 0x155   :  { %453 = vadd.xlane.f32.xlu1 %v452_v5  ;;  %533 = vadd.xlane.f32.xlu0 %v532_v30  ;;  %v2967_v5 = vadd.f32 %v373_v44, %v2673_v62  ;;  %v2982_v44 = vadd.f32 %v381_v51, %v2676_v1  ;;  %v2994_v20 = vadd.f32 %v387_v39, %v2676_v1 }
 0x157   :  { %4436 = vst [vmem:[#allocation11_spill] sm:$0xff] %v2967_v5  ;;  %v458_v21 = vadd.f32 %v2970_v6, %v2967_v5  ;;  %v511_v30 = vmul.f32 %v2967_v5, %v2967_v5  ;;  %4439 = vst [vmem:[#allocation14_spill] sm:$0xff] %v2982_v44  ;;  %v461_v15 = vadd.f32 %v2982_v44, %v2979_v46 }
 0x158   :  { %4441 = vst [vmem:[#allocation16_spill] sm:$0xff] %v2994_v20 }
 0x159   :  { %578 = vadd.xlane.f32.xlu1 %v577_v48  ;;  %411 = vadd.xlane.f32.xlu0 %v410_v13  ;;  %v580_v48 = vadd.f32 %v510_v26, %v509_v24  ;;  %v512_v13 = vmul.f32 %v2970_v6, %v2970_v6  ;;  %v514_v24 = vmul.f32 %v2982_v44, %v2982_v44 }
 0x15a   :  { %v2991_v26 = vadd.f32 %v385_v33, %v2673_v62 }
 0x15b   :  { %v583_v45 = vadd.f32 %v512_v13, %v511_v30 }
 0x15c   :  { %4440 = vst [vmem:[#allocation15_spill] sm:$0xff] %v2991_v26 }
 0x15d   :  { %456 = vadd.xlane.f32.xlu1 %v455_v0  ;;  %536 = vadd.xlane.f32.xlu0 %v535_v4  ;;  %v513_v0 = vmul.f32 %v2979_v46, %v2979_v46  ;;  %v464_v4 = vadd.f32 %v2994_v20, %v2991_v26 }
 0x15f   :  { %v586_v51 = vadd.f32 %v514_v24, %v513_v0 }
 0x161   :  { %581 = vadd.xlane.f32.xlu1 %v580_v48  ;;  %v515_v48 = vmul.f32 %v2991_v26, %v2991_v26 }
 0x165   :  { %459 = vadd.xlane.f32.xlu1 %v458_v21  ;;  %v516_v21 = vmul.f32 %v2994_v20, %v2994_v20 }
 0x167   :  { %v589_v30 = vadd.f32 %v516_v21, %v515_v48  ;;  %v390_v21 = vld [vmem:[%s4387_s3] sm:$0x3] }
 0x169   :  { %584 = vadd.xlane.f32.xlu1 %v583_v45 }
 0x16d   :  { %462 = vadd.xlane.f32.xlu1 %v461_v15 }
 0x171   :  { %587 = vadd.xlane.f32.xlu1 %v586_v51 }
 0x175   :  { %465 = vadd.xlane.f32.xlu1 %v464_v4 }
 0x179   :  { %590 = vadd.xlane.f32.xlu1 %v589_v30 }
 0x186   :  { %v394_v13 = vpop.xlane.xlu0 %393 }
 0x187   :  { %v592_v62 = vmul.f32 0.00390625, %v394_v13 }
 0x189   :  { %v642_v45 = vmul.f32 %v592_v62, %v592_v62 }
 0x18a   :  { %v519_v33 = vpop.xlane.xlu0 %518 }
 0x18b   :  { %v617_v1 = vmul.f32 0.00390625, %v519_v33 }
 0x18d   :  { %v667_v39 = vsub.f32 %v617_v1, %v642_v45 }
 0x18e   :  { %v397_v15 = vpop.xlane.xlu0 %396 }
 0x18f   :  { %v692_v0 = vmax.f32 %v667_v39, 0.0  ;;  %v593_v24 = vmul.f32 0.00390625, %v397_v15 }
 0x191   :  { %v767_v51 = vadd.f32 1e-05, %v692_v0  ;;  %v643_v46 = vmul.f32 %v593_v24, %v593_v24 }
 0x192   :  { %v522_v44 = vpop.xlane.xlu0 %521 }
 0x193   :  { %2313 = vrsqrt.f32 %v767_v51  ;;  %v618_v26 = vmul.f32 0.00390625, %v522_v44  ;;  %v391_v44 = vld [vmem:[%s4388_s4] sm:$0x3] }
 0x194   :  { %v3021_v15 = vrot.slane %v391_v44, %v2665_v53  ;;  %v3024_v0 = vrot.slane %v391_v44, %v2670_v57 }
 0x195   :  { %v668_v6 = vsub.f32 %v618_v26, %v643_v46  ;;  %v717_v46 = vsub.f32 %v2679_v7, %v592_v62  ;;  %v3018_v26 = vrot.slane %v390_v21, %v2670_v57 }
 0x196   :  { %v400_v5 = vpop.xlane.xlu0 %399 }
 0x197   :  { %v693_v20 = vmax.f32 %v668_v6, 0.0  ;;  %v3002_v4 = vmul.f32 0.00390625, %v400_v5  ;;  %v718_v5 = vsub.f32 %v2682_v11, %v592_v62  ;;  %v3015_v6 = vrot.slane %v390_v21, %v2665_v53 }
 0x199   :  { %v768_v48 = vadd.f32 1e-05, %v693_v20  ;;  %v644_v13 = vmul.f32 %v3002_v4, %v3002_v4 }
 0x19a   :  { %v525_v30 = vpop.xlane.xlu0 %524 }
 0x19b   :  { %2315 = vrsqrt.f32 %v768_v48  ;;  %v619_v33 = vmul.f32 0.00390625, %v525_v30 }
 0x19d   :  { %v2314_v20 = vpop.eup %2313  ;;  %v669_v45 = vsub.f32 %v619_v33, %v644_v13  ;;  %v719_v33 = vsub.f32 %v2691_v31, %v593_v24 }
 0x19e   :  { %v817_v1 = vmul.f32 %v2314_v20, %v717_v46  ;;  %v818_v39 = vmul.f32 %v2314_v20, %v718_v5  ;;  %v720_v46 = vsub.f32 %v2694_v32, %v593_v24 }
 0x19f   :  { %v694_v51 = vmax.f32 %v669_v45, 0.0 }
 0x1a0   :  { %v879_v7 = vmul.f32 %v3018_v26, %v818_v39  ;;  %v878_v11 = vmul.f32 %v3015_v6, %v817_v1 }
 0x1a1   :  { %v769_v62 = vadd.f32 1e-05, %v694_v51 }
 0x1a2   :  { %v415_v48 = vpop.xlane.xlu0 %414  ;;  %v940_v21 = vadd.f32 %v3024_v0, %v879_v7  ;;  %v939_v30 = vadd.f32 %v3021_v15, %v878_v11 }
 0x1a3   :  { %2317 = vrsqrt.f32 %v769_v62  ;;  %v3030_v13 = vmul.f32 0.00390625, %v415_v48 }
 0x1a4   :  { %v990_v44 = vmax.f32 %v940_v21, 0.0  ;;  %v989_v5 = vmax.f32 %v939_v30, 0.0 }
 0x1a5   :  { %v2316_v20 = vpop.eup %2315  ;;  %v649_v7 = vmul.f32 %v3030_v13, %v3030_v13 }
 0x1a6   :  { %v418_v45 = vpop.xlane.xlu1 %417  ;;  %1179 = vmatprep.mubr.f32.mxu0 %v990_v44  ;;  %v540_v39 = vpop.xlane.xlu0 %539  ;;  %v820_v1 = vmul.f32 %v2316_v20, %v720_v46  ;;  %v819_v51 = vmul.f32 %v2316_v20, %v719_v33 }
 0x1a7   :  { %v3034_v57 = vmul.f32 0.00390625, %v418_v45  ;;  %v624_v11 = vmul.f32 0.00390625, %v540_v39  ;;  %1180 = vmatmul.mubr.f32.vlgmr.msra.gmra.mrb[50].mxu0 %v989_v5  ;;  %v721_v5 = vsub.f32 %v2707_v49, %v3002_v4  ;;  %v722_v45 = vsub.f32 %v2710_v50, %v3002_v4 }
 0x1a8   :  { %v881_v62 = vmul.f32 %v3018_v26, %v820_v1  ;;  %v880_v31 = vmul.f32 %v3015_v6, %v819_v51 }
 0x1a9   :  { %v674_v32 = vsub.f32 %v624_v11, %v649_v7  ;;  %v650_v33 = vmul.f32 %v3034_v57, %v3034_v57 }
 0x1aa   :  { %v543_v24 = vpop.xlane.xlu1 %542  ;;  %v421_v48 = vpop.xlane.xlu0 %420  ;;  %v942_v21 = vadd.f32 %v3024_v0, %v881_v62  ;;  %v941_v30 = vadd.f32 %v3021_v15, %v880_v31 }
 0x1ab   :  { %v699_v46 = vmax.f32 %v674_v32, 0.0  ;;  %v625_v44 = vmul.f32 0.00390625, %v543_v24  ;;  %v3044_v20 = vmul.f32 0.00390625, %v421_v48 }
 0x1ac   :  { %v992_v39 = vmax.f32 %v942_v21, 0.0  ;;  %v991_v1 = vmax.f32 %v941_v30, 0.0 }
 0x1ad   :  { %v2318_v51 = vpop.eup %2317  ;;  %v774_v7 = vadd.f32 1e-05, %v699_v46  ;;  %v675_v11 = vsub.f32 %v625_v44, %v650_v33  ;;  %v651_v31 = vmul.f32 %v3044_v20, %v3044_v20 }
 0x1ae   :  { %v546_v62 = vpop.xlane.xlu1 %545  ;;  %1185 = vmatprep.mubr.f32.mxu0 %v992_v39  ;;  %v424_v32 = vpop.xlane.xlu0 %423  ;;  %v822_v24 = vmul.f32 %v2318_v51, %v722_v45  ;;  %v821_v48 = vmul.f32 %v2318_v51, %v721_v5 }
 0x1af   :  { %2319 = vrsqrt.f32 %v774_v7  ;;  %v700_v53 = vmax.f32 %v675_v11, 0.0  ;;  %v626_v63 = vmul.f32 0.00390625, %v546_v62  ;;  %v3052_v49 = vmul.f32 0.00390625, %v424_v32  ;;  %1186 = vmatmul.mubr.f32.gmra.mrb[52].mxu0 %v991_v1 }
 0x1b0   :  { %v883_v50 = vmul.f32 %v3018_v26, %v822_v24  ;;  %v882_v4 = vmul.f32 %v3015_v6, %v821_v48 }
 0x1b1   :  { %v775_v21 = vadd.f32 1e-05, %v700_v53  ;;  %v676_v30 = vsub.f32 %v626_v63, %v651_v31  ;;  %v652_v33 = vmul.f32 %v3052_v49, %v3052_v49 }
 0x1b2   :  { %v549_v46 = vpop.xlane.xlu1 %548  ;;  %v427_v44 = vpop.xlane.xlu0 %426  ;;  %v944_v45 = vadd.f32 %v3024_v0, %v883_v50  ;;  %v943_v5 = vadd.f32 %v3021_v15, %v882_v4  ;;  %v731_v4 = vsub.f32 %v2731_v23, %v3030_v13 }
 0x1b3   :  { %2321 = vrsqrt.f32 %v775_v21  ;;  %v701_v39 = vmax.f32 %v676_v30, 0.0  ;;  %v627_v51 = vmul.f32 0.00390625, %v549_v46  ;;  %v3060_v7 = vmul.f32 0.00390625, %v427_v44 }
 0x1b4   :  { %v994_v1 = vmax.f32 %v944_v45, 0.0  ;;  %v993_v11 = vmax.f32 %v943_v5, 0.0  ;;  %v732_v21 = vsub.f32 %v2734_v27, %v3030_v13  ;;  %v733_v44 = vsub.f32 %v2743_v38, %v3034_v57 }
 0x1b5   :  { %v776_v62 = vadd.f32 1e-05, %v701_v39  ;;  %v677_v32 = vsub.f32 %v627_v51, %v652_v33  ;;  %v653_v63 = vmul.f32 %v3060_v7, %v3060_v7  ;;  %v734_v27 = vsub.f32 %v2746_v42, %v3034_v57 }
 0x1b6   :  { %v552_v53 = vpop.xlane.xlu1 %551  ;;  %1191 = vmatprep.mubr.f32.mxu0 %v994_v1  ;;  %v430_v31 = vpop.xlane.xlu0 %429  ;;  %v735_v13 = vsub.f32 %v2755_v60, %v3044_v20 }
 0x1b7   :  { %2323 = vrsqrt.f32 %v776_v62  ;;  %v702_v24 = vmax.f32 %v677_v32, 0.0  ;;  %v628_v48 = vmul.f32 0.00390625, %v552_v53  ;;  %v3064_v50 = vmul.f32 0.00390625, %v430_v31  ;;  %1192 = vmatmul.mubr.f32.gmra.mrb[54].mxu0 %v993_v11 }
 0x1b8   :  { %v737_v31 = vsub.f32 %v2767_v18, %v3052_v49 }
 0x1b9   :  { %v2320_v30 = vpop.eup %2319  ;;  %v777_v46 = vadd.f32 1e-05, %v702_v24  ;;  %v678_v33 = vsub.f32 %v628_v48, %v653_v63  ;;  %v654_v5 = vmul.f32 %v3064_v50, %v3064_v50  ;;  %v736_v63 = vsub.f32 %v2758_v3, %v3044_v20 }
 0x1ba   :  { %v555_v45 = vpop.xlane.xlu1 %554  ;;  %v433_v39 = vpop.xlane.xlu0 %432  ;;  %v832_v51 = vmul.f32 %v2320_v30, %v732_v21  ;;  %v831_v1 = vmul.f32 %v2320_v30, %v731_v4 }
 0x1bb   :  { %2325 = vrsqrt.f32 %v777_v46  ;;  %v703_v11 = vmax.f32 %v678_v33, 0.0  ;;  %v629_v62 = vmul.f32 0.00390625, %v555_v45  ;;  %v3074_v23 = vmul.f32 0.00390625, %v433_v39 }
 0x1bc   :  { %v893_v38 = vmul.f32 %v3018_v26, %v832_v51  ;;  %v892_v32 = vmul.f32 %v3015_v6, %v831_v1  ;;  %v738_v51 = vsub.f32 %v2770_v22, %v3052_v49  ;;  %v739_v1 = vsub.f32 %v2779_v36, %v3060_v7 }
 0x1bd   :  { %v2322_v53 = vpop.eup %2321  ;;  %v778_v24 = vadd.f32 1e-05, %v703_v11  ;;  %v679_v48 = vsub.f32 %v629_v62, %v654_v5  ;;  %v655_v57 = vmul.f32 %v3074_v23, %v3074_v23 }
 0x1be   :  { %v558_v4 = vpop.xlane.xlu1 %557  ;;  %v436_v42 = vpop.xlane.xlu0 %435  ;;  %v954_v60 = vadd.f32 %v3024_v0, %v893_v38  ;;  %v953_v21 = vadd.f32 %v3021_v15, %v892_v32  ;;  %v834_v30 = vmul.f32 %v2322_v53, %v734_v27  ;;  %v833_v5 = vmul.f32 %v2322_v53, %v733_v44 }
 0x1bf   :  { %2327 = vrsqrt.f32 %v778_v24  ;;  %v704_v46 = vmax.f32 %v679_v48, 0.0  ;;  %v630_v33 = vmul.f32 0.00390625, %v558_v4  ;;  %v3090_v45 = vmul.f32 0.00390625, %v436_v42 }
 0x1c0   :  { %v1004_v3 = vmax.f32 %v954_v60, 0.0  ;;  %v1003_v20 = vmax.f32 %v953_v21, 0.0  ;;  %v895_v18 = vmul.f32 %v3018_v26, %v834_v30  ;;  %v894_v48 = vmul.f32 %v3015_v6, %v833_v5 }
 0x1c1   :  { %v2324_v39 = vpop.eup %2323  ;;  %v779_v11 = vadd.f32 1e-05, %v704_v46  ;;  %v680_v62 = vsub.f32 %v630_v33, %v655_v57  ;;  %v656_v38 = vmul.f32 %v3090_v45, %v3090_v45  ;;  %v740_v21 = vsub.f32 %v2782_v41, %v3060_v7 }
 0x1c2   :  { %v561_v27 = vpop.xlane.xlu1 %560  ;;  %1221 = vmatprep.mubr.f32.mxu1 %v1004_v3  ;;  %v439_v32 = vpop.xlane.xlu0 %438  ;;  %v956_v24 = vadd.f32 %v3024_v0, %v895_v18  ;;  %v836_v44 = vmul.f32 %v2324_v39, %v736_v63  ;;  %v955_v49 = vadd.f32 %v3021_v15, %v894_v48  ;;  %v835_v42 = vmul.f32 %v2324_v39, %v735_v13 }
 0x1c3   :  { %2329 = vrsqrt.f32 %v779_v11  ;;  %v705_v53 = vmax.f32 %v680_v62, 0.0  ;;  %v631_v4 = vmul.f32 0.00390625, %v561_v27  ;;  %v3101_v22 = vmul.f32 0.00390625, %v439_v32  ;;  %1222 = vmatmul.mubr.f32.vlgmr.msra.gmra.mrb[0].mxu1 %v1003_v20 }
 0x1c4   :  { %v1006_v36 = vmax.f32 %v956_v24, 0.0  ;;  %v897_v57 = vmul.f32 %v3018_v26, %v836_v44  ;;  %v741_v30 = vsub.f32 %v2791_v61, %v3064_v50  ;;  %v1005_v18 = vmax.f32 %v955_v49, 0.0 }
 0x1c5   :  { %v2326_v60 = vpop.eup %2325  ;;  %v780_v63 = vadd.f32 1e-05, %v705_v53  ;;  %v681_v46 = vsub.f32 %v631_v4, %v656_v38  ;;  %v657_v33 = vmul.f32 %v3101_v22, %v3101_v22  ;;  %v896_v13 = vmul.f32 %v3015_v6, %v835_v42 }
 0x1c6   :  { %v564_v3 = vpop.xlane.xlu1 %563  ;;  %1227 = vmatprep.mubr.f32.mxu1 %v1006_v36  ;;  %v442_v20 = vpop.xlane.xlu0 %441  ;;  %v958_v5 = vadd.f32 %v3024_v0, %v897_v57  ;;  %v838_v62 = vmul.f32 %v2326_v60, %v738_v51  ;;  %v837_v27 = vmul.f32 %v2326_v60, %v737_v31  ;;  %v742_v32 = vsub.f32 %v2794_v2, %v3064_v50 }
 0x1c7   :  { %2331 = vrsqrt.f32 %v780_v63  ;;  %v706_v39 = vmax.f32 %v681_v46, 0.0  ;;  %v632_v11 = vmul.f32 0.00390625, %v564_v3  ;;  %v3113_v41 = vmul.f32 0.00390625, %v442_v20  ;;  %1228 = vmatmul.mubr.f32.gmra.mrb[2].mxu1 %v1005_v18 }
 0x1c8   :  { %v1008_v61 = vmax.f32 %v958_v5, 0.0  ;;  %v957_v7 = vadd.f32 %v3021_v15, %v896_v13  ;;  %v743_v24 = vsub.f32 %v2803_v12, %v3074_v23  ;;  %v899_v57 = vmul.f32 %v3018_v26, %v838_v62 }
 0x1c9   :  { %v2328_v38 = vpop.eup %2327  ;;  %v781_v48 = vadd.f32 1e-05, %v706_v39  ;;  %v682_v44 = vsub.f32 %v632_v11, %v657_v33  ;;  %v658_v53 = vmul.f32 %v3113_v41, %v3113_v41  ;;  %v898_v31 = vmul.f32 %v3015_v6, %v837_v27 }
 0x1ca   :  { %v567_v4 = vpop.xlane.xlu1 %566  ;;  %1233 = vmatprep.mubr.f32.mxu1 %v1008_v61  ;;  %v445_v36 = vpop.xlane.xlu0 %444  ;;  %v1007_v49 = vmax.f32 %v957_v7, 0.0  ;;  %v960_v50 = vadd.f32 %v3024_v0, %v899_v57  ;;  %v840_v63 = vmul.f32 %v2328_v38, %v740_v21  ;;  %v839_v46 = vmul.f32 %v2328_v38, %v739_v1 }
 0x1cb   :  { %2333 = vrsqrt.f32 %v781_v48  ;;  %v707_v51 = vmax.f32 %v682_v44, 0.0  ;;  %v633_v42 = vmul.f32 0.00390625, %v567_v4  ;;  %v3124_v2 = vmul.f32 0.00390625, %v445_v36 }
 0x1cc   :  { %1234 = vmatmul.mubr.f32.gmra.mrb[4].mxu1 %v1007_v49  ;;  %v959_v60 = vadd.f32 %v3021_v15, %v898_v31  ;;  %v744_v3 = vsub.f32 %v2806_v16, %v3074_v23  ;;  %v745_v20 = vsub.f32 %v2815_v25, %v3090_v45  ;;  %v1010_v11 = vmax.f32 %v960_v50, 0.0 }
 0x1cd   :  { %v2330_v33 = vpop.eup %2329  ;;  %v782_v18 = vadd.f32 1e-05, %v707_v51  ;;  %v683_v5 = vsub.f32 %v633_v42, %v658_v53  ;;  %v659_v13 = vmul.f32 %v3124_v2, %v3124_v2  ;;  %v901_v62 = vmul.f32 %v3018_v26, %v840_v63 }
 0x1ce   :  { %v570_v39 = vpop.xlane.xlu1 %569  ;;  %v403_v61 = vpop.xlane.xlu0 %402  ;;  %v1009_v7 = vmax.f32 %v959_v60, 0.0  ;;  %1239 = vmatprep.mubr.f32.mxu1 %v1010_v11  ;;  %v900_v38 = vmul.f32 %v3015_v6, %v839_v46  ;;  %v842_v48 = vmul.f32 %v2330_v33, %v742_v32  ;;  %v841_v44 = vmul.f32 %v2330_v33, %v741_v30 }
 0x1cf   :  { %2335 = vrsqrt.f32 %v782_v18  ;;  %v708_v1 = vmax.f32 %v683_v5, 0.0  ;;  %v634_v21 = vmul.f32 0.00390625, %v570_v39  ;;  %v3135_v27 = vmul.f32 0.00390625, %v403_v61 }
 0x1d0   :  { %v962_v16 = vadd.f32 %v3024_v0, %v901_v62  ;;  %v746_v4 = vsub.f32 %v2818_v28, %v3090_v45  ;;  %v747_v36 = vsub.f32 %v2827_v37, %v3101_v22  ;;  %1240 = vmatmul.mubr.f32.gmra.mrb[6].mxu1 %v1009_v7  ;;  %v961_v60 = vadd.f32 %v3021_v15, %v900_v38 }
 0x1d1   :  { %v2332_v53 = vpop.eup %2331  ;;  %v783_v49 = vadd.f32 1e-05, %v708_v1  ;;  %v684_v57 = vsub.f32 %v634_v21, %v659_v13  ;;  %v645_v42 = vmul.f32 %v3135_v27, %v3135_v27  ;;  %v903_v30 = vmul.f32 %v3018_v26, %v842_v48 }
 0x1d2   :  { %v448_v31 = vpop.xlane.xlu1 %447  ;;  %v1012_v51 = vmax.f32 %v962_v16, 0.0  ;;  %v528_v50 = vpop.xlane.xlu0 %527  ;;  %v1011_v46 = vmax.f32 %v961_v60, 0.0  ;;  %v902_v18 = vmul.f32 %v3015_v6, %v841_v44  ;;  %v844_v5 = vmul.f32 %v2332_v53, %v744_v3 }
 0x1d3   :  { %2337 = vrsqrt.f32 %v783_v49  ;;  %v709_v32 = vmax.f32 %v684_v57, 0.0  ;;  %v3147_v63 = vmul.f32 0.00390625, %v448_v31  ;;  %v620_v28 = vmul.f32 0.00390625, %v528_v50 }
 0x1d4   :  { %1245 = vmatprep.mubr.f32.mxu1 %v1012_v51  ;;  %v964_v33 = vadd.f32 %v3024_v0, %v903_v30  ;;  %v748_v39 = vsub.f32 %v2830_v40, %v3101_v22  ;;  %v749_v11 = vsub.f32 %v2839_v55, %v3113_v41  ;;  %v963_v38 = vadd.f32 %v3021_v15, %v902_v18 }
 0x1d5   :  { %v2334_v13 = vpop.eup %2333  ;;  %v784_v61 = vadd.f32 1e-05, %v709_v32  ;;  %v670_v7 = vsub.f32 %v620_v28, %v645_v42  ;;  %1246 = vmatmul.mubr.f32.gmra.mrb[8].mxu1 %v1011_v46  ;;  %v660_v62 = vmul.f32 %v3147_v63, %v3147_v63  ;;  %v905_v3 = vmul.f32 %v3018_v26, %v844_v5 }
 0x1d6   :  { %v573_v1 = vpop.xlane.xlu1 %572  ;;  %v1014_v21 = vmax.f32 %v964_v33, 0.0  ;;  %v406_v16 = vpop.xlane.xlu0 %405  ;;  %v750_v48 = vsub.f32 %v2842_v58, %v3113_v41  ;;  %v1013_v57 = vmax.f32 %v963_v38, 0.0  ;;  %v843_v51 = vmul.f32 %v2332_v53, %v743_v24 }
 0x1d7   :  { %v695_v40 = vmax.f32 %v670_v7, 0.0  ;;  %v635_v44 = vmul.f32 0.00390625, %v573_v1  ;;  %v3161_v49 = vmul.f32 0.00390625, %v406_v16  ;;  %v966_v31 = vadd.f32 %v3024_v0, %v905_v3 }
 0x1d8   :  { %1251 = vmatprep.mubr.f32.mxu1 %v1014_v21  ;;  %v846_v42 = vmul.f32 %v2334_v13, %v746_v4  ;;  %v751_v60 = vsub.f32 %v2851_v9, %v3124_v2  ;;  %v752_v58 = vsub.f32 %v2854_v14, %v3124_v2  ;;  %2339 = vrsqrt.f32 %v784_v61 }
 0x1d9   :  { %v2336_v50 = vpop.eup %2335  ;;  %v685_v30 = vsub.f32 %v635_v44, %v660_v62  ;;  %v770_v32 = vadd.f32 1e-05, %v695_v40  ;;  %1252 = vmatmul.mubr.f32.gmra.mrb[10].mxu1 %v1013_v57  ;;  %v1016_v46 = vmax.f32 %v966_v31, 0.0  ;;  %v904_v18 = vmul.f32 %v3015_v6, %v843_v51 }
 0x1da   :  { %v451_v28 = vpop.xlane.xlu1 %450  ;;  %v531_v33 = vpop.xlane.xlu0 %530  ;;  %v907_v12 = vmul.f32 %v3018_v26, %v846_v42  ;;  %v646_v53 = vmul.f32 %v3161_v49, %v3161_v49  ;;  %v845_v7 = vmul.f32 %v2334_v13, %v745_v20  ;;  %v848_v62 = vmul.f32 %v2336_v50, %v748_v39 }
 0x1db   :  { %v710_v23 = vmax.f32 %v685_v30, 0.0  ;;  %v3173_v24 = vmul.f32 0.00390625, %v451_v28  ;;  %v621_v4 = vmul.f32 0.00390625, %v531_v33  ;;  %1257 = vmatprep.mubr.f32.mxu1 %v1016_v46  ;;  %v965_v5 = vadd.f32 %v3021_v15, %v904_v18 }
 0x1dc   :  { %v968_v61 = vadd.f32 %v3024_v0, %v907_v12  ;;  %v723_v21 = vsub.f32 %v2858_v17, %v3135_v27  ;;  %v724_v16 = vsub.f32 %v2862_v19, %v3135_v27  ;;  %v906_v25 = vmul.f32 %v3015_v6, %v845_v7 }
 0x1dd   :  { %v2338_v1 = vpop.eup %2337  ;;  %v785_v38 = vadd.f32 1e-05, %v710_v23  ;;  %v671_v3 = vsub.f32 %v621_v4, %v646_v53  ;;  %v1015_v40 = vmax.f32 %v965_v5, 0.0  ;;  %v661_v44 = vmul.f32 %v3173_v24, %v3173_v24 }
 0x1de   :  { %v576_v57 = vpop.xlane.xlu1 %575  ;;  %v1018_v31 = vmax.f32 %v968_v61, 0.0  ;;  %v409_v51 = vpop.xlane.xlu0 %408  ;;  %2341 = vrsqrt.f32 %v770_v32  ;;  %v967_v39 = vadd.f32 %v3021_v15, %v906_v25  ;;  %v909_v42 = vmul.f32 %v3018_v26, %v848_v62 }
 0x1df   :  { %v696_v45 = vmax.f32 %v671_v3, 0.0  ;;  %v636_v20 = vmul.f32 0.00390625, %v576_v57  ;;  %v3189_v13 = vmul.f32 0.00390625, %v409_v51  ;;  %1258 = vmatmul.mubr.f32.gmra.mrb[12].mxu1 %v1015_v40  ;;  %v847_v30 = vmul.f32 %v2336_v50, %v747_v36 }
 0x1e0   :  { %v850_v28 = vmul.f32 %v2338_v1, %v750_v48  ;;  %v753_v46 = vsub.f32 %v2871_v43, %v3147_v63  ;;  %2343 = vrsqrt.f32 %v785_v38  ;;  %1263 = vmatprep.mubr.f32.mxu1 %v1018_v31  ;;  %v1017_v18 = vmax.f32 %v967_v39, 0.0 }
 0x1e1   :  { %v771_v33 = vadd.f32 1e-05, %v696_v45  ;;  %v686_v32 = vsub.f32 %v636_v20, %v661_v44  ;;  %v970_v23 = vadd.f32 %v3024_v0, %v909_v42  ;;  %v647_v53 = vmul.f32 %v3189_v13, %v3189_v13 }
 0x1e2   :  { %v454_v12 = vpop.xlane.xlu1 %453  ;;  %v534_v4 = vpop.xlane.xlu0 %533  ;;  %v908_v5 = vmul.f32 %v3015_v6, %v847_v30  ;;  %v911_v7 = vmul.f32 %v3018_v26, %v850_v28  ;;  %v849_v62 = vmul.f32 %v2338_v1, %v749_v11  ;;  %v754_v38 = vsub.f32 %v2874_v47, %v3147_v63 }
 0x1e3   :  { %v2340_v37 = vpop.eup %2339  ;;  %2345 = vrsqrt.f32 %v771_v33  ;;  %v711_v22 = vmax.f32 %v686_v32, 0.0  ;;  %v3202_v36 = vmul.f32 0.00390625, %v454_v12  ;;  %v622_v48 = vmul.f32 0.00390625, %v534_v4  ;;  %1264 = vmatmul.mubr.f32.gmra.mrb[14].mxu1 %v1017_v18 }
 0x1e4   :  { %v1020_v50 = vmax.f32 %v970_v23, 0.0  ;;  %v969_v61 = vadd.f32 %v3021_v15, %v908_v5  ;;  %v725_v3 = vsub.f32 %v2890_v56, %v3161_v49  ;;  %v972_v25 = vadd.f32 %v3024_v0, %v911_v7 }
 0x1e5   :  { %v786_v40 = vadd.f32 1e-05, %v711_v22  ;;  %v672_v44 = vsub.f32 %v622_v48, %v647_v53  ;;  %v662_v31 = vmul.f32 %v3202_v36, %v3202_v36  ;;  %v910_v55 = vmul.f32 %v3015_v6, %v849_v62 }
 0x1e6   :  { %1269 = vmatprep.mubr.f32.mxu1 %v1020_v50  ;;  %v1019_v57 = vmax.f32 %v969_v61, 0.0  ;;  %v579_v51 = vpop.xlane.xlu1 %578  ;;  %v412_v45 = vpop.xlane.xlu0 %411  ;;  %v726_v41 = vsub.f32 %v2894_v59, %v3161_v49  ;;  %v1022_v20 = vmax.f32 %v972_v25, 0.0  ;;  %v852_v42 = vmul.f32 %v2340_v37, %v752_v58 }
 0x1e7   :  { %v697_v47 = vmax.f32 %v672_v44, 0.0  ;;  %v637_v11 = vmul.f32 0.00390625, %v579_v51  ;;  %v3219_v1 = vmul.f32 0.00390625, %v412_v45  ;;  %v971_v39 = vadd.f32 %v3021_v15, %v910_v55 }
 0x1e8   :  { %1270 = vmatmul.mubr.f32.gmra.mrb[16].mxu1 %v1019_v57  ;;  %v851_v30 = vmul.f32 %v2340_v37, %v751_v60  ;;  %v2342_v28 = vpop.eup %2341  ;;  %v755_v59 = vsub.f32 %v2897_v8, %v3173_v24  ;;  %2347 = vrsqrt.f32 %v786_v40  ;;  %v913_v23 = vmul.f32 %v3018_v26, %v852_v42 }
 0x1e9   :  { %v772_v33 = vadd.f32 1e-05, %v697_v47  ;;  %v687_v32 = vsub.f32 %v637_v11, %v662_v31  ;;  %1275 = vmatprep.mubr.f32.mxu1 %v1022_v20  ;;  %v1021_v18 = vmax.f32 %v971_v39, 0.0  ;;  %v648_v14 = vmul.f32 %v3219_v1, %v3219_v1 }
 0x1ea   :  { %v457_v12 = vpop.xlane.xlu1 %456  ;;  %v537_v58 = vpop.xlane.xlu0 %536  ;;  %v912_v53 = vmul.f32 %v3015_v6, %v851_v30  ;;  %v974_v5 = vadd.f32 %v3024_v0, %v913_v23  ;;  %v824_v22 = vmul.f32 %v2342_v28, %v724_v16  ;;  %v823_v48 = vmul.f32 %v2342_v28, %v723_v21 }
 0x1eb   :  { %v2344_v9 = vpop.eup %2343  ;;  %2349 = vrsqrt.f32 %v772_v33  ;;  %v712_v2 = vmax.f32 %v687_v32, 0.0  ;;  %v3234_v60 = vmul.f32 0.00390625, %v457_v12  ;;  %v623_v4 = vmul.f32 0.00390625, %v537_v58 }
 0x1ec   :  { %1276 = vmatmul.mubr.f32.gmra.mrb[18].mxu1 %v1021_v18  ;;  %v973_v37 = vadd.f32 %v3021_v15, %v912_v53  ;;  %v756_v61 = vsub.f32 %v2900_v10, %v3173_v24  ;;  %v727_v7 = vsub.f32 %v2916_v34, %v3189_v13  ;;  %v1024_v44 = vmax.f32 %v974_v5, 0.0  ;;  %v4442_v18 = vld [vmem:[#allocation8_spill] sm:$0xff] }
 0x1ed   :  { %v2346_v50 = vpop.eup %2345  ;;  %v787_v62 = vadd.f32 1e-05, %v712_v2  ;;  %v673_v40 = vsub.f32 %v623_v4, %v648_v14  ;;  %v663_v31 = vmul.f32 %v3234_v60, %v3234_v60  ;;  %v885_v16 = vmul.f32 %v3018_v26, %v824_v22 }
 0x1ee   :  { %v1023_v57 = vmax.f32 %v973_v37, 0.0  ;;  %v582_v19 = vpop.xlane.xlu1 %581  ;;  %v884_v21 = vmul.f32 %v3015_v6, %v823_v48  ;;  %1281 = vmatprep.mubr.f32.mxu1 %v1024_v44  ;;  %v854_v51 = vmul.f32 %v2344_v9, %v754_v38  ;;  %v853_v34 = vmul.f32 %v2344_v9, %v753_v46 }
 0x1ef   :  { %2351 = vrsqrt.f32 %v787_v62  ;;  %v698_v17 = vmax.f32 %v673_v40, 0.0  ;;  %v638_v27 = vmul.f32 0.00390625, %v582_v19  ;;  %v946_v10 = vadd.f32 %v3024_v0, %v885_v16 }
 0x1f0   :  { %v826_v25 = vmul.f32 %v2346_v50, %v726_v41  ;;  %1282 = vmatmul.mubr.f32.gmra.mrb[20].mxu1 %v1023_v57  ;;  %v945_v47 = vadd.f32 %v3021_v15, %v884_v21  ;;  %v825_v11 = vmul.f32 %v2346_v50, %v725_v3  ;;  %v915_v42 = vmul.f32 %v3018_v26, %v854_v51 }
 0x1f1   :  { %v773_v45 = vadd.f32 1e-05, %v698_v17  ;;  %v688_v55 = vsub.f32 %v638_v27, %v663_v31  ;;  %v996_v20 = vmax.f32 %v946_v10, 0.0  ;;  %v914_v38 = vmul.f32 %v3015_v6, %v853_v34 }
 0x1f2   :  { %v460_v39 = vpop.xlane.xlu1 %459  ;;  %v887_v30 = vmul.f32 %v3018_v26, %v826_v25  ;;  %v2348_v43 = vpop.eup %2347  ;;  %v995_v46 = vmax.f32 %v945_v47, 0.0  ;;  %v976_v28 = vadd.f32 %v3024_v0, %v915_v42  ;;  %v886_v3 = vmul.f32 %v3015_v6, %v825_v11 }
 0x1f3   :  { %2353 = vrsqrt.f32 %v773_v45  ;;  %v713_v63 = vmax.f32 %v688_v55, 0.0  ;;  %v3263_v41 = vmul.f32 0.00390625, %v460_v39  ;;  %1197 = vmatprep.mubr.f32.mxu0 %v996_v20  ;;  %v975_v56 = vadd.f32 %v3021_v15, %v914_v38 }
 0x1f4   :  { %v948_v49 = vadd.f32 %v3024_v0, %v887_v30  ;;  %v728_v32 = vsub.f32 %v2920_v35, %v3189_v13  ;;  %v757_v12 = vsub.f32 %v4442_v18, %v3202_v36  ;;  %1198 = vmatmul.mubr.f32.gmra.mrb[56].mxu0 %v995_v46  ;;  %v1026_v58 = vmax.f32 %v976_v28, 0.0  ;;  %v4443_v13 = vld [vmem:[#allocation9_spill] sm:$0xff] }
 0x1f5   :  { %v2350_v33 = vpop.eup %2349  ;;  %v788_v23 = vadd.f32 1e-05, %v713_v63  ;;  %v664_v14 = vmul.f32 %v3263_v41, %v3263_v41  ;;  %v1025_v53 = vmax.f32 %v975_v56, 0.0  ;;  %v947_v4 = vadd.f32 %v3021_v15, %v886_v3 }
 0x1f6   :  { %v585_v9 = vpop.xlane.xlu1 %584  ;;  %v998_v2 = vmax.f32 %v948_v49, 0.0  ;;  %v856_v37 = vmul.f32 %v2348_v43, %v756_v61  ;;  %v855_v35 = vmul.f32 %v2348_v43, %v755_v59  ;;  %v758_v22 = vsub.f32 %v4443_v13, %v3202_v36  ;;  %1287 = vmatprep.mubr.f32.mxu1 %v1026_v58 }
 0x1f7   :  { %2355 = vrsqrt.f32 %v788_v23  ;;  %v639_v5 = vmul.f32 0.00390625, %v585_v9  ;;  %v997_v48 = vmax.f32 %v947_v4, 0.0  ;;  %v828_v50 = vmul.f32 %v2350_v33, %v728_v32  ;;  %1288 = vmatmul.mubr.f32.gmra.mrb[22].mxu1 %v1025_v53 }
 0x1f8   :  { %1203 = vmatprep.mubr.f32.mxu0 %v998_v2  ;;  %v827_v62 = vmul.f32 %v2350_v33, %v727_v7  ;;  %v729_v44 = vsub.f32 %v2942_v54, %v3219_v1  ;;  %v917_v61 = vmul.f32 %v3018_v26, %v856_v37  ;;  %v916_v31 = vmul.f32 %v3015_v6, %v855_v35 }
 0x1f9   :  { %v2352_v40 = vpop.eup %2351  ;;  %v689_v57 = vsub.f32 %v639_v5, %v664_v14  ;;  %1204 = vmatmul.mubr.f32.gmra.mrb[58].mxu0 %v997_v48  ;;  %v889_v24 = vmul.f32 %v3018_v26, %v828_v50  ;;  %v730_v25 = vsub.f32 %v2946_v29, %v3219_v1  ;;  %v759_v45 = vsub.f32 %v2949_v52, %v3234_v60  ;;  %v4444_v29 = vld [vmem:[#allocation10_spill] sm:$0xff] }
 0x1fa   :  { %v463_v8 = vpop.xlane.xlu1 %462  ;;  %v888_v36 = vmul.f32 %v3015_v6, %v827_v62  ;;  %v858_v59 = vmul.f32 %v2352_v40, %v758_v22  ;;  %v857_v19 = vmul.f32 %v2352_v40, %v757_v12  ;;  %v978_v17 = vadd.f32 %v3024_v0, %v917_v61  ;;  %v4445_v62 = vld [vmem:[#allocation11_spill] sm:$0xff] }
 0x1fb   :  { %v714_v16 = vmax.f32 %v689_v57, 0.0  ;;  %v3287_v7 = vmul.f32 0.00390625, %v463_v8  ;;  %v977_v54 = vadd.f32 %v3021_v15, %v916_v31  ;;  %v950_v27 = vadd.f32 %v3024_v0, %v889_v24 }
 0x1fc   :  { %v949_v21 = vadd.f32 %v3021_v15, %v888_v36  ;;  %v919_v10 = vmul.f32 %v3018_v26, %v858_v59  ;;  %v918_v51 = vmul.f32 %v3015_v6, %v857_v19  ;;  %v1028_v47 = vmax.f32 %v978_v17, 0.0 }
 0x1fd   :  { %v2354_v34 = vpop.eup %2353  ;;  %v789_v55 = vadd.f32 1e-05, %v714_v16  ;;  %v1027_v11 = vmax.f32 %v977_v54, 0.0  ;;  %v665_v20 = vmul.f32 %v3287_v7, %v3287_v7  ;;  %v1000_v42 = vmax.f32 %v950_v27, 0.0 }
 0x1fe   :  { %v588_v39 = vpop.xlane.xlu1 %587  ;;  %v999_v38 = vmax.f32 %v949_v21, 0.0  ;;  %1293 = vmatprep.mubr.f32.mxu1 %v1028_v47  ;;  %v980_v43 = vadd.f32 %v3024_v0, %v919_v10  ;;  %v979_v63 = vadd.f32 %v3021_v15, %v918_v51  ;;  %v760_v1 = vsub.f32 %v4444_v29, %v3234_v60  ;;  %v4447_v21 = vld [vmem:[#allocation13_spill] sm:$0xff]  ;;  %v4448_v51 = vld [vmem:[#allocation14_spill] sm:$0xff] }
 0x1ff   :  { %2357 = vrsqrt.f32 %v789_v55  ;;  %v640_v30 = vmul.f32 0.00390625, %v588_v39  ;;  %1294 = vmatmul.mubr.f32.gmra.mrb[24].mxu1 %v1027_v11  ;;  %1209 = vmatprep.mubr.f32.mxu0 %v1000_v42  ;;  %v830_v52 = vmul.f32 %v2354_v34, %v730_v25  ;;  %v829_v46 = vmul.f32 %v2354_v34, %v729_v44  ;;  %v4446_v44 = vld [vmem:[#allocation12_spill] sm:$0xff] }
 0x200   :  { %1210 = vmatmul.mubr.f32.gmra.mrb[60].mxu0 %v999_v38  ;;  %v1030_v49 = vmax.f32 %v980_v43, 0.0  ;;  %v1029_v3 = vmax.f32 %v979_v63, 0.0  ;;  %v761_v40 = vsub.f32 %v4445_v62, %v3263_v41  ;;  %v762_v57 = vsub.f32 %v4446_v44, %v3263_v41  ;;  %v4450_v63 = vld [vmem:[#allocation16_spill] sm:$0xff] }
 0x201   :  { %v2356_v28 = vpop.eup %2355  ;;  %v690_v56 = vsub.f32 %v640_v30, %v665_v20  ;;  %v891_v32 = vmul.f32 %v3018_v26, %v830_v52  ;;  %v890_v18 = vmul.f32 %v3015_v6, %v829_v46  ;;  %v763_v10 = vsub.f32 %v4447_v21, %v3287_v7  ;;  %v4449_v30 = vld [vmem:[#allocation15_spill] sm:$0xff] }
 0x202   :  { %v466_v33 = vpop.xlane.xlu1 %465  ;;  %v860_v12 = vmul.f32 %v2356_v28, %v760_v1  ;;  %v859_v23 = vmul.f32 %v2356_v28, %v759_v45  ;;  %1299 = vmatprep.mubr.f32.mxu1 %v1030_v49  ;;  %v764_v34 = vsub.f32 %v4448_v51, %v3287_v7 }
 0x203   :  { %v715_v14 = vmax.f32 %v690_v56, 0.0  ;;  %v616_v58 = vmul.f32 0.00390625, %v466_v33  ;;  %1300 = vmatmul.mubr.f32.gmra.mrb[26].mxu1 %v1029_v3  ;;  %v952_v60 = vadd.f32 %v3024_v0, %v891_v32  ;;  %v951_v53 = vadd.f32 %v3021_v15, %v890_v18 }
 0x204   :  { %v921_v9 = vmul.f32 %v3018_v26, %v860_v12  ;;  %v920_v2 = vmul.f32 %v3015_v6, %v859_v23  ;;  %v1103_v12 = vld [vmem:[%s4390_s6] sm:$0x3] }
 0x205   :  { %v790_v4 = vadd.f32 1e-05, %v715_v14  ;;  %v666_v5 = vmul.f32 %v616_v58, %v616_v58  ;;  %v1002_v35 = vmax.f32 %v952_v60, 0.0  ;;  %v1001_v13 = vmax.f32 %v951_v53, 0.0  ;;  %v4451_v23 = vld [vmem:[#allocation6_spill] sm:$0xff] }
 0x206   :  { %v591_v37 = vpop.xlane.xlu1 %590  ;;  %v982_v22 = vadd.f32 %v3024_v0, %v921_v9  ;;  %v981_v48 = vadd.f32 %v3021_v15, %v920_v2  ;;  %v765_v43 = vsub.f32 %v4449_v30, %v616_v58  ;;  %v766_v29 = vsub.f32 %v4450_v63, %v616_v58  ;;  %v4452_v58 = vld [vmem:[#allocation7_spill] sm:$0xff] }
 0x207   :  { %2359 = vrsqrt.f32 %v790_v4  ;;  %v641_v50 = vmul.f32 0.00390625, %v591_v37  ;;  %1215 = vmatprep.mubr.f32.mxu0 %v1002_v35  ;;  %v3339_v14 = vrot.slane %v1103_v12, %v4451_v23  ;;  %v3342_v60 = vrot.slane %v1103_v12, %v4452_v58 }
 0x208   :  { %v1032_v61 = vmax.f32 %v982_v22, 0.0  ;;  %v1031_v31 = vmax.f32 %v981_v48, 0.0  ;;  %1216 = vmatmul.mubr.f32.gmra.mrb[62].mxu0 %v1001_v13 }
 0x209   :  { %v2358_v8 = vpop.eup %2357  ;;  %v691_v24 = vsub.f32 %v641_v50, %v666_v5 }
 0x20a   :  { %1305 = vmatprep.mubr.f32.mxu1 %v1032_v61  ;;  %v862_v36 = vmul.f32 %v2358_v8, %v762_v57  ;;  %v861_v59 = vmul.f32 %v2358_v8, %v761_v40 }
 0x20b   :  { %v716_v19 = vmax.f32 %v691_v24, 0.0  ;;  %1306 = vmatmul.mubr.f32.gmra.mrb[28].mxu1 %v1031_v31 }
 0x20c   :  { %v923_v16 = vmul.f32 %v3018_v26, %v862_v36  ;;  %v922_v17 = vmul.f32 %v3015_v6, %v861_v59 }
 0x20d   :  { %v791_v54 = vadd.f32 1e-05, %v716_v19 }
 0x20e   :  { %v984_v27 = vadd.f32 %v3024_v0, %v923_v16  ;;  %v983_v41 = vadd.f32 %v3021_v15, %v922_v17 }
 0x20f   :  { %2361 = vrsqrt.f32 %v791_v54 }
 0x210   :  { %v1034_v25 = vmax.f32 %v984_v27, 0.0  ;;  %v1033_v45 = vmax.f32 %v983_v41, 0.0 }
 0x211   :  { %v2360_v55 = vpop.eup %2359 }
 0x212   :  { %1311 = vmatprep.mubr.f32.mxu1 %v1034_v25  ;;  %v864_v47 = vmul.f32 %v2360_v55, %v764_v34  ;;  %v863_v11 = vmul.f32 %v2360_v55, %v763_v10 }
 0x213   :  { %1312 = vmatmul.mubr.f32.gmra.mrb[30].mxu1 %v1033_v45 }
 0x214   :  { %v925_v20 = vmul.f32 %v3018_v26, %v864_v47  ;;  %v924_v39 = vmul.f32 %v3015_v6, %v863_v11 }
 0x216   :  { %v986_v42 = vadd.f32 %v3024_v0, %v925_v20  ;;  %v985_v38 = vadd.f32 %v3021_v15, %v924_v39 }
 0x218   :  { %v1036_v7 = vmax.f32 %v986_v42, 0.0  ;;  %v1035_v1 = vmax.f32 %v985_v38, 0.0 }
 0x219   :  { %v2362_v52 = vpop.eup %2361 }
 0x21a   :  { %1317 = vmatprep.mubr.f32.mxu1 %v1036_v7  ;;  %v866_v46 = vmul.f32 %v2362_v52, %v766_v29  ;;  %v865_v28 = vmul.f32 %v2362_v52, %v765_v43 }
 0x21b   :  { %1318 = vmatmul.mubr.f32.gmra.mrb[32].mxu1 %v1035_v1 }
 0x21c   :  { %v927_v56 = vmul.f32 %v3018_v26, %v866_v46  ;;  %v926_v49 = vmul.f32 %v3015_v6, %v865_v28 }
 0x21e   :  { %v988_v3 = vadd.f32 %v3024_v0, %v927_v56  ;;  %v987_v33 = vadd.f32 %v3021_v15, %v926_v49 }
 0x220   :  { %v1038_v32 = vmax.f32 %v988_v3, 0.0  ;;  %v1037_v18 = vmax.f32 %v987_v33, 0.0 }
 0x222   :  { %1323 = vmatprep.mubr.f32.mxu1 %v1038_v32 }
 0x223   :  { %1324 = vmatmul.mubr.f32.gmra.mrb[34].mxu1 %v1037_v18 }
 0x27a   :  { %v1181_v26 = vpop.f32.mrb[50].mxu0 }
 0x27b   :  { %v3345_v6 = vadd.f32 %v1181_v26, %v3339_v14  ;;  %v1183_v0 = vpop.f32.mrb[51].mxu0 }
 0x27c   :  { %v3348_v15 = vadd.f32 %v1183_v0, %v3342_v60 }
 0x27d   :  { %v1407_v53 = vmul.f32 %v3345_v6, %v3345_v6 }
 0x27e   :  { %v1332_v9 = vadd.f32 %v3348_v15, %v3345_v6  ;;  %v1408_v2 = vmul.f32 %v3348_v15, %v3348_v15 }
 0x280   :  { %1333 = vadd.xlane.f32.xlu0 %v1332_v9  ;;  %v1457_v4 = vadd.f32 %v1408_v2, %v1407_v53 }
 0x282   :  { %1458 = vadd.xlane.f32.xlu1 %v1457_v4  ;;  %v1187_v5 = vpop.f32.mrb[52].mxu0 }
 0x283   :  { %v3357_v37 = vadd.f32 %v1187_v5, %v3339_v14  ;;  %v1189_v35 = vpop.f32.mrb[53].mxu0 }
 0x284   :  { %v3360_v13 = vadd.f32 %v1189_v35, %v3342_v60 }
 0x285   :  { %v1409_v22 = vmul.f32 %v3357_v37, %v3357_v37 }
 0x286   :  { %v1335_v48 = vadd.f32 %v3360_v13, %v3357_v37  ;;  %v1410_v50 = vmul.f32 %v3360_v13, %v3360_v13 }
 0x288   :  { %1336 = vadd.xlane.f32.xlu1 %v1335_v48  ;;  %v1460_v62 = vadd.f32 %v1410_v50, %v1409_v22 }
 0x28a   :  { %1461 = vadd.xlane.f32.xlu0 %v1460_v62  ;;  %v1193_v40 = vpop.f32.mrb[54].mxu0 }
 0x28b   :  { %v3369_v44 = vadd.f32 %v1193_v40, %v3339_v14  ;;  %v1195_v57 = vpop.f32.mrb[55].mxu0 }
 0x28c   :  { %v3372_v61 = vadd.f32 %v1195_v57, %v3342_v60 }
 0x28d   :  { %v1411_v31 = vmul.f32 %v3369_v44, %v3369_v44 }
 0x28e   :  { %v1338_v8 = vadd.f32 %v3372_v61, %v3369_v44  ;;  %v1412_v24 = vmul.f32 %v3372_v61, %v3372_v61 }
 0x290   :  { %1339 = vadd.xlane.f32.xlu0 %v1338_v8  ;;  %v1463_v36 = vadd.f32 %v1412_v24, %v1411_v31 }
 0x292   :  { %1464 = vadd.xlane.f32.xlu1 %v1463_v36 }
 0x296   :  { %v1223_v59 = vpop.f32.mrb[0].mxu1 }
 0x297   :  { %v1225_v19 = vpop.f32.mrb[1].mxu1  ;;  %v3469_v24 = vadd.f32 %v1223_v59, %v3339_v14 }
 0x298   :  { %v3472_v36 = vadd.f32 %v1225_v19, %v3342_v60 }
 0x29a   :  { %v3380_v16 = vpop.f32.mrb[2].mxu1 }
 0x29b   :  { %v3382_v17 = vpop.f32.mrb[3].mxu1 }
 0x29f   :  { %v3384_v54 = vpop.f32.mrb[4].mxu1 }
 0x2a0   :  { %v3386_v27 = vpop.f32.mrb[5].mxu1 }
 0x2a3   :  { %v3388_v41 = vpop.f32.mrb[6].mxu1 }
 0x2a4   :  { %v3390_v21 = vpop.f32.mrb[7].mxu1 }
 0x2a8   :  { %v3392_v10 = vpop.f32.mrb[8].mxu1 }
 0x2a9   :  { %v3394_v51 = vpop.f32.mrb[9].mxu1 }
 0x2ac   :  { %v3396_v34 = vpop.f32.mrb[10].mxu1 }
 0x2ad   :  { %v3398_v25 = vpop.f32.mrb[11].mxu1 }
 0x2b2   :  { %v3400_v45 = vpop.f32.mrb[12].mxu1 }
 0x2b3   :  { %v3402_v55 = vpop.f32.mrb[13].mxu1 }
 0x2b6   :  { %v3404_v47 = vpop.f32.mrb[14].mxu1 }
 0x2b7   :  { %v3406_v11 = vpop.f32.mrb[15].mxu1 }
 0x2bb   :  { %v3408_v20 = vpop.f32.mrb[16].mxu1 }
 0x2bc   :  { %v3410_v39 = vpop.f32.mrb[17].mxu1 }
 0x2bf   :  { %v3412_v42 = vpop.f32.mrb[18].mxu1 }
 0x2c0   :  { %v3414_v38 = vpop.f32.mrb[19].mxu1 }
 0x2c3   :  { %v3416_v30 = vpop.f32.mrb[20].mxu1 }
 0x2c4   :  { %v3418_v43 = vpop.f32.mrb[21].mxu1 }
 0x2c7   :  { %v1199_v63 = vpop.f32.mrb[56].mxu0 }
 0x2c8   :  { %v3421_v29 = vadd.f32 %v1199_v63, %v3339_v14  ;;  %v1201_v7 = vpop.f32.mrb[57].mxu0 }
 0x2c9   :  { %v3424_v1 = vadd.f32 %v1201_v7, %v3342_v60 }
 0x2ca   :  { %v1413_v52 = vmul.f32 %v3421_v29, %v3421_v29  ;;  %v3428_v46 = vpop.f32.mrb[22].mxu1 }
 0x2cb   :  { %v1341_v28 = vadd.f32 %v3424_v1, %v3421_v29  ;;  %v1414_v56 = vmul.f32 %v3424_v1, %v3424_v1  ;;  %v3434_v49 = vpop.f32.mrb[23].mxu1 }
 0x2cc   :  { %v1205_v3 = vpop.f32.mrb[58].mxu0 }
 0x2cd   :  { %1342 = vadd.xlane.f32.xlu1 %v1341_v28  ;;  %v1466_v33 = vadd.f32 %v1414_v56, %v1413_v52  ;;  %v3437_v32 = vadd.f32 %v1205_v3, %v3339_v14  ;;  %v1207_v18 = vpop.f32.mrb[59].mxu0 }
 0x2ce   :  { %v3440_v12 = vadd.f32 %v1207_v18, %v3342_v60  ;;  %v1421_v18 = vmul.f32 %v3469_v24, %v3469_v24 }
 0x2cf   :  { %1467 = vadd.xlane.f32.xlu0 %v1466_v33  ;;  %v1415_v26 = vmul.f32 %v3437_v32, %v3437_v32 }
 0x2d0   :  { %v1344_v0 = vadd.f32 %v3440_v12, %v3437_v32  ;;  %v1416_v53 = vmul.f32 %v3440_v12, %v3440_v12 }
 0x2d2   :  { %v3448_v9 = vpop.f32.mrb[24].mxu1  ;;  %v1469_v2 = vadd.f32 %v1416_v53, %v1415_v26  ;;  %v1422_v26 = vmul.f32 %v3472_v36, %v3472_v36  ;;  %v3500_v53 = vadd.f32 %v3382_v17, %v3342_v60 }
 0x2d3   :  { %v3450_v4 = vpop.f32.mrb[25].mxu1  ;;  %1345 = vadd.xlane.f32.xlu0 %v1344_v0  ;;  %v1211_v5 = vpop.f32.mrb[60].mxu0  ;;  %v3496_v0 = vadd.f32 %v3380_v16, %v3339_v14  ;;  %v1353_v16 = vadd.f32 %v3472_v36, %v3469_v24 }
 0x2d4   :  { %1470 = vadd.xlane.f32.xlu1 %v1469_v2  ;;  %v3453_v35 = vadd.f32 %v1211_v5, %v3339_v14  ;;  %v1213_v22 = vpop.f32.mrb[61].mxu0  ;;  %v3504_v5 = vadd.f32 %v3384_v54, %v3339_v14 }
 0x2d5   :  { %v3456_v48 = vadd.f32 %v1213_v22, %v3342_v60  ;;  %v3508_v22 = vadd.f32 %v3386_v27, %v3342_v60  ;;  %v1423_v17 = vmul.f32 %v3496_v0, %v3496_v0  ;;  %v1356_v27 = vadd.f32 %v3500_v53, %v3496_v0 }
 0x2d6   :  { %v3458_v50 = vpop.f32.mrb[26].mxu1  ;;  %v1417_v62 = vmul.f32 %v3453_v35, %v3453_v35 }
 0x2d7   :  { %v3462_v40 = vpop.f32.mrb[27].mxu1  ;;  %v1347_v57 = vadd.f32 %v3456_v48, %v3453_v35  ;;  %v1418_v31 = vmul.f32 %v3456_v48, %v3456_v48 }
 0x2d9   :  { %1348 = vadd.xlane.f32.xlu1 %v1347_v57  ;;  %v1472_v8 = vadd.f32 %v1418_v31, %v1417_v62  ;;  %v1478_v62 = vadd.f32 %v1422_v26, %v1421_v18  ;;  %v1424_v31 = vmul.f32 %v3500_v53, %v3500_v53  ;;  %v3540_v18 = vadd.f32 %v3394_v51, %v3342_v60 }
 0x2db   :  { %1473 = vadd.xlane.f32.xlu0 %v1472_v8  ;;  %v1217_v63 = vpop.f32.mrb[62].mxu0  ;;  %v1425_v8 = vmul.f32 %v3504_v5, %v3504_v5 }
 0x2dc   :  { %v3475_v7 = vadd.f32 %v1217_v63, %v3339_v14  ;;  %v1219_v52 = vpop.f32.mrb[63].mxu0  ;;  %v1426_v63 = vmul.f32 %v3508_v22, %v3508_v22 }
 0x2dd   :  { %v3478_v28 = vadd.f32 %v1219_v52, %v3342_v60  ;;  %v3528_v52 = vadd.f32 %v3388_v41, %v3339_v14  ;;  %v1359_v41 = vadd.f32 %v3508_v22, %v3504_v5 }
 0x2de   :  { %v3480_v56 = vpop.f32.mrb[28].mxu1  ;;  %v1419_v59 = vmul.f32 %v3475_v7, %v3475_v7  ;;  %v1484_v26 = vadd.f32 %v1426_v63, %v1425_v8  ;;  %v3568_v63 = vadd.f32 %v3400_v45, %v3339_v14 }
 0x2df   :  { %v3482_v3 = vpop.f32.mrb[29].mxu1  ;;  %v1350_v19 = vadd.f32 %v3478_v28, %v3475_v7  ;;  %v1420_v33 = vmul.f32 %v3478_v28, %v3478_v28 }
 0x2e1   :  { %1351 = vadd.xlane.f32.xlu0 %v1350_v19  ;;  %v1475_v2 = vadd.f32 %v1420_v33, %v1419_v59  ;;  %v3532_v59 = vadd.f32 %v3390_v21, %v3342_v60  ;;  %v1481_v19 = vadd.f32 %v1424_v31, %v1423_v17  ;;  %v3536_v33 = vadd.f32 %v3392_v10, %v3339_v14 }
 0x2e2   :  { %v1427_v21 = vmul.f32 %v3528_v52, %v3528_v52  ;;  %v1430_v17 = vmul.f32 %v3540_v18, %v3540_v18  ;;  %v3560_v31 = vadd.f32 %v3396_v34, %v3339_v14 }
 0x2e3   :  { %1476 = vadd.xlane.f32.xlu1 %v1475_v2  ;;  %v1362_v51 = vadd.f32 %v3532_v59, %v3528_v52  ;;  %v1365_v34 = vadd.f32 %v3540_v18, %v3536_v33 }
 0x2e5   :  { %1479 = vadd.xlane.f32.xlu0 %v1478_v62  ;;  %v1428_v62 = vmul.f32 %v3532_v59, %v3532_v59 }
 0x2e6   :  { %v3510_v57 = vpop.f32.mrb[30].mxu1 }
 0x2e7   :  { %v3518_v54 = vpop.f32.mrb[31].mxu1  ;;  %1354 = vadd.xlane.f32.xlu1 %v1353_v16  ;;  %v1429_v16 = vmul.f32 %v3536_v33, %v3536_v33  ;;  %v1487_v8 = vadd.f32 %v1428_v62, %v1427_v21  ;;  %v1433_v62 = vmul.f32 %v3568_v63, %v3568_v63 }
 0x2e9   :  { %1357 = vadd.xlane.f32.xlu0 %v1356_v27  ;;  %v3564_v27 = vadd.f32 %v3398_v25, %v3342_v60  ;;  %v1431_v25 = vmul.f32 %v3560_v31, %v3560_v31 }
 0x2eb   :  { %1482 = vadd.xlane.f32.xlu1 %v1481_v19  ;;  %4453 = vst [vmem:[#allocation8_spill] sm:$0xff] %v3564_v27  ;;  %v3572_v19 = vadd.f32 %v3402_v55, %v3342_v60  ;;  %v1432_v21 = vmul.f32 %v3564_v27, %v3564_v27  ;;  %v1368_v55 = vadd.f32 %v3564_v27, %v3560_v31 }
 0x2ed   :  { %1485 = vadd.xlane.f32.xlu0 %v1484_v26  ;;  %v1490_v26 = vadd.f32 %v1430_v17, %v1429_v16  ;;  %v3592_v16 = vadd.f32 %v3404_v47, %v3339_v14  ;;  %v3596_v17 = vadd.f32 %v3406_v11, %v3342_v60  ;;  %v1371_v47 = vadd.f32 %v3572_v19, %v3568_v63 }
 0x2ee   :  { %v3542_v2 = vpop.f32.mrb[32].mxu1 }
 0x2ef   :  { %v3550_v10 = vpop.f32.mrb[33].mxu1  ;;  %1360 = vadd.xlane.f32.xlu1 %v1359_v41  ;;  %v1435_v11 = vmul.f32 %v3592_v16, %v3592_v16 }
 0x2f1   :  { %1363 = vadd.xlane.f32.xlu0 %v1362_v51  ;;  %v1434_v51 = vmul.f32 %v3572_v19, %v3572_v19 }
 0x2f3   :  { %1488 = vadd.xlane.f32.xlu1 %v1487_v8  ;;  %v1493_v8 = vadd.f32 %v1432_v21, %v1431_v25  ;;  %v1496_v27 = vadd.f32 %v1434_v51, %v1433_v62  ;;  %v1436_v25 = vmul.f32 %v3596_v17, %v3596_v17  ;;  %v3628_v51 = vadd.f32 %v3416_v30, %v3339_v14 }
 0x2f5   :  { %1491 = vadd.xlane.f32.xlu0 %v1490_v26  ;;  %v3600_v26 = vadd.f32 %v3408_v20, %v3339_v14  ;;  %v1374_v20 = vadd.f32 %v3596_v17, %v3592_v16  ;;  %v1499_v62 = vadd.f32 %v1436_v25, %v1435_v11  ;;  %4456 = vst [vmem:[#allocation11_spill] sm:$0xff] %v3628_v51 }
 0x2f6   :  { %v3574_v41 = vpop.f32.mrb[34].mxu1 }
 0x2f7   :  { %v3582_v45 = vpop.f32.mrb[35].mxu1  ;;  %1366 = vadd.xlane.f32.xlu1 %v1365_v34  ;;  %v3604_v34 = vadd.f32 %v3410_v39, %v3342_v60  ;;  %v1437_v39 = vmul.f32 %v3600_v26, %v3600_v26 }
 0x2f9   :  { %1369 = vadd.xlane.f32.xlu0 %v1368_v55  ;;  %v1438_v21 = vmul.f32 %v3604_v34, %v3604_v34  ;;  %v3624_v55 = vadd.f32 %v3414_v38, %v3342_v60 }
 0x2fb   :  { %1494 = vadd.xlane.f32.xlu1 %v1493_v8  ;;  %4455 = vst [vmem:[#allocation10_spill] sm:$0xff] %v3624_v55  ;;  %v3632_v8 = vadd.f32 %v3418_v43, %v3342_v60  ;;  %v1440_v11 = vmul.f32 %v3624_v55, %v3624_v55  ;;  %v1441_v43 = vmul.f32 %v3628_v51, %v3628_v51 }
 0x2fd   :  { %1497 = vadd.xlane.f32.xlu0 %v1496_v27  ;;  %v3620_v27 = vadd.f32 %v3412_v42, %v3339_v14  ;;  %4457 = vst [vmem:[#allocation12_spill] sm:$0xff] %v3632_v8  ;;  %v1377_v42 = vadd.f32 %v3604_v34, %v3600_v26  ;;  %v1442_v25 = vmul.f32 %v3632_v8, %v3632_v8 }
 0x2ff   :  { %1372 = vadd.xlane.f32.xlu1 %v1371_v47  ;;  %4454 = vst [vmem:[#allocation9_spill] sm:$0xff] %v3620_v27  ;;  %v1502_v47 = vadd.f32 %v1438_v21, %v1437_v39  ;;  %v1439_v38 = vmul.f32 %v3620_v27, %v3620_v27  ;;  %v1380_v30 = vadd.f32 %v3624_v55, %v3620_v27 }
 0x300   :  { %v3652_v39 = vadd.f32 %v3434_v49, %v3342_v60  ;;  %v1383_v49 = vadd.f32 %v3632_v8, %v3628_v51 }
 0x301   :  { %1375 = vadd.xlane.f32.xlu0 %v1374_v20  ;;  %v3648_v20 = vadd.f32 %v3428_v46, %v3339_v14  ;;  %v1505_v21 = vadd.f32 %v1440_v11, %v1439_v38 }
 0x302   :  { %4459 = vst [vmem:[#allocation14_spill] sm:$0xff] %v3652_v39 }
 0x303   :  { %1500 = vadd.xlane.f32.xlu1 %v1499_v62  ;;  %4458 = vst [vmem:[#allocation13_spill] sm:$0xff] %v3648_v20  ;;  %v3656_v62 = vadd.f32 %v3448_v9, %v3339_v14  ;;  %v1443_v38 = vmul.f32 %v3648_v20, %v3648_v20  ;;  %v1444_v9 = vmul.f32 %v3652_v39, %v3652_v39 }
 0x305   :  { %1503 = vadd.xlane.f32.xlu0 %v1502_v47  ;;  %v3660_v47 = vadd.f32 %v3450_v4, %v3342_v60  ;;  %v1386_v4 = vadd.f32 %v3652_v39, %v3648_v20  ;;  %v3692_v20 = vadd.f32 %v3482_v3, %v3342_v60 }
 0x307   :  { %1378 = vadd.xlane.f32.xlu1 %v1377_v42  ;;  %v1508_v42 = vadd.f32 %v1442_v25, %v1441_v43  ;;  %v1446_v25 = vmul.f32 %v3660_v47, %v3660_v47  ;;  %v1389_v27 = vadd.f32 %v3660_v47, %v3656_v62 }
 0x309   :  { %1381 = vadd.xlane.f32.xlu0 %v1380_v30 }
 0x30b   :  { %1506 = vadd.xlane.f32.xlu1 %v1505_v21  ;;  %v3680_v21 = vadd.f32 %v3458_v50, %v3339_v14 }
 0x30d   :  { %v1334_v55 = vpop.xlane.xlu0 %1333  ;;  %1509 = vadd.xlane.f32.xlu0 %v1508_v42  ;;  %v3684_v42 = vadd.f32 %v3462_v40, %v3342_v60 }
 0x30e   :  { %v3662_v46 = vmul.f32 0.00390625, %v1334_v55  ;;  %v1445_v55 = vmul.f32 %v3656_v62, %v3656_v62 }
 0x30f   :  { %v1459_v11 = vpop.xlane.xlu1 %1458  ;;  %1384 = vadd.xlane.f32.xlu1 %v1383_v49  ;;  %4460 = vst [vmem:[#allocation15_spill] sm:$0xff] %v3684_v42  ;;  %v1511_v49 = vadd.f32 %v1444_v9, %v1443_v38  ;;  %v1447_v38 = vmul.f32 %v3680_v21, %v3680_v21  ;;  %v1392_v3 = vadd.f32 %v3684_v42, %v3680_v21 }
 0x310   :  { %v1557_v30 = vmul.f32 0.00390625, %v1459_v11  ;;  %v1582_v43 = vmul.f32 %v3662_v46, %v3662_v46  ;;  %v3688_v11 = vadd.f32 %v3480_v56, %v3339_v14  ;;  %v1514_v51 = vadd.f32 %v1446_v25, %v1445_v55  ;;  %v1330_v25 = vld [vmem:[%s4391_s7] sm:$0x3] }
 0x311   :  { %1387 = vadd.xlane.f32.xlu0 %v1386_v4  ;;  %v1448_v56 = vmul.f32 %v3684_v42, %v3684_v42  ;;  %v3716_v55 = vadd.f32 %v3518_v54, %v3342_v60 }
 0x312   :  { %v1607_v39 = vsub.f32 %v1557_v30, %v1582_v43  ;;  %v3712_v43 = vadd.f32 %v3510_v57, %v3339_v14  ;;  %v1395_v54 = vadd.f32 %v3692_v20, %v3688_v11 }
 0x313   :  { %1512 = vadd.xlane.f32.xlu1 %v1511_v49  ;;  %4462 = vst [vmem:[#allocation6_spill] sm:$0xff] %v3716_v55 }
 0x314   :  { %v1632_v8 = vmax.f32 %v1607_v39, 0.0  ;;  %4461 = vst [vmem:[#allocation16_spill] sm:$0xff] %v3712_v43 }
 0x315   :  { %v1337_v50 = vpop.xlane.xlu1 %1336  ;;  %1515 = vadd.xlane.f32.xlu0 %v1514_v51  ;;  %v1449_v51 = vmul.f32 %v3688_v11, %v3688_v11 }
 0x316   :  { %v1707_v40 = vadd.f32 1e-05, %v1632_v8  ;;  %v3696_v30 = vmul.f32 0.00390625, %v1337_v50  ;;  %v1450_v8 = vmul.f32 %v3692_v20, %v3692_v20 }
 0x317   :  { %v1462_v9 = vpop.xlane.xlu0 %1461  ;;  %1390 = vadd.xlane.f32.xlu1 %v1389_v27  ;;  %v1517_v27 = vadd.f32 %v1448_v56, %v1447_v38  ;;  %v1451_v38 = vmul.f32 %v3712_v43, %v3712_v43  ;;  %v1452_v56 = vmul.f32 %v3716_v55, %v3716_v55 }
 0x318   :  { %2363 = vrsqrt.f32 %v1707_v40  ;;  %v1583_v39 = vmul.f32 %v3696_v30, %v3696_v30  ;;  %v1558_v4 = vmul.f32 0.00390625, %v1462_v9  ;;  %v1520_v50 = vadd.f32 %v1450_v8, %v1449_v51 }
 0x319   :  { %1393 = vadd.xlane.f32.xlu0 %v1392_v3  ;;  %v3722_v9 = vrot.slane %v1330_v25, %v4451_v23  ;;  %v3734_v3 = vadd.f32 %v3542_v2, %v3339_v14  ;;  %v1398_v8 = vadd.f32 %v3716_v55, %v3712_v43 }
 0x31a   :  { %v1608_v49 = vsub.f32 %v1558_v4, %v1583_v39  ;;  %v3738_v39 = vadd.f32 %v3550_v10, %v3342_v60  ;;  %v3744_v4 = vadd.f32 %v3574_v41, %v3339_v14  ;;  %v1331_v10 = vld [vmem:[%s4392_s8] sm:$0x3]  ;;  %v1658_v14 = vsub.f32 %v3348_v15, %v3662_v46 }
 0x31b   :  { %1518 = vadd.xlane.f32.xlu1 %v1517_v27  ;;  %v3748_v27 = vadd.f32 %v3582_v45, %v3342_v60  ;;  %v3760_v41 = vrot.slane %v1330_v25, %v4452_v58  ;;  %v3763_v55 = vrot.slane %v1331_v10, %v4451_v23  ;;  %v3766_v43 = vrot.slane %v1331_v10, %v4452_v58 }
 0x31c   :  { %v1633_v40 = vmax.f32 %v1608_v49, 0.0  ;;  %4463 = vst [vmem:[#allocation7_spill] sm:$0xff] %v3738_v39  ;;  %v1454_v15 = vmul.f32 %v3738_v39, %v3738_v39  ;;  %v1401_v10 = vadd.f32 %v3738_v39, %v3734_v3 }
 0x31d   :  { %v1340_v42 = vpop.xlane.xlu0 %1339  ;;  %1521 = vadd.xlane.f32.xlu0 %v1520_v50  ;;  %v1657_v50 = vsub.f32 %v3345_v6, %v3662_v46  ;;  %v1453_v6 = vmul.f32 %v3734_v3, %v3734_v3  ;;  %v1404_v25 = vadd.f32 %v3748_v27, %v3744_v4 }
 0x31e   :  { %v3724_v57 = vmul.f32 0.00390625, %v1340_v42  ;;  %v1708_v51 = vadd.f32 1e-05, %v1633_v40  ;;  %v1523_v40 = vadd.f32 %v1452_v56, %v1451_v38  ;;  %v1979_v38 = vld [vmem:[%s4393_s9] sm:$0x3] }
 0x31f   :  { %v1465_v42 = vpop.xlane.xlu1 %1464  ;;  %1396 = vadd.xlane.f32.xlu1 %v1395_v54 }
 0x320   :  { %v1559_v2 = vmul.f32 0.00390625, %v1465_v42  ;;  %v1584_v49 = vmul.f32 %v3724_v57, %v3724_v57  ;;  %2365 = vrsqrt.f32 %v1708_v51 }
 0x321   :  { %1399 = vadd.xlane.f32.xlu0 %v1398_v8  ;;  %v1455_v8 = vmul.f32 %v3744_v4, %v3744_v4 }
 0x322   :  { %v2364_v60 = vpop.eup %2363  ;;  %v1609_v45 = vsub.f32 %v1559_v2, %v1584_v49  ;;  %v1456_v2 = vmul.f32 %v3748_v27, %v3748_v27 }
 0x323   :  { %v1757_v54 = vmul.f32 %v2364_v60, %v1657_v50  ;;  %v1758_v42 = vmul.f32 %v2364_v60, %v1658_v14  ;;  %1524 = vadd.xlane.f32.xlu1 %v1523_v40  ;;  %v3788_v60 = vrot.slane %v1979_v38, %v4451_v23  ;;  %v1526_v40 = vadd.f32 %v1454_v15, %v1453_v6 }
 0x324   :  { %v1634_v46 = vmax.f32 %v1609_v45, 0.0  ;;  %v3791_v45 = vrot.slane %v1979_v38, %v4452_v58 }
 0x325   :  { %v1818_v56 = vmul.f32 %v3722_v9, %v1757_v54  ;;  %v1819_v51 = vmul.f32 %v3760_v41, %v1758_v42  ;;  %1405 = vadd.xlane.f32.xlu0 %v1404_v25  ;;  %v1660_v25 = vsub.f32 %v3360_v13, %v3696_v30 }
 0x326   :  { %v1709_v49 = vadd.f32 1e-05, %v1634_v46  ;;  %v1659_v46 = vsub.f32 %v3357_v37, %v3696_v30  ;;  %v1661_v30 = vsub.f32 %v3369_v44, %v3724_v57 }
 0x327   :  { %v1879_v50 = vadd.f32 %v3763_v55, %v1818_v56  ;;  %v1880_v14 = vadd.f32 %v3766_v43, %v1819_v51  ;;  %1402 = vadd.xlane.f32.xlu1 %v1401_v10  ;;  %v1529_v56 = vadd.f32 %v1456_v2, %v1455_v8  ;;  %v1662_v8 = vsub.f32 %v3372_v61, %v3724_v57 }
 0x328   :  { %2367 = vrsqrt.f32 %v1709_v49 }
 0x329   :  { %v1929_v54 = vmax.f32 %v1879_v50, 0.0  ;;  %v1930_v42 = vmax.f32 %v1880_v14, 0.0  ;;  %1527 = vadd.xlane.f32.xlu0 %v1526_v40 }
 0x32a   :  { %v2366_v51 = vpop.eup %2365 }
 0x32b   :  { %v1991_v23 = vmul.f32 %v3788_v60, %v1929_v54  ;;  %v1992_v39 = vmul.f32 %v3791_v45, %v1930_v42  ;;  %1530 = vadd.xlane.f32.xlu1 %v1529_v56  ;;  %v1759_v58 = vmul.f32 %v2366_v51, %v1659_v46  ;;  %v1760_v38 = vmul.f32 %v2366_v51, %v1660_v25 }
 0x32d   :  { %v2041_v49 = vadd.f32 %v1992_v39, %v1991_v23  ;;  %v1820_v6 = vmul.f32 %v3722_v9, %v1759_v58  ;;  %v1821_v15 = vmul.f32 %v3760_v41, %v1760_v38 }
 0x32f   :  { %2042 = vadd.xlane.f32.xlu0 %v2041_v49  ;;  %v1881_v37 = vadd.f32 %v3763_v55, %v1820_v6  ;;  %v1882_v13 = vadd.f32 %v3766_v43, %v1821_v15 }
 0x331   :  { %v1931_v10 = vmax.f32 %v1881_v37, 0.0  ;;  %v1932_v50 = vmax.f32 %v1882_v13, 0.0 }
 0x332   :  { %v2368_v2 = vpop.eup %2367 }
 0x333   :  { %v1761_v14 = vmul.f32 %v2368_v2, %v1661_v30  ;;  %v1762_v39 = vmul.f32 %v2368_v2, %v1662_v8  ;;  %v1993_v40 = vmul.f32 %v3788_v60, %v1931_v10  ;;  %v1994_v54 = vmul.f32 %v3791_v45, %v1932_v50 }
 0x335   :  { %v1822_v42 = vmul.f32 %v3722_v9, %v1761_v14  ;;  %v1823_v46 = vmul.f32 %v3760_v41, %v1762_v39  ;;  %v2044_v25 = vadd.f32 %v1994_v54, %v1993_v40 }
 0x337   :  { %v1883_v56 = vadd.f32 %v3763_v55, %v1822_v42  ;;  %v1884_v44 = vadd.f32 %v3766_v43, %v1823_v46  ;;  %2045 = vadd.xlane.f32.xlu1 %v2044_v25 }
 0x339   :  { %v1933_v61 = vmax.f32 %v1883_v56, 0.0  ;;  %v1934_v57 = vmax.f32 %v1884_v44, 0.0 }
 0x33b   :  { %v1995_v51 = vmul.f32 %v3788_v60, %v1933_v61  ;;  %v1996_v23 = vmul.f32 %v3791_v45, %v1934_v57 }
 0x33d   :  { %v2047_v58 = vadd.f32 %v1996_v23, %v1995_v51 }
 0x33f   :  { %2048 = vadd.xlane.f32.xlu0 %v2047_v58 }
 0x35a   :  { %v1343_v38 = vpop.xlane.xlu1 %1342 }
 0x35b   :  { %v1535_v49 = vmul.f32 0.00390625, %v1343_v38 }
 0x35c   :  { %v1468_v6 = vpop.xlane.xlu0 %1467 }
 0x35d   :  { %v1585_v15 = vmul.f32 %v1535_v49, %v1535_v49  ;;  %v1560_v37 = vmul.f32 0.00390625, %v1468_v6  ;;  %v1663_v51 = vsub.f32 %v3421_v29, %v1535_v49  ;;  %v1664_v23 = vsub.f32 %v3424_v1, %v1535_v49 }
 0x35f   :  { %v1610_v13 = vsub.f32 %v1560_v37, %v1585_v15 }
 0x360   :  { %v1346_v30 = vpop.xlane.xlu0 %1345 }
 0x361   :  { %v1635_v8 = vmax.f32 %v1610_v13, 0.0  ;;  %v1536_v2 = vmul.f32 0.00390625, %v1346_v30  ;;  %v1471_v10 = vpop.xlane.xlu1 %1470 }
 0x362   :  { %v1561_v50 = vmul.f32 0.00390625, %v1471_v10 }
 0x363   :  { %v1710_v14 = vadd.f32 1e-05, %v1635_v8  ;;  %v1586_v39 = vmul.f32 %v1536_v2, %v1536_v2  ;;  %v1665_v49 = vsub.f32 %v3437_v32, %v1536_v2 }
 0x365   :  { %2369 = vrsqrt.f32 %v1710_v14  ;;  %v1611_v40 = vsub.f32 %v1561_v50, %v1586_v39 }
 0x366   :  { %v1349_v54 = vpop.xlane.xlu1 %1348 }
 0x367   :  { %v1636_v42 = vmax.f32 %v1611_v40, 0.0  ;;  %v3815_v46 = vmul.f32 0.00390625, %v1349_v54  ;;  %v1666_v40 = vsub.f32 %v3440_v12, %v1536_v2 }
 0x368   :  { %v1474_v25 = vpop.xlane.xlu0 %1473 }
 0x369   :  { %v1711_v56 = vadd.f32 1e-05, %v1636_v42  ;;  %v1587_v44 = vmul.f32 %v3815_v46, %v3815_v46  ;;  %v1562_v61 = vmul.f32 0.00390625, %v1474_v25 }
 0x36b   :  { %2371 = vrsqrt.f32 %v1711_v56  ;;  %v1612_v57 = vsub.f32 %v1562_v61, %v1587_v44 }
 0x36d   :  { %v1637_v58 = vmax.f32 %v1612_v57, 0.0 }
 0x36e   :  { %v1352_v38 = vpop.xlane.xlu0 %1351 }
 0x36f   :  { %v2370_v6 = vpop.eup %2369  ;;  %v3821_v15 = vmul.f32 0.00390625, %v1352_v38  ;;  %v1712_v37 = vadd.f32 1e-05, %v1637_v58 }
 0x370   :  { %v1477_v13 = vpop.xlane.xlu1 %1476  ;;  %v1763_v30 = vmul.f32 %v2370_v6, %v1663_v51  ;;  %v1764_v8 = vmul.f32 %v2370_v6, %v1664_v23  ;;  %v1667_v6 = vsub.f32 %v3453_v35, %v3815_v46  ;;  %v1668_v35 = vsub.f32 %v3456_v48, %v3815_v46 }
 0x371   :  { %v1563_v10 = vmul.f32 0.00390625, %v1477_v13  ;;  %v1588_v50 = vmul.f32 %v3821_v15, %v3821_v15  ;;  %2373 = vrsqrt.f32 %v1712_v37 }
 0x372   :  { %v1480_v14 = vpop.xlane.xlu0 %1479  ;;  %v1824_v39 = vmul.f32 %v3722_v9, %v1763_v30  ;;  %v1825_v29 = vmul.f32 %v3760_v41, %v1764_v8 }
 0x373   :  { %v1613_v1 = vsub.f32 %v1563_v10, %v1588_v50  ;;  %v1564_v37 = vmul.f32 0.00390625, %v1480_v14  ;;  %v1669_v14 = vsub.f32 %v3475_v7, %v3821_v15 }
 0x374   :  { %v1355_v54 = vpop.xlane.xlu1 %1354  ;;  %v1885_v42 = vadd.f32 %v3763_v55, %v1824_v39  ;;  %v1886_v25 = vadd.f32 %v3766_v43, %v1825_v29 }
 0x375   :  { %v2372_v56 = vpop.eup %2371  ;;  %v1638_v44 = vmax.f32 %v1613_v1, 0.0  ;;  %v3831_v61 = vmul.f32 0.00390625, %v1355_v54  ;;  %v1670_v54 = vsub.f32 %v3478_v28, %v3821_v15 }
 0x376   :  { %v1358_v57 = vpop.xlane.xlu0 %1357  ;;  %v1935_v51 = vmax.f32 %v1885_v42, 0.0  ;;  %v1936_v23 = vmax.f32 %v1886_v25, 0.0  ;;  %v1765_v58 = vmul.f32 %v2372_v56, %v1665_v49  ;;  %v1766_v38 = vmul.f32 %v2372_v56, %v1666_v40 }
 0x377   :  { %v1713_v32 = vadd.f32 1e-05, %v1638_v44  ;;  %v1589_v12 = vmul.f32 %v3831_v61, %v3831_v61  ;;  %v3837_v2 = vmul.f32 0.00390625, %v1358_v57  ;;  %v1671_v48 = vsub.f32 %v3469_v24, %v3831_v61 }
 0x378   :  { %v1483_v13 = vpop.xlane.xlu1 %1482  ;;  %v1997_v30 = vmul.f32 %v3788_v60, %v1935_v51  ;;  %v1998_v8 = vmul.f32 %v3791_v45, %v1936_v23  ;;  %v1826_v10 = vmul.f32 %v3722_v9, %v1765_v58  ;;  %v1827_v29 = vmul.f32 %v3760_v41, %v1766_v38 }
 0x379   :  { %2375 = vrsqrt.f32 %v1713_v32  ;;  %v1614_v50 = vsub.f32 %v1564_v37, %v1589_v12  ;;  %v1565_v39 = vmul.f32 0.00390625, %v1483_v13  ;;  %v1590_v1 = vmul.f32 %v3837_v2, %v3837_v2 }
 0x37a   :  { %v2050_v49 = vadd.f32 %v1998_v8, %v1997_v30  ;;  %v1486_v40 = vpop.xlane.xlu0 %1485  ;;  %v1887_v25 = vadd.f32 %v3763_v55, %v1826_v10  ;;  %v1888_v56 = vadd.f32 %v3766_v43, %v1827_v29  ;;  %v1672_v7 = vsub.f32 %v3472_v36, %v3831_v61 }
 0x37b   :  { %v1639_v42 = vmax.f32 %v1614_v50, 0.0  ;;  %v2374_v44 = vpop.eup %2373  ;;  %v1673_v46 = vsub.f32 %v3496_v0, %v3837_v2  ;;  %v1615_v57 = vsub.f32 %v1565_v39, %v1590_v1  ;;  %v1566_v30 = vmul.f32 0.00390625, %v1486_v40 }
 0x37c   :  { %2051 = vadd.xlane.f32.xlu1 %v2050_v49  ;;  %v1361_v51 = vpop.xlane.xlu1 %1360  ;;  %v1937_v15 = vmax.f32 %v1887_v25, 0.0  ;;  %v1938_v58 = vmax.f32 %v1888_v56, 0.0  ;;  %v1767_v12 = vmul.f32 %v2374_v44, %v1667_v6  ;;  %v1768_v13 = vmul.f32 %v2374_v44, %v1668_v35 }
 0x37d   :  { %v1714_v23 = vadd.f32 1e-05, %v1639_v42  ;;  %v3859_v28 = vmul.f32 0.00390625, %v1361_v51  ;;  %v1640_v32 = vmax.f32 %v1615_v57, 0.0 }
 0x37e   :  { %v1364_v37 = vpop.xlane.xlu0 %1363  ;;  %v1999_v1 = vmul.f32 %v3788_v60, %v1937_v15  ;;  %v2000_v49 = vmul.f32 %v3791_v45, %v1938_v58  ;;  %v1828_v6 = vmul.f32 %v3722_v9, %v1767_v12  ;;  %v1829_v35 = vmul.f32 %v3760_v41, %v1768_v13 }
 0x37f   :  { %2377 = vrsqrt.f32 %v1714_v23  ;;  %v1591_v8 = vmul.f32 %v3859_v28, %v3859_v28  ;;  %v1715_v50 = vadd.f32 1e-05, %v1640_v32  ;;  %v3867_v39 = vmul.f32 0.00390625, %v1364_v37 }
 0x380   :  { %v1489_v29 = vpop.xlane.xlu1 %1488  ;;  %v2053_v58 = vadd.f32 %v2000_v49, %v1999_v1  ;;  %v1889_v32 = vadd.f32 %v3763_v55, %v1828_v6  ;;  %v1890_v13 = vadd.f32 %v3766_v43, %v1829_v35 }
 0x381   :  { %v1616_v42 = vsub.f32 %v1566_v30, %v1591_v8  ;;  %v1567_v25 = vmul.f32 0.00390625, %v1489_v29  ;;  %2379 = vrsqrt.f32 %v1715_v50  ;;  %v1592_v44 = vmul.f32 %v3867_v39, %v3867_v39 }
 0x382   :  { %v1492_v57 = vpop.xlane.xlu0 %1491  ;;  %2054 = vadd.xlane.f32.xlu0 %v2053_v58  ;;  %v1939_v38 = vmax.f32 %v1889_v32, 0.0  ;;  %v1940_v10 = vmax.f32 %v1890_v13, 0.0 }
 0x383   :  { %v2376_v51 = vpop.eup %2375  ;;  %v1641_v23 = vmax.f32 %v1616_v42, 0.0  ;;  %v1617_v37 = vsub.f32 %v1567_v25, %v1592_v44  ;;  %v1568_v29 = vmul.f32 0.00390625, %v1492_v57 }
 0x384   :  { %v1367_v12 = vpop.xlane.xlu1 %1366  ;;  %v1769_v30 = vmul.f32 %v2376_v51, %v1669_v14  ;;  %v1770_v8 = vmul.f32 %v2376_v51, %v1670_v54  ;;  %v2001_v44 = vmul.f32 %v3788_v60, %v1939_v38  ;;  %v2002_v57 = vmul.f32 %v3791_v45, %v1940_v10 }
 0x385   :  { %v1716_v50 = vadd.f32 1e-05, %v1641_v23  ;;  %v3883_v56 = vmul.f32 0.00390625, %v1367_v12  ;;  %v1642_v40 = vmax.f32 %v1617_v37, 0.0 }
 0x386   :  { %v1370_v42 = vpop.xlane.xlu0 %1369  ;;  %v1830_v15 = vmul.f32 %v3722_v9, %v1769_v30  ;;  %v1831_v1 = vmul.f32 %v3760_v41, %v1770_v8  ;;  %v4464_v30 = vld [vmem:[#allocation8_spill] sm:$0xff] }
 0x387   :  { %2381 = vrsqrt.f32 %v1716_v50  ;;  %v1593_v49 = vmul.f32 %v3883_v56, %v3883_v56  ;;  %v1679_v14 = vsub.f32 %v3536_v33, %v3883_v56  ;;  %v1680_v54 = vsub.f32 %v3540_v18, %v3883_v56 }
 0x388   :  { %v1717_v25 = vadd.f32 1e-05, %v1642_v40  ;;  %v3893_v6 = vmul.f32 0.00390625, %v1370_v42  ;;  %v1495_v35 = vpop.xlane.xlu1 %1494  ;;  %v1891_v32 = vadd.f32 %v3763_v55, %v1830_v15  ;;  %v1892_v37 = vadd.f32 %v3766_v43, %v1831_v1 }
 0x389   :  { %v2378_v51 = vpop.eup %2377  ;;  %v1618_v23 = vsub.f32 %v1568_v29, %v1593_v49  ;;  %v1569_v58 = vmul.f32 0.00390625, %v1495_v35  ;;  %v2056_v50 = vadd.f32 %v2002_v57, %v2001_v44 }
 0x38a   :  { %v1771_v12 = vmul.f32 %v2378_v51, %v1671_v48  ;;  %v1772_v40 = vmul.f32 %v2378_v51, %v1672_v7  ;;  %2383 = vrsqrt.f32 %v1717_v25  ;;  %v1681_v38 = vsub.f32 %v3560_v31, %v3893_v6  ;;  %v1498_v10 = vpop.xlane.xlu0 %1497 }
 0x38b   :  { %v1643_v13 = vmax.f32 %v1618_v23, 0.0  ;;  %v1594_v15 = vmul.f32 %v3893_v6, %v3893_v6  ;;  %v2380_v29 = vpop.eup %2379  ;;  %v1570_v36 = vmul.f32 0.00390625, %v1498_v10  ;;  %v1941_v7 = vmax.f32 %v1891_v32, 0.0  ;;  %2057 = vadd.xlane.f32.xlu1 %v2056_v50 }
 0x38c   :  { %v1832_v24 = vmul.f32 %v3722_v9, %v1771_v12  ;;  %v1833_v48 = vmul.f32 %v3760_v41, %v1772_v40  ;;  %v1373_v61 = vpop.xlane.xlu1 %1372  ;;  %v1942_v25 = vmax.f32 %v1892_v37, 0.0  ;;  %v1773_v57 = vmul.f32 %v2380_v29, %v1673_v46 }
 0x38d   :  { %v1718_v42 = vadd.f32 1e-05, %v1643_v13  ;;  %v1619_v1 = vsub.f32 %v1569_v58, %v1594_v15  ;;  %v3913_v49 = vmul.f32 0.00390625, %v1373_v61  ;;  %v2003_v51 = vmul.f32 %v3788_v60, %v1941_v7 }
 0x38e   :  { %v1376_v35 = vpop.xlane.xlu0 %1375  ;;  %v1893_v23 = vadd.f32 %v3763_v55, %v1832_v24  ;;  %v1894_v44 = vadd.f32 %v3766_v43, %v1833_v48  ;;  %v2004_v13 = vmul.f32 %v3791_v45, %v1942_v25  ;;  %v4465_v61 = vsub.f32 %v3504_v5, %v3859_v28 }
 0x38f   :  { %2385 = vrsqrt.f32 %v1718_v42  ;;  %v1644_v12 = vmax.f32 %v1619_v1, 0.0  ;;  %v1595_v58 = vmul.f32 %v3913_v49, %v3913_v49  ;;  %v1683_v32 = vsub.f32 %v3568_v63, %v3913_v49 }
 0x390   :  { %v1684_v37 = vsub.f32 %v3572_v19, %v3913_v49  ;;  %v3927_v40 = vmul.f32 0.00390625, %v1376_v35  ;;  %v1501_v10 = vpop.xlane.xlu1 %1500  ;;  %v1943_v15 = vmax.f32 %v1893_v23, 0.0  ;;  %v1944_v48 = vmax.f32 %v1894_v44, 0.0 }
 0x391   :  { %v2382_v50 = vpop.eup %2381  ;;  %v1719_v0 = vadd.f32 1e-05, %v1644_v12  ;;  %v1620_v46 = vsub.f32 %v1570_v36, %v1595_v58  ;;  %v1571_v24 = vmul.f32 0.00390625, %v1501_v10  ;;  %v4466_v42 = vsub.f32 %v3508_v22, %v3859_v28 }
 0x392   :  { %v1775_v7 = vmul.f32 %v2382_v50, %v4465_v61  ;;  %v1504_v23 = vpop.xlane.xlu0 %1503  ;;  %v1596_v36 = vmul.f32 %v3927_v40, %v3927_v40  ;;  %v2059_v44 = vadd.f32 %v2004_v13, %v2003_v51  ;;  %v4467_v51 = vsub.f32 %v3500_v53, %v3837_v2 }
 0x393   :  { %v1776_v1 = vmul.f32 %v2382_v50, %v4466_v42  ;;  %2387 = vrsqrt.f32 %v1719_v0  ;;  %v1645_v12 = vmax.f32 %v1620_v46, 0.0  ;;  %v1572_v28 = vmul.f32 0.00390625, %v1504_v23 }
 0x394   :  { %v3942_v58 = vpop.eup %2383  ;;  %v1836_v5 = vmul.f32 %v3722_v9, %v1775_v7  ;;  %v1379_v10 = vpop.xlane.xlu1 %1378  ;;  %v2005_v50 = vmul.f32 %v3788_v60, %v1943_v15  ;;  %v1621_v42 = vsub.f32 %v1571_v24, %v1596_v36  ;;  %2060 = vadd.xlane.f32.xlu0 %v2059_v44  ;;  %v2006_v0 = vmul.f32 %v3791_v45, %v1944_v48 }
 0x395   :  { %v1837_v22 = vmul.f32 %v3760_v41, %v1776_v1  ;;  %v1720_v61 = vadd.f32 1e-05, %v1645_v12  ;;  %v3947_v25 = vmul.f32 0.00390625, %v1379_v10  ;;  %v1774_v13 = vmul.f32 %v2380_v29, %v4467_v51 }
 0x396   :  { %v1382_v46 = vpop.xlane.xlu0 %1381  ;;  %v1834_v7 = vmul.f32 %v3722_v9, %v1773_v57  ;;  %v1897_v1 = vadd.f32 %v3763_v55, %v1836_v5  ;;  %v1646_v15 = vmax.f32 %v1621_v42, 0.0  ;;  %v2062_v36 = vadd.f32 %v2006_v0, %v2005_v50  ;;  %v4468_v50 = vld [vmem:[#allocation9_spill] sm:$0xff] }
 0x397   :  { %v1898_v23 = vadd.f32 %v3766_v43, %v1837_v22  ;;  %2389 = vrsqrt.f32 %v1720_v61  ;;  %v1597_v24 = vmul.f32 %v3947_v25, %v3947_v25  ;;  %v1687_v12 = vsub.f32 %v3600_v26, %v3947_v25 }
 0x398   :  { %v1688_v48 = vsub.f32 %v3604_v34, %v3947_v25  ;;  %v3962_v53 = vmul.f32 0.00390625, %v1382_v46  ;;  %v1507_v2 = vpop.xlane.xlu1 %1506  ;;  %v1835_v29 = vmul.f32 %v3760_v41, %v1774_v13  ;;  %v1721_v44 = vadd.f32 1e-05, %v1646_v15  ;;  %2063 = vadd.xlane.f32.xlu1 %v2062_v36  ;;  %v4469_v46 = vld [vmem:[#allocation10_spill] sm:$0xff] }
 0x399   :  { %v2386_v57 = vpop.eup %2385  ;;  %v1622_v5 = vsub.f32 %v1572_v28, %v1597_v24  ;;  %v1573_v22 = vmul.f32 0.00390625, %v1507_v2  ;;  %v1895_v10 = vadd.f32 %v3763_v55, %v1834_v7  ;;  %v1948_v0 = vmax.f32 %v1898_v23, 0.0 }
 0x39a   :  { %v1779_v61 = vmul.f32 %v2386_v57, %v1679_v14  ;;  %v1780_v42 = vmul.f32 %v2386_v57, %v1680_v54  ;;  %v1510_v13 = vpop.xlane.xlu0 %1509  ;;  %2391 = vrsqrt.f32 %v1721_v44  ;;  %v1598_v7 = vmul.f32 %v3962_v53, %v3962_v53 }
 0x39b   :  { %v1647_v28 = vmax.f32 %v1622_v5, 0.0  ;;  %v1896_v33 = vadd.f32 %v3766_v43, %v1835_v29  ;;  %v1945_v56 = vmax.f32 %v1895_v10, 0.0  ;;  %v1574_v54 = vmul.f32 0.00390625, %v1510_v13  ;;  %v4471_v13 = vld [vmem:[#allocation11_spill] sm:$0xff] }
 0x39c   :  { %v1840_v14 = vmul.f32 %v3722_v9, %v1779_v61  ;;  %v1841_v18 = vmul.f32 %v3760_v41, %v1780_v42  ;;  %v1385_v15 = vpop.xlane.xlu1 %1384  ;;  %v1623_v2 = vsub.f32 %v1573_v22, %v1598_v7  ;;  %v1947_v5 = vmax.f32 %v1897_v1, 0.0  ;;  %v4472_v7 = vld [vmem:[#allocation12_spill] sm:$0xff] }
 0x39d   :  { %v3981_v24 = vpop.eup %2387  ;;  %v1722_v36 = vadd.f32 1e-05, %v1647_v28  ;;  %v1946_v57 = vmax.f32 %v1896_v33, 0.0  ;;  %v3983_v51 = vmul.f32 0.00390625, %v1385_v15  ;;  %v2007_v44 = vmul.f32 %v3788_v60, %v1945_v56 }
 0x39e   :  { %v1388_v35 = vpop.xlane.xlu0 %1387  ;;  %v4470_v29 = vsub.f32 %v3528_v52, %v3867_v39  ;;  %v1648_v10 = vmax.f32 %v1623_v2, 0.0  ;;  %v2009_v23 = vmul.f32 %v3788_v60, %v1947_v5  ;;  %v2010_v33 = vmul.f32 %v3791_v45, %v1948_v0 }
 0x39f   :  { %2393 = vrsqrt.f32 %v1722_v36  ;;  %v2008_v42 = vmul.f32 %v3791_v45, %v1946_v57  ;;  %v1599_v22 = vmul.f32 %v3983_v51, %v3983_v51  ;;  %v4475_v49 = vsub.f32 %v3532_v59, %v3867_v39 }
 0x3a0   :  { %v1777_v61 = vmul.f32 %v3942_v58, %v4470_v29  ;;  %v1513_v52 = vpop.xlane.xlu1 %1512  ;;  %v1723_v15 = vadd.f32 1e-05, %v1648_v10  ;;  %v3999_v29 = vmul.f32 0.00390625, %v1388_v35  ;;  %v2068_v1 = vadd.f32 %v2010_v33, %v2009_v23  ;;  %v4473_v10 = vld [vmem:[#allocation13_spill] sm:$0xff]  ;;  %v4474_v35 = vld [vmem:[#allocation14_spill] sm:$0xff] }
 0x3a1   :  { %v2390_v56 = vpop.eup %2389  ;;  %v2065_v36 = vadd.f32 %v2008_v42, %v2007_v44  ;;  %v1624_v2 = vsub.f32 %v1574_v54, %v1599_v22  ;;  %v1575_v8 = vmul.f32 0.00390625, %v1513_v52 }
 0x3a2   :  { %v1783_v57 = vmul.f32 %v2390_v56, %v1683_v32  ;;  %v1784_v28 = vmul.f32 %v2390_v56, %v1684_v37  ;;  %v1516_v5 = vpop.xlane.xlu0 %1515  ;;  %2395 = vrsqrt.f32 %v1723_v15  ;;  %v1693_v44 = vsub.f32 %v4473_v10, %v3999_v29  ;;  %2069 = vadd.xlane.f32.xlu1 %v2068_v1 }
 0x3a3   :  { %2066 = vadd.xlane.f32.xlu0 %v2065_v36  ;;  %v1649_v0 = vmax.f32 %v1624_v2, 0.0  ;;  %v1600_v19 = vmul.f32 %v3999_v29, %v3999_v29  ;;  %v1778_v32 = vmul.f32 %v3942_v58, %v4475_v49  ;;  %v1838_v33 = vmul.f32 %v3722_v9, %v1777_v61 }
 0x3a4   :  { %v1844_v42 = vmul.f32 %v3722_v9, %v1783_v57  ;;  %v1845_v63 = vmul.f32 %v3760_v41, %v1784_v28  ;;  %v1391_v37 = vpop.xlane.xlu1 %1390  ;;  %v4019_v22 = vpop.eup %2391  ;;  %v1576_v52 = vmul.f32 0.00390625, %v1516_v5  ;;  %v1901_v1 = vadd.f32 %v3763_v55, %v1840_v14 }
 0x3a5   :  { %v1724_v23 = vadd.f32 1e-05, %v1649_v0  ;;  %v4022_v56 = vmul.f32 0.00390625, %v1391_v37  ;;  %v1625_v15 = vsub.f32 %v1575_v8, %v1600_v19  ;;  %v1839_v28 = vmul.f32 %v3760_v41, %v1778_v32 }
 0x3a6   :  { %v1902_v36 = vadd.f32 %v3766_v43, %v1841_v18  ;;  %v1394_v2 = vpop.xlane.xlu0 %1393  ;;  %v1899_v59 = vadd.f32 %v3763_v55, %v1838_v33  ;;  %v1951_v5 = vmax.f32 %v1901_v1, 0.0  ;;  %v1906_v31 = vadd.f32 %v3766_v43, %v1845_v63 }
 0x3a7   :  { %2397 = vrsqrt.f32 %v1724_v23  ;;  %v1601_v39 = vmul.f32 %v4022_v56, %v4022_v56  ;;  %v1695_v58 = vsub.f32 %v3656_v62, %v4022_v56  ;;  %v1650_v61 = vmax.f32 %v1625_v15, 0.0 }
 0x3a8   :  { %v1900_v57 = vadd.f32 %v3766_v43, %v1839_v28  ;;  %v1696_v8 = vsub.f32 %v3660_v47, %v4022_v56  ;;  %v1519_v14 = vpop.xlane.xlu1 %1518  ;;  %v1949_v18 = vmax.f32 %v1899_v59, 0.0  ;;  %v1952_v49 = vmax.f32 %v1902_v36, 0.0 }
 0x3a9   :  { %v2394_v0 = vpop.eup %2393  ;;  %v1626_v19 = vsub.f32 %v1576_v52, %v1601_v39  ;;  %v4035_v32 = vmul.f32 0.00390625, %v1394_v2  ;;  %v1725_v33 = vadd.f32 1e-05, %v1650_v61  ;;  %v2013_v59 = vmul.f32 %v3788_v60, %v1951_v5  ;;  %v4476_v61 = vld [vmem:[#allocation15_spill] sm:$0xff] }
 0x3aa   :  { %v1787_v37 = vmul.f32 %v2394_v0, %v1687_v12  ;;  %v1788_v23 = vmul.f32 %v2394_v0, %v1688_v48  ;;  %v1950_v15 = vmax.f32 %v1900_v57, 0.0  ;;  %v1522_v28 = vpop.xlane.xlu0 %1521  ;;  %v2011_v1 = vmul.f32 %v3788_v60, %v1949_v18 }
 0x3ab   :  { %v1651_v54 = vmax.f32 %v1626_v19, 0.0  ;;  %v2014_v52 = vmul.f32 %v3791_v45, %v1952_v49  ;;  %2399 = vrsqrt.f32 %v1725_v33  ;;  %v1697_v39 = vsub.f32 %v3680_v21, %v4035_v32 }
 0x3ac   :  { %v4047_v36 = vmul.f32 %v3722_v9, %v1787_v37  ;;  %v4050_v26 = vmul.f32 %v3760_v41, %v1788_v23  ;;  %v2012_v34 = vmul.f32 %v3791_v45, %v1950_v15  ;;  %v1397_v25 = vpop.xlane.xlu1 %1396  ;;  %v4053_v12 = vpop.eup %2395  ;;  %v1577_v0 = vmul.f32 0.00390625, %v1519_v14 }
 0x3ad   :  { %v1726_v48 = vadd.f32 1e-05, %v1651_v54  ;;  %v2074_v2 = vadd.f32 %v2014_v52, %v2013_v59  ;;  %v1602_v18 = vmul.f32 %v4035_v32, %v4035_v32  ;;  %v1781_v19 = vmul.f32 %v3981_v24, %v1681_v38 }
 0x3ae   :  { %v2071_v5 = vadd.f32 %v2012_v34, %v2011_v1  ;;  %v4477_v54 = vsub.f32 %v4464_v30, %v3893_v6  ;;  %v1578_v37 = vmul.f32 0.00390625, %v1522_v28  ;;  %v4069_v23 = vmul.f32 0.00390625, %v1397_v25  ;;  %v1400_v33 = vpop.xlane.xlu0 %1399 }
 0x3af   :  { %2401 = vrsqrt.f32 %v1726_v48  ;;  %2075 = vadd.xlane.f32.xlu1 %v2074_v2  ;;  %v1627_v14 = vsub.f32 %v1577_v0, %v1602_v18  ;;  %v1842_v15 = vmul.f32 %v3722_v9, %v1781_v19  ;;  %v1905_v1 = vadd.f32 %v3763_v55, %v1844_v42 }
 0x3b0   :  { %v1782_v49 = vmul.f32 %v3981_v24, %v4477_v54  ;;  %2072 = vadd.xlane.f32.xlu0 %v2071_v5  ;;  %v1525_v38 = vpop.xlane.xlu1 %1524  ;;  %v1603_v6 = vmul.f32 %v4069_v23, %v4069_v23  ;;  %v1699_v30 = vsub.f32 %v3688_v11, %v4069_v23  ;;  %v1700_v24 = vsub.f32 %v3692_v20, %v4069_v23 }
 0x3b1   :  { %v2398_v59 = vpop.eup %2397  ;;  %v4478_v28 = vsub.f32 %v4471_v13, %v3983_v51  ;;  %v4479_v42 = vsub.f32 %v4472_v7, %v3983_v51  ;;  %v1652_v25 = vmax.f32 %v1627_v14, 0.0  ;;  %v1903_v48 = vadd.f32 %v3763_v55, %v1842_v15 }
 0x3b2   :  { %v1843_v52 = vmul.f32 %v3760_v41, %v1782_v49  ;;  %v1628_v5 = vsub.f32 %v1578_v37, %v1603_v6  ;;  %v1955_v0 = vmax.f32 %v1905_v1, 0.0  ;;  %v1956_v18 = vmax.f32 %v1906_v31, 0.0  ;;  %v1406_v14 = vpop.xlane.xlu0 %1405 }
 0x3b3   :  { %v1791_v34 = vmul.f32 %v2398_v59, %v4478_v28  ;;  %v1792_v63 = vmul.f32 %v2398_v59, %v4479_v42  ;;  %v1727_v13 = vadd.f32 1e-05, %v1652_v25  ;;  %v1953_v49 = vmax.f32 %v1903_v48, 0.0  ;;  %v4481_v25 = vld [vmem:[#allocation16_spill] sm:$0xff] }
 0x3b4   :  { %v1904_v2 = vadd.f32 %v3766_v43, %v1843_v52  ;;  %v1653_v57 = vmax.f32 %v1628_v5, 0.0  ;;  %v2017_v51 = vmul.f32 %v3788_v60, %v1955_v0  ;;  %v2018_v7 = vmul.f32 %v3791_v45, %v1956_v18  ;;  %v1403_v59 = vpop.xlane.xlu1 %1402 }
 0x3b5   :  { %v4090_v19 = vmul.f32 %v3722_v9, %v1791_v34  ;;  %v4093_v54 = vmul.f32 %v3760_v41, %v1792_v63  ;;  %v4097_v15 = vpop.eup %2399  ;;  %2403 = vrsqrt.f32 %v1727_v13  ;;  %v2015_v37 = vmul.f32 %v3788_v60, %v1953_v49 }
 0x3b6   :  { %v1954_v28 = vmax.f32 %v1904_v2, 0.0  ;;  %v4100_v1 = vmul.f32 0.00390625, %v1400_v33  ;;  %v1579_v31 = vmul.f32 0.00390625, %v1525_v38  ;;  %v1728_v6 = vadd.f32 1e-05, %v1653_v57  ;;  %v4482_v2 = vld [vmem:[#allocation6_spill] sm:$0xff]  ;;  %v1528_v62 = vpop.xlane.xlu0 %1527 }
 0x3b7   :  { %v2080_v34 = vadd.f32 %v2018_v7, %v2017_v51  ;;  %v4480_v42 = vsub.f32 %v3592_v16, %v3927_v40  ;;  %v4483_v38 = vsub.f32 %v3596_v17, %v3927_v40  ;;  %v4118_v13 = vmul.f32 0.00390625, %v1406_v14 }
 0x3b8   :  { %v2016_v52 = vmul.f32 %v3791_v45, %v1954_v28  ;;  %v1701_v48 = vsub.f32 %v4481_v25, %v4100_v1  ;;  %v1702_v5 = vsub.f32 %v4482_v2, %v4100_v1  ;;  %v1604_v33 = vmul.f32 %v4100_v1, %v4100_v1 }
 0x3b9   :  { %v1785_v63 = vmul.f32 %v4019_v22, %v4480_v42  ;;  %v1786_v57 = vmul.f32 %v4019_v22, %v4483_v38  ;;  %v2402_v0 = vpop.eup %2401  ;;  %2405 = vrsqrt.f32 %v1728_v6  ;;  %2081 = vadd.xlane.f32.xlu1 %v2080_v34  ;;  %v4132_v14 = vmul.f32 0.00390625, %v1403_v59  ;;  %v4484_v6 = vld [vmem:[#allocation7_spill] sm:$0xff] }
 0x3ba   :  { %v2077_v18 = vadd.f32 %v2016_v52, %v2015_v37  ;;  %v1795_v49 = vmul.f32 %v2402_v0, %v1695_v58  ;;  %v1796_v28 = vmul.f32 %v2402_v0, %v1696_v8  ;;  %v1629_v17 = vsub.f32 %v1579_v31, %v1604_v33  ;;  %v1531_v37 = vpop.xlane.xlu1 %1530 }
 0x3bb   :  { %v1846_v16 = vmul.f32 %v3722_v9, %v1785_v63  ;;  %v1847_v40 = vmul.f32 %v3760_v41, %v1786_v57  ;;  %v1703_v52 = vsub.f32 %v3734_v3, %v4132_v14  ;;  %v1704_v34 = vsub.f32 %v4484_v6, %v4132_v14 }
 0x3bc   :  { %2078 = vadd.xlane.f32.xlu0 %v2077_v18  ;;  %v4135_v58 = vmul.f32 %v3722_v9, %v1795_v49  ;;  %v4138_v47 = vmul.f32 %v3760_v41, %v1796_v28  ;;  %v1654_v56 = vmax.f32 %v1629_v17, 0.0  ;;  %v1909_v59 = vadd.f32 %v3763_v55, %v4047_v36  ;;  %v4152_v49 = vld [vmem:[#allocation2] ss:$0 sm:$0xff]  ;;  %v2043_v28 = vpop.xlane.xlu0 %2042 }
 0x3bd   :  { %v1907_v22 = vadd.f32 %v3763_v55, %v1846_v16  ;;  %v1908_v8 = vadd.f32 %v3766_v43, %v1847_v40  ;;  %v1910_v33 = vadd.f32 %v3766_v43, %v4050_v26  ;;  %v1605_v38 = vmul.f32 %v4132_v14, %v4132_v14 }
 0x3be   :  { %v1729_v42 = vadd.f32 1e-05, %v1654_v56  ;;  %v1959_v0 = vmax.f32 %v1909_v59, 0.0  ;;  %v1580_v18 = vmul.f32 0.00390625, %v1528_v62  ;;  %v1581_v16 = vmul.f32 0.00390625, %v1531_v37 }
 0x3bf   :  { %v1957_v31 = vmax.f32 %v1907_v22, 0.0  ;;  %v1958_v63 = vmax.f32 %v1908_v8, 0.0  ;;  %v2404_v17 = vpop.eup %2403  ;;  %v1960_v40 = vmax.f32 %v1910_v33, 0.0  ;;  %v1606_v22 = vmul.f32 %v4118_v13, %v4118_v13 }
 0x3c0   :  { %2407 = vrsqrt.f32 %v1729_v42  ;;  %v2021_v26 = vmul.f32 %v3788_v60, %v1959_v0  ;;  %v1630_v56 = vsub.f32 %v1580_v18, %v1605_v38  ;;  %v4485_v8 = vsub.f32 %v4468_v50, %v3962_v53 }
 0x3c1   :  { %v2019_v57 = vmul.f32 %v3788_v60, %v1957_v31  ;;  %v2020_v36 = vmul.f32 %v3791_v45, %v1958_v63  ;;  %v4486_v37 = vsub.f32 %v4469_v46, %v3962_v53  ;;  %v2022_v42 = vmul.f32 %v3791_v45, %v1960_v40 }
 0x3c2   :  { %v1789_v62 = vmul.f32 %v4053_v12, %v4485_v8  ;;  %v1631_v63 = vsub.f32 %v1581_v16, %v1606_v22  ;;  %v2123_v33 = vadd.f32 %v4152_v49, %v2043_v28  ;;  %v1655_v51 = vmax.f32 %v1630_v56, 0.0 }
 0x3c3   :  { %v1790_v31 = vmul.f32 %v4053_v12, %v4486_v37  ;;  %v2083_v59 = vadd.f32 %v2020_v36, %v2019_v57  ;;  %v2406_v7 = vpop.eup %2405  ;;  %v1913_v50 = vadd.f32 %v3763_v55, %v4090_v19  ;;  %v2086_v12 = vadd.f32 %v2022_v42, %v2021_v26 }
 0x3c4   :  { %v1850_v38 = vmul.f32 %v3722_v9, %v1789_v62  ;;  %v1799_v53 = vmul.f32 %v2406_v7, %v1699_v30  ;;  %v1800_v46 = vmul.f32 %v2406_v7, %v1700_v24  ;;  %v1656_v57 = vmax.f32 %v1631_v63, 0.0  ;;  %2149 = vst.msk [vmem:[%s4395_s11] sm:$0xff] %vm2148_vm1, %v2123_v33  ;;  %v2046_v7 = vpop.xlane.xlu1 %2045 }
 0x3c5   :  { %v1851_v0 = vmul.f32 %v3760_v41, %v1790_v31  ;;  %2084 = vadd.xlane.f32.xlu0 %v2083_v59  ;;  %v1730_v18 = vadd.f32 1e-05, %v1655_v51  ;;  %v1914_v11 = vadd.f32 %v3766_v43, %v4093_v54  ;;  %2087 = vadd.xlane.f32.xlu1 %v2086_v12  ;;  %v1963_v24 = vmax.f32 %v1913_v50, 0.0 }
 0x3c6   :  { %v1911_v16 = vadd.f32 %v3763_v55, %v1850_v38  ;;  %v1860_v30 = vmul.f32 %v3722_v9, %v1799_v53  ;;  %v1861_v20 = vmul.f32 %v3760_v41, %v1800_v46  ;;  %v1731_v23 = vadd.f32 1e-05, %v1656_v57 }
 0x3c7   :  { %v1912_v19 = vadd.f32 %v3766_v43, %v1851_v0  ;;  %2409 = vrsqrt.f32 %v1730_v18  ;;  %v1964_v40 = vmax.f32 %v1914_v11, 0.0  ;;  %v2025_v51 = vmul.f32 %v3788_v60, %v1963_v24 }
 0x3c8   :  { %v1961_v28 = vmax.f32 %v1911_v16, 0.0  ;;  %2411 = vrsqrt.f32 %v1731_v23  ;;  %v1793_v54 = vmul.f32 %v4097_v15, %v1693_v44  ;;  %v4487_v22 = vsub.f32 %v4474_v35, %v3999_v29 }
 0x3c9   :  { %v1962_v36 = vmax.f32 %v1912_v19, 0.0  ;;  %v2026_v62 = vmul.f32 %v3791_v45, %v1964_v40  ;;  %v2124_v37 = vadd.f32 %v4152_v49, %v2046_v7  ;;  %v1917_v44 = vadd.f32 %v3763_v55, %v4135_v58 }
 0x3ca   :  { %v1794_v26 = vmul.f32 %v4097_v15, %v4487_v22  ;;  %v2023_v56 = vmul.f32 %v3788_v60, %v1961_v28  ;;  %v2408_v31 = vpop.eup %2407  ;;  %v1854_v59 = vmul.f32 %v3722_v9, %v1793_v54  ;;  %v1918_v29 = vadd.f32 %v3766_v43, %v4138_v47 }
 0x3cb   :  { %v2024_v8 = vmul.f32 %v3791_v45, %v1962_v36  ;;  %v2092_v15 = vadd.f32 %v2026_v62, %v2025_v51  ;;  %2150 = vst.msk [vmem:[%s4395_s11 + $0x8] sm:$0xff] %vm2148_vm1, %v2124_v37  ;;  %v1797_v42 = vmul.f32 %v2404_v17, %v1697_v39  ;;  %v4488_v63 = vsub.f32 %v4476_v61, %v4035_v32 }
 0x3cc   :  { %v1855_v10 = vmul.f32 %v3760_v41, %v1794_v26  ;;  %v2049_v38 = vpop.xlane.xlu0 %2048  ;;  %v1915_v58 = vadd.f32 %v3763_v55, %v1854_v59  ;;  %v1967_v0 = vmax.f32 %v1917_v44, 0.0  ;;  %v1968_v50 = vmax.f32 %v1918_v29, 0.0 }
 0x3cd   :  { %v2089_v35 = vadd.f32 %v2024_v8, %v2023_v56  ;;  %v1798_v33 = vmul.f32 %v2404_v17, %v4488_v63  ;;  %2093 = vadd.xlane.f32.xlu1 %v2092_v15  ;;  %v1858_v53 = vmul.f32 %v3722_v9, %v1797_v42  ;;  %v2125_v21 = vadd.f32 %v4152_v49, %v2049_v38 }
 0x3ce   :  { %v1916_v47 = vadd.f32 %v3766_v43, %v1855_v10  ;;  %v1965_v39 = vmax.f32 %v1915_v58, 0.0  ;;  %v2029_v32 = vmul.f32 %v3788_v60, %v1967_v0  ;;  %v2030_v61 = vmul.f32 %v3791_v45, %v1968_v50 }
 0x3cf   :  { %2090 = vadd.xlane.f32.xlu0 %v2089_v35  ;;  %v1859_v46 = vmul.f32 %v3760_v41, %v1798_v33  ;;  %v1919_v17 = vadd.f32 %v3763_v55, %v1858_v53  ;;  %2151 = vst.msk [vmem:[%s4395_s11 + $0x10] sm:$0xff] %vm2148_vm1, %v2125_v21  ;;  %v1921_v18 = vadd.f32 %v3763_v55, %v1860_v30 }
 0x3d0   :  { %v1966_v12 = vmax.f32 %v1916_v47, 0.0  ;;  %v1922_v16 = vadd.f32 %v3766_v43, %v1861_v20  ;;  %v2027_v19 = vmul.f32 %v3788_v60, %v1965_v39  ;;  %v2098_v23 = vadd.f32 %v2030_v61, %v2029_v32 }
 0x3d1   :  { %v1920_v57 = vadd.f32 %v3766_v43, %v1859_v46  ;;  %v1801_v24 = vmul.f32 %v2408_v31, %v1701_v48  ;;  %v2410_v7 = vpop.eup %2409  ;;  %v1969_v28 = vmax.f32 %v1919_v17, 0.0  ;;  %v1971_v40 = vmax.f32 %v1921_v18, 0.0 }
 0x3d2   :  { %v2028_v11 = vmul.f32 %v3791_v45, %v1966_v12  ;;  %v1972_v51 = vmax.f32 %v1922_v16, 0.0  ;;  %v2412_v54 = vpop.eup %2411  ;;  %2099 = vadd.xlane.f32.xlu1 %v2098_v23  ;;  %v1802_v30 = vmul.f32 %v2408_v31, %v1702_v5  ;;  %v1803_v26 = vmul.f32 %v2410_v7, %v1703_v52 }
 0x3d3   :  { %v1970_v36 = vmax.f32 %v1920_v57, 0.0  ;;  %v1862_v20 = vmul.f32 %v3722_v9, %v1801_v24  ;;  %v2031_v25 = vmul.f32 %v3788_v60, %v1969_v28  ;;  %v2033_v56 = vmul.f32 %v3788_v60, %v1971_v40 }
 0x3d4   :  { %v2095_v22 = vadd.f32 %v2028_v11, %v2027_v19  ;;  %v2034_v8 = vmul.f32 %v3791_v45, %v1972_v51  ;;  %v1863_v62 = vmul.f32 %v3760_v41, %v1802_v30  ;;  %v1804_v2 = vmul.f32 %v2410_v7, %v1704_v34 }
 0x3d5   :  { %v2032_v48 = vmul.f32 %v3791_v45, %v1970_v36  ;;  %v1923_v1 = vadd.f32 %v3763_v55, %v1862_v20  ;;  %v1864_v3 = vmul.f32 %v3722_v9, %v1803_v26  ;;  %v4489_v37 = vsub.f32 %v3744_v4, %v4118_v13 }
 0x3d6   :  { %2096 = vadd.xlane.f32.xlu0 %v2095_v22  ;;  %v2104_v52 = vadd.f32 %v2034_v8, %v2033_v56  ;;  %v4490_v59 = vsub.f32 %v3748_v27, %v4118_v13  ;;  %v1924_v44 = vadd.f32 %v3766_v43, %v1863_v62  ;;  %v1865_v35 = vmul.f32 %v3760_v41, %v1804_v2 }
 0x3d7   :  { %v2101_v5 = vadd.f32 %v2032_v48, %v2031_v25  ;;  %v1805_v31 = vmul.f32 %v2412_v54, %v4489_v37  ;;  %v1973_v29 = vmax.f32 %v1923_v1, 0.0  ;;  %v1925_v14 = vadd.f32 %v3763_v55, %v1864_v3 }
 0x3d8   :  { %v1806_v10 = vmul.f32 %v2412_v54, %v4490_v59  ;;  %2105 = vadd.xlane.f32.xlu1 %v2104_v52  ;;  %v1974_v15 = vmax.f32 %v1924_v44, 0.0  ;;  %v1926_v42 = vadd.f32 %v3766_v43, %v1865_v35 }
 0x3d9   :  { %v1866_v6 = vmul.f32 %v3722_v9, %v1805_v31  ;;  %v2035_v4 = vmul.f32 %v3788_v60, %v1973_v29  ;;  %v1975_v27 = vmax.f32 %v1925_v14, 0.0 }
 0x3da   :  { %v1867_v34 = vmul.f32 %v3760_v41, %v1806_v10  ;;  %2102 = vadd.xlane.f32.xlu0 %v2101_v5  ;;  %v2036_v33 = vmul.f32 %v3791_v45, %v1974_v15  ;;  %v1976_v38 = vmax.f32 %v1926_v42, 0.0 }
 0x3db   :  { %v1927_v13 = vadd.f32 %v3763_v55, %v1866_v6  ;;  %v2037_v58 = vmul.f32 %v3788_v60, %v1975_v27 }
 0x3dc   :  { %v1928_v63 = vadd.f32 %v3766_v43, %v1867_v34  ;;  %v2107_v0 = vadd.f32 %v2036_v33, %v2035_v4  ;;  %v2038_v41 = vmul.f32 %v3791_v45, %v1976_v38 }
 0x3dd   :  { %v1977_v47 = vmax.f32 %v1927_v13, 0.0 }
 0x3de   :  { %v1978_v9 = vmax.f32 %v1928_v63, 0.0  ;;  %2108 = vadd.xlane.f32.xlu0 %v2107_v0  ;;  %v2110_v46 = vadd.f32 %v2038_v41, %v2037_v58 }
 0x3df   :  { %v2039_v50 = vmul.f32 %v3788_v60, %v1977_v47 }
 0x3e0   :  { %v2040_v53 = vmul.f32 %v3791_v45, %v1978_v9  ;;  %2111 = vadd.xlane.f32.xlu1 %v2110_v46 }
 0x3e2   :  { %v2113_v21 = vadd.f32 %v2040_v53, %v2039_v50 }
 0x3e4   :  { %2114 = vadd.xlane.f32.xlu0 %v2113_v21 }
 0x409   :  { %v2052_v43 = vpop.xlane.xlu1 %2051 }
 0x40a   :  { %v2126_v55 = vadd.f32 %v4152_v49, %v2052_v43 }
 0x40c   :  { %2152 = vst.msk [vmem:[%s4395_s11 + $0x18] sm:$0xff] %vm2148_vm1, %v2126_v55 }
 0x40f   :  { %v2055_v39 = vpop.xlane.xlu0 %2054 }
 0x410   :  { %v2127_v12 = vadd.f32 %v4152_v49, %v2055_v39 }
 0x412   :  { %2153 = vst.msk [vmem:[%s4395_s11 + $0x20] sm:$0xff] %vm2148_vm1, %v2127_v12 }
 0x418   :  { %v2058_v60 = vpop.xlane.xlu1 %2057 }
 0x419   :  { %v2128_v45 = vadd.f32 %v4152_v49, %v2058_v60 }
 0x41b   :  { %2154 = vst.msk [vmem:[%s4395_s11 + $0x28] sm:$0xff] %vm2148_vm1, %v2128_v45 }
 0x421   :  { %v2061_v32 = vpop.xlane.xlu0 %2060 }
 0x422   :  { %v2129_v61 = vadd.f32 %v4152_v49, %v2061_v32 }
 0x424   :  { %2155 = vst.msk [vmem:[%s4395_s11 + $0x30] sm:$0xff] %vm2148_vm1, %v2129_v61 }
 0x425   :  { %v2064_v17 = vpop.xlane.xlu1 %2063 }
 0x426   :  { %v2130_v57 = vadd.f32 %v4152_v49, %v2064_v17 }
 0x428   :  { %2156 = vst.msk [vmem:[%s4395_s11 + $0x38] sm:$0xff] %vm2148_vm1, %v2130_v57 }
 0x42f   :  { %v2070_v19 = vpop.xlane.xlu1 %2069 }
 0x430   :  { %v2067_v18 = vpop.xlane.xlu0 %2066  ;;  %v2132_v11 = vadd.f32 %v4152_v49, %v2070_v19 }
 0x431   :  { %v2131_v16 = vadd.f32 %v4152_v49, %v2067_v18 }
 0x432   :  { %2158 = vst.msk [vmem:[%s4395_s11 + $0x48] sm:$0xff] %vm2148_vm1, %v2132_v11 }
 0x433   :  { %2157 = vst.msk [vmem:[%s4395_s11 + $0x40] sm:$0xff] %vm2148_vm1, %v2131_v16 }
 0x43c   :  { %v2076_v23 = vpop.xlane.xlu1 %2075 }
 0x43d   :  { %v2073_v24 = vpop.xlane.xlu0 %2072  ;;  %v2134_v7 = vadd.f32 %v4152_v49, %v2076_v23 }
 0x43e   :  { %v2133_v28 = vadd.f32 %v4152_v49, %v2073_v24 }
 0x43f   :  { %2160 = vst.msk [vmem:[%s4395_s11 + $0x58] sm:$0xff] %vm2148_vm1, %v2134_v7 }
 0x440   :  { %2159 = vst.msk [vmem:[%s4395_s11 + $0x50] sm:$0xff] %vm2148_vm1, %v2133_v28 }
 0x446   :  { %v2082_v36 = vpop.xlane.xlu1 %2081 }
 0x447   :  { %v2136_v40 = vadd.f32 %v4152_v49, %v2082_v36 }
 0x449   :  { %v2079_v51 = vpop.xlane.xlu0 %2078  ;;  %2162 = vst.msk [vmem:[%s4395_s11 + $0x68] sm:$0xff] %vm2148_vm1, %v2136_v40 }
 0x44a   :  { %v2135_v54 = vadd.f32 %v4152_v49, %v2079_v51 }
 0x44c   :  { %2161 = vst.msk [vmem:[%s4395_s11 + $0x60] sm:$0xff] %vm2148_vm1, %v2135_v54 }
 0x452   :  { %v2085_v22 = vpop.xlane.xlu0 %2084  ;;  %v2088_v20 = vpop.xlane.xlu1 %2087 }
 0x453   :  { %v2137_v30 = vadd.f32 %v4152_v49, %v2085_v22  ;;  %v2138_v26 = vadd.f32 %v4152_v49, %v2088_v20 }
 0x455   :  { %2163 = vst.msk [vmem:[%s4395_s11 + $0x70] sm:$0xff] %vm2148_vm1, %v2137_v30  ;;  %2164 = vst.msk [vmem:[%s4395_s11 + $0x78] sm:$0xff] %vm2148_vm1, %v2138_v26 }
 0x45a   :  { %v2094_v48 = vpop.xlane.xlu1 %2093 }
 0x45b   :  { %v2140_v8 = vadd.f32 %v4152_v49, %v2094_v48 }
 0x45c   :  { %v2091_v25 = vpop.xlane.xlu0 %2090 }
 0x45d   :  { %v2139_v56 = vadd.f32 %v4152_v49, %v2091_v25  ;;  %2166 = vst.msk [vmem:[%s4395_s11 + $0x88] sm:$0xff] %vm2148_vm1, %v2140_v8 }
 0x45f   :  { %2165 = vst.msk [vmem:[%s4395_s11 + $0x80] sm:$0xff] %vm2148_vm1, %v2139_v56  ;;  %v2100_v62 = vpop.xlane.xlu1 %2099 }
 0x460   :  { %v2142_v1 = vadd.f32 %v4152_v49, %v2100_v62 }
 0x462   :  { %2168 = vst.msk [vmem:[%s4395_s11 + $0x98] sm:$0xff] %vm2148_vm1, %v2142_v1 }
 0x463   :  { %v2097_v2 = vpop.xlane.xlu0 %2096 }
 0x464   :  { %v2141_v3 = vadd.f32 %v4152_v49, %v2097_v2 }
 0x465   :  { %v2106_v5 = vpop.xlane.xlu1 %2105 }
 0x466   :  { %2167 = vst.msk [vmem:[%s4395_s11 + $0x90] sm:$0xff] %vm2148_vm1, %v2141_v3  ;;  %v2144_v37 = vadd.f32 %v4152_v49, %v2106_v5 }
 0x467   :  { %v2103_v52 = vpop.xlane.xlu0 %2102 }
 0x468   :  { %v2143_v31 = vadd.f32 %v4152_v49, %v2103_v52  ;;  %2170 = vst.msk [vmem:[%s4395_s11 + $0xa8] sm:$0xff] %vm2148_vm1, %v2144_v37 }
 0x46a   :  { %2169 = vst.msk [vmem:[%s4395_s11 + $0xa0] sm:$0xff] %vm2148_vm1, %v2143_v31 }
 0x46b   :  { %v2109_v59 = vpop.xlane.xlu0 %2108 }
 0x46c   :  { %v2145_v10 = vadd.f32 %v4152_v49, %v2109_v59 }
 0x46d   :  { %v2112_v44 = vpop.xlane.xlu1 %2111 }
 0x46e   :  { %2171 = vst.msk [vmem:[%s4395_s11 + $0xb0] sm:$0xff] %vm2148_vm1, %v2145_v10  ;;  %v2146_v29 = vadd.f32 %v4152_v49, %v2112_v44 }
 0x470   :  { %2172 = vst.msk [vmem:[%s4395_s11 + $0xb8] sm:$0xff] %vm2148_vm1, %v2146_v29 }
 0x471   :  { %v2115_v35 = vpop.xlane.xlu0 %2114 }
 0x472   :  { %v2147_v14 = vadd.f32 %v4152_v49, %v2115_v35 }
 0x474   :  { %2173 = vst.msk [vmem:[%s4395_s11 + $0xc0] sm:$0xff] %vm2148_vm1, %v2147_v14 }
 0x475   :  { %2178 = vsyncpa [#allocation4], 1 }

</bundles_post_ra>
